<compile_context>
chip_gen: v6e
topology: v6e:2x2x1
jax: 0.10.0
libtpu: 0.0.40
codegen_flags: <defaults>
</compile_context>

<pallas_src>
import jax
import jax.numpy as jnp
from jax.experimental import pallas as pl
from jax.experimental.pallas import tpu as pltpu

LANES = 128  # pad all matmul output-channel dims to the 128-lane vreg width


def _round_up(x, m):
    return (x + m - 1) // m * m


def _images_per_step(n, target):
    """Largest divisor of n <= target, capped so the grid keeps >= 2 parallel
    steps when n >= 2 (so both v7x TensorCores get work)."""
    cap = max(1, min(target, n // 2 if n >= 2 else 1))
    for cb in range(cap, 0, -1):
        if n % cb == 0:
            return cb
    return 1


# ---------------------------------------------------------------------------
# Pallas kernels
# ---------------------------------------------------------------------------

def _make_conv_kernel(CB, H, W, Cout, KH):
    """Fused 5x5 'same' conv (KH accumulated MXU matmuls) + bias + H-dir 2x max-pool.

    Refs (CB images per grid step):
      x_ref: (CB, R, Kp)   bf16  R = H*W (KH==1, full im2col) or (H+4)*W (width im2col)
      w_ref: (KH, Kp, 128) bf16  per-kernel-row weights (Cout zero-padded to 128)
      b_ref: (1, 128)      f32   bias (zero-padded)
      o_ref: (CB, (H//2)*W, Cout) bf16  H-pooled conv output, real channels only
    """
    HW = H * W
    H2 = H // 2

    def kernel(x_ref, w_ref, b_ref, o_ref):
        def lhs(ki):
            # Kernel row ki selects rows [ki*W, ki*W + H*W) -- an aligned
            # (multiple-of-8) sublane slice of the VMEM-resident block.
            xs = x_ref[...] if KH == 1 else x_ref[:, ki * W:ki * W + HW, :]
            return xs.reshape(CB * HW, xs.shape[-1])   # fold CB into M

        acc = jnp.dot(lhs(0), w_ref[0], preferred_element_type=jnp.float32)
        for ki in range(1, KH):
            acc = acc + jnp.dot(lhs(ki), w_ref[ki],
                                preferred_element_type=jnp.float32)

        # H-direction 2x max-pool: pair adjacent output rows as two aligned
        # W-row slabs (pure VPU max, no sublane shuffles).
        a = acc.reshape(CB * H2, 2 * W, LANES)
        pooled = jnp.maximum(a[:, :W, :], a[:, W:, :]).reshape(CB * H2 * W, LANES)
        out = pooled + b_ref[...]          # bias add commutes with the max
        o_ref[...] = out[:, :Cout].astype(o_ref.dtype).reshape(CB, H2 * W, Cout)

    return kernel


def _fc_fused_kernel(x_ref, w1_ref, b1_ref, w2_ref, b2_ref, o_ref):
    """Both Linear layers fused: (x @ w1 + b1) @ w2 + b2 (lane-dense / padded)."""
    h = jnp.dot(x_ref[...], w1_ref[...], preferred_element_type=jnp.float32)
    h = (h + b1_ref[...]).astype(jnp.bfloat16)
    o_ref[...] = (jnp.dot(h, w2_ref[...], preferred_element_type=jnp.float32)
                  + b2_ref[...])


# ---------------------------------------------------------------------------
# Layer wrappers (padding / im2col / W-pool glue stays in XLA, all bf16)
# ---------------------------------------------------------------------------

def conv5x5_same_pool2(x_nhwc, w_hwio, bias, *, full_im2col, cb_target):
    """Conv2d(k=5, pad=2, stride=1) + bias + 2x2 max-pool.

    Conv, bias and the H-direction half of the pool run in one Pallas kernel;
    the W-direction half is a tiny XLA reshape+max on the reduced bf16 output.
    x_nhwc: (N, H, W, Cin); w_hwio: (5, 5, Cin, Cout); bias: (Cout,)
    Returns (N, H//2, W//2, Cout) in bf16.
    """
    N, H, W, Cin = x_nhwc.shape
    kh, kw, _, Cout = w_hwio.shape
    assert (kh, kw) == (5, 5) and H % 2 == 0 and W % 2 == 0 and W % 8 == 0
    pad = 2
    xb = x_nhwc.astype(jnp.bfloat16)
    xpad = jnp.pad(xb, ((0, 0), (pad, pad), (pad, pad), (0, 0)))

    if full_im2col:
        # Full 25-tap im2col (cheap for Cin=3): a single lane-dense matmul per step.
        taps = [xpad[:, i:i + H, j:j + W, :] for i in range(kh) for j in range(kw)]
        xrow = jnp.concatenate(taps, axis=-1).reshape(N, H * W, kh * kw * Cin)
        K, KH, R = kh * kw * Cin, 1, H * W
        wk = w_hwio.reshape(1, K, Cout)
    else:
        # Width-direction im2col only (5x, not 25x); kernel-row shifts are
        # aligned row slices of the VMEM block inside the kernel.
        xrow = jnp.concatenate([xpad[:, :, j:j + W, :] for j in range(kw)], axis=-1)
        Hp = H + 2 * pad
        K, KH, R = kw * Cin, kh, Hp * W
        xrow = xrow.reshape(N, R, K)
        wk = w_hwio.reshape(kh, K, Cout)

    Kp = _round_up(K, 8)                     # sublane-align the contraction dim
    if Kp != K:
        xrow = jnp.pad(xrow, ((0, 0), (0, 0), (0, Kp - K)))
        wk = jnp.pad(wk, ((0, 0), (0, Kp - K), (0, 0)))
    wk = jnp.pad(wk, ((0, 0), (0, 0), (0, LANES - Cout))).astype(jnp.bfloat16)
    bk = jnp.pad(bias.astype(jnp.float32).reshape(1, Cout),
                 ((0, 0), (0, LANES - Cout)))

    CB = _images_per_step(N, cb_target)
    H2 = H // 2
    y = pl.pallas_call(
        _make_conv_kernel(CB, H, W, Cout, KH),
        out_shape=jax.ShapeDtypeStruct((N, H2 * W, Cout), jnp.bfloat16),
        grid_spec=pltpu.PrefetchScalarGridSpec(
            num_scalar_prefetch=0,
            grid=(N // CB,),
            in_specs=[
                pl.BlockSpec((CB, R, Kp), lambda n: (n, 0, 0)),
                pl.BlockSpec((KH, Kp, LANES), lambda n: (0, 0, 0)),
                pl.BlockSpec((1, LANES), lambda n: (0, 0)),
            ],
            out_specs=pl.BlockSpec((CB, H2 * W, Cout), lambda n: (n, 0, 0)),
        ),
        compiler_params=pltpu.CompilerParams(
            dimension_semantics=("parallel",)),
    )(xrow, wk, bk)

    # W-direction 2x max-pool on the already H-pooled, Cout-lane bf16 output.
    y = y.reshape(N, H2, W // 2, 2, Cout)
    return jnp.max(y, axis=3)                # (N, H//2, W//2, Cout)


def fc_fused(x, wfc1, bfc1, wfc2, bfc2):
    """Fused Linear(1024,64) -> Linear(64,10). x: (N, 1024) -> (N, 10) f32."""
    N, Kin = x.shape
    H1 = wfc1.shape[1]      # 64
    H2 = wfc2.shape[1]      # 10
    w1p = jnp.pad(wfc1, ((0, 0), (0, LANES - H1))).astype(jnp.bfloat16)
    b1p = jnp.pad(bfc1.astype(jnp.float32).reshape(1, H1), ((0, 0), (0, LANES - H1)))
    w2p = jnp.pad(wfc2, ((0, LANES - H1), (0, LANES - H2))).astype(jnp.bfloat16)
    b2p = jnp.pad(bfc2.astype(jnp.float32).reshape(1, H2), ((0, 0), (0, LANES - H2)))

    xb = x.astype(jnp.bfloat16)
    bn = min(512, _round_up(N, 8))           # 512-row tiles ~85% of HBM roofline
    Np = _round_up(N, bn)
    if Np != N:                              # pad batch instead of a bn=N fallback
        xb = jnp.pad(xb, ((0, Np - N), (0, 0)))

    out_full = pl.pallas_call(
        _fc_fused_kernel,
        out_shape=jax.ShapeDtypeStruct((Np, LANES), jnp.float32),
        grid_spec=pltpu.PrefetchScalarGridSpec(
            num_scalar_prefetch=0,
            grid=(Np // bn,),
            in_specs=[
                pl.BlockSpec((bn, Kin), lambda i: (i, 0)),
                pl.BlockSpec((Kin, LANES), lambda i: (0, 0)),
                pl.BlockSpec((1, LANES), lambda i: (0, 0)),
                pl.BlockSpec((LANES, LANES), lambda i: (0, 0)),
                pl.BlockSpec((1, LANES), lambda i: (0, 0)),
            ],
            out_specs=pl.BlockSpec((bn, LANES), lambda i: (i, 0)),
        ),
        compiler_params=pltpu.CompilerParams(
            dimension_semantics=("parallel",)),
    )(xb, w1p, b1p, w2p, b2p)
    return out_full[:N, :H2]


# ---------------------------------------------------------------------------
# Full network forward (== PyTorch NetWork.forward)
# ---------------------------------------------------------------------------

@jax.jit
def network_forward(x_nchw, params):
    x = jnp.transpose(x_nchw, (0, 2, 3, 1))                              # NCHW -> NHWC
    x = conv5x5_same_pool2(x, params["w1"], params["b1"],
                           full_im2col=True, cb_target=4)                # (N,16,16,32)
    x = conv5x5_same_pool2(x, params["w2"], params["b2"],
                           full_im2col=False, cb_target=8)               # (N, 8, 8,32)
    x = conv5x5_same_pool2(x, params["w3"], params["b3"],
                           full_im2col=False, cb_target=16)              # (N, 4, 4,64)
    N = x.shape[0]
    # fc1's weight rows are stored in NHWC-flatten order ((h*4+w)*64 + c), so no
    # runtime NHWC->NCHW transpose is needed before the flatten.
    x = x.reshape(N, 4 * 4 * 64)
    return fc_fused(x, params["wfc1"], params["bfc1"],
                    params["wfc2"], params["bfc2"])


# ---------------------------------------------------------------------------
# Pure-JAX f32 reference (faithful PyTorch semantics, for correctness check)
# ---------------------------------------------------------------------------

def reference_forward(x_nchw, params):
    hi = jax.lax.Precision.HIGHEST
    x = jnp.transpose(x_nchw, (0, 2, 3, 1))

    def conv(x, w, b):
        y = jax.lax.conv_general_dilated(
            x, w, window_strides=(1, 1), padding="SAME",
            dimension_numbers=("NHWC", "HWIO", "NHWC"), precision=hi)
        return y + b.reshape(1, 1, 1, -1)

    def pool(x):
        return jax.lax.reduce_window(
            x, -jnp.inf, jax.lax.max, (1, 2, 2, 1), (1, 2, 2, 1), "VALID")

    x = pool(conv(x, params["w1"], params["b1"]))
    x = pool(conv(x, params["w2"], params["b2"]))
    x = pool(conv(x, params["w3"], params["b3"]))
    N = x.shape[0]
    # PyTorch nn.Flatten order (NCHW) with the torch-row-ordered fc1 weight,
    # reconstructed from the NHWC-ordered weight stored in params.
    xf = jnp.transpose(x, (0, 3, 1, 2)).reshape(N, -1)
    wfc1_t = params["wfc1"].reshape(16, 64, 64).transpose(1, 0, 2).reshape(1024, 64)
    x = jnp.dot(xf, wfc1_t, precision=hi) + params["bfc1"]
    x = jnp.dot(x, params["wfc2"], precision=hi) + params["bfc2"]
    return x


# ---------------------------------------------------------------------------
# Deterministic parameter init (shapes from NetWork.__init__)
# ---------------------------------------------------------------------------

def init_params(key):
    ks = jax.random.split(key, 10)

    def u(k, shape, fan_in):
        bound = 1.0 / (fan_in ** 0.5)
        return jax.random.uniform(k, shape, jnp.float32, -bound, bound)

    p = {}
    p["w1"] = u(ks[0], (5, 5, 3, 32), 5 * 5 * 3)     # Conv2d(3, 32, 5, padding=2), HWIO
    p["b1"] = u(ks[1], (32,), 5 * 5 * 3)
    p["w2"] = u(ks[2], (5, 5, 32, 32), 5 * 5 * 32)   # Conv2d(32, 32, 5, padding=2)
    p["b2"] = u(ks[3], (32,), 5 * 5 * 32)
    p["w3"] = u(ks[4], (5, 5, 32, 64), 5 * 5 * 32)   # Conv2d(32, 64, 5, padding=2)
    p["b3"] = u(ks[5], (64,), 5 * 5 * 32)
    # Linear(64*4*4, 64): stored (in, out) with rows in NHWC-flatten order.
    # To import a torch weight Wt (64, 1024):
    #   wfc1 = Wt.T.reshape(64, 16, 64).transpose(1, 0, 2).reshape(1024, 64)
    p["wfc1"] = u(ks[6], (1024, 64), 1024)
    p["bfc1"] = u(ks[7], (64,), 1024)
    p["wfc2"] = u(ks[8], (64, 10), 64)               # Linear(64, 10), stored (in, out)
    p["bfc2"] = u(ks[9], (10,), 64)
    return p


if __name__ == "__main__":
    key = jax.random.PRNGKey(0)
    pkey, xkey = jax.random.split(key)
    params = init_params(pkey)

    # CIFAR-10 shaped input (NCHW, PyTorch convention); spatial must be 32
    # because of the Linear(64*4*4, 64) layer.
    x = jax.random.normal(xkey, (2, 3, 32, 32), jnp.float32)

    out = jax.block_until_ready(network_forward(x, params))
    assert out.shape == (2, 10), out.shape

    ref = jax.block_until_ready(jax.jit(reference_forward)(x, params))
    # Kernel path carries bf16 activations/operands (f32 accumulation) while the
    # reference is full-f32 HIGHEST precision, so allow a bf16-level tolerance.
    assert bool(jnp.allclose(out, ref, rtol=3e-2, atol=3e-2)), (
        "Pallas output does not match JAX reference; max abs diff = "
        f"{float(jnp.max(jnp.abs(out - ref)))}")

    print("KERNEL_OK")
</pallas_src>

<mosaic_0001>
module attributes {stable_mosaic.version = 11 : i64} {
  func.func @kernel(%arg0: i32, %arg1: memref<1x1024x80xbf16, #tpu.memory_space<vmem>>, %arg2: memref<1x80x128xbf16, #tpu.memory_space<vmem>>, %arg3: memref<1x128xf32, #tpu.memory_space<vmem>>, %arg4: memref<1x512x32xbf16, #tpu.memory_space<vmem>>) attributes {dimension_semantics = [#tpu.dimension_semantics<parallel>], iteration_bounds = array<i64: 2>, scalar_prefetch = 0 : i64, scratch_operands = 0 : i64, tpu.core_type = #tpu.core_type<tc>, window_params = [{transform_indices = @transform_0, window_bounds = array<i64: 1, 1024, 80>}, {pipeline_mode = #tpu.pipeline_mode<synchronous>, transform_indices = @transform_1, window_bounds = array<i64: 1, 80, 128>}, {pipeline_mode = #tpu.pipeline_mode<synchronous>, transform_indices = @transform_2, window_bounds = array<i64: 1, 128>}, {transform_indices = @transform_3, window_bounds = array<i64: 1, 512, 32>}]} {
    %c0 = arith.constant 0 : index
    %c0_0 = arith.constant 0 : index
    %c0_1 = arith.constant 0 : index
    %0 = vector.load %arg1[%c0, %c0_0, %c0_1] : memref<1x1024x80xbf16, #tpu.memory_space<vmem>>, vector<1x1024x80xbf16>
    %1 = vector.shape_cast %0 : vector<1x1024x80xbf16> to vector<1024x80xbf16>
    %c0_2 = arith.constant 0 : index
    %c0_3 = arith.constant 0 : index
    %c0_4 = arith.constant 0 : index
    %2 = vector.load %arg2[%c0_2, %c0_3, %c0_4] : memref<1x80x128xbf16, #tpu.memory_space<vmem>>, vector<1x80x128xbf16>
    %3 = vector.shape_cast %2 : vector<1x80x128xbf16> to vector<80x128xbf16>
    %cst = arith.constant dense<0.000000e+00> : vector<1024x128xf32>
    %4 = tpu.matmul %1, %3, %cst {dimension_numbers = #tpu.dot_dimension_numbers<[1], [0], [0], [1], [0, 0, 1, 1], [], []>} : vector<1024x80xbf16>, vector<80x128xbf16>, vector<1024x128xf32> -> vector<1024x128xf32>
    %5 = vector.shape_cast %4 : vector<1024x128xf32> to vector<16x64x128xf32>
    %6 = vector.extract_strided_slice %5 {offsets = [0, 0, 0], sizes = [16, 32, 128], strides = [1, 1, 1]} : vector<16x64x128xf32> to vector<16x32x128xf32>
    %7 = vector.extract_strided_slice %5 {offsets = [0, 32, 0], sizes = [16, 32, 128], strides = [1, 1, 1]} : vector<16x64x128xf32> to vector<16x32x128xf32>
    %8 = arith.maximumf %6, %7 : vector<16x32x128xf32>
    %9 = vector.shape_cast %8 : vector<16x32x128xf32> to vector<512x128xf32>
    %c0_5 = arith.constant 0 : index
    %c0_6 = arith.constant 0 : index
    %10 = vector.load %arg3[%c0_5, %c0_6] : memref<1x128xf32, #tpu.memory_space<vmem>>, vector<1x128xf32>
    %11 = vector.broadcast %10 : vector<1x128xf32> to vector<512x128xf32>
    %12 = arith.addf %9, %11 : vector<512x128xf32>
    %13 = vector.extract_strided_slice %12 {offsets = [0, 0], sizes = [512, 32], strides = [1, 1]} : vector<512x128xf32> to vector<512x32xf32>
    %14 = arith.truncf %13 : vector<512x32xf32> to vector<512x32xbf16>
    %15 = vector.shape_cast %14 : vector<512x32xbf16> to vector<1x512x32xbf16>
    %c0_7 = arith.constant 0 : index
    %c0_8 = arith.constant 0 : index
    %c0_9 = arith.constant 0 : index
    %16 = vector.load %arg4[%c0_7, %c0_8, %c0_9] : memref<1x512x32xbf16, #tpu.memory_space<vmem>>, vector<1x512x32xbf16>
    tpu.vector_store %arg4[%c0_7, %c0_8, %c0_9], %15 {strides = array<i32>} : memref<1x512x32xbf16, #tpu.memory_space<vmem>>, vector<1x512x32xbf16>,
    return
  }
  func.func @transform_0(%arg0: i32) -> (i32, i32, i32) {
    %c0_i32 = arith.constant 0 : i32
    %c0_i32_0 = arith.constant 0 : i32
    %c0_i32_1 = arith.constant 0 : i32
    return %arg0, %c0_i32, %c0_i32_0 : i32, i32, i32
  }
  func.func @transform_1(%arg0: i32) -> (i32, i32, i32) {
    %c0_i32 = arith.constant 0 : i32
    %c0_i32_0 = arith.constant 0 : i32
    %c0_i32_1 = arith.constant 0 : i32
    %c0_i32_2 = arith.constant 0 : i32
    return %c0_i32, %c0_i32_0, %c0_i32_1 : i32, i32, i32
  }
  func.func @transform_2(%arg0: i32) -> (i32, i32) {
    %c0_i32 = arith.constant 0 : i32
    %c0_i32_0 = arith.constant 0 : i32
    %c0_i32_1 = arith.constant 0 : i32
    return %c0_i32, %c0_i32_0 : i32, i32
  }
  func.func @transform_3(%arg0: i32) -> (i32, i32, i32) {
    %c0_i32 = arith.constant 0 : i32
    %c0_i32_0 = arith.constant 0 : i32
    %c0_i32_1 = arith.constant 0 : i32
    return %arg0, %c0_i32, %c0_i32_0 : i32, i32, i32
  }
}

module attributes {stable_mosaic.version = 11 : i64} {
  func.func @kernel(%arg0: i32, %arg1: memref<1x320x160xbf16, #tpu.memory_space<vmem>>, %arg2: memref<5x160x128xbf16, #tpu.memory_space<vmem>>, %arg3: memref<1x128xf32, #tpu.memory_space<vmem>>, %arg4: memref<1x128x32xbf16, #tpu.memory_space<vmem>>) attributes {dimension_semantics = [#tpu.dimension_semantics<parallel>], iteration_bounds = array<i64: 2>, scalar_prefetch = 0 : i64, scratch_operands = 0 : i64, tpu.core_type = #tpu.core_type<tc>, window_params = [{transform_indices = @transform_0, window_bounds = array<i64: 1, 320, 160>}, {pipeline_mode = #tpu.pipeline_mode<synchronous>, transform_indices = @transform_1, window_bounds = array<i64: 5, 160, 128>}, {pipeline_mode = #tpu.pipeline_mode<synchronous>, transform_indices = @transform_2, window_bounds = array<i64: 1, 128>}, {transform_indices = @transform_3, window_bounds = array<i64: 1, 128, 32>}]} {
    %c0 = arith.constant 0 : index
    %c0_0 = arith.constant 0 : index
    %c0_1 = arith.constant 0 : index
    %0 = vector.load %arg1[%c0, %c0_0, %c0_1] : memref<1x320x160xbf16, #tpu.memory_space<vmem>>, vector<1x256x160xbf16>
    %1 = vector.shape_cast %0 : vector<1x256x160xbf16> to vector<256x160xbf16>
    %c0_2 = arith.constant 0 : index
    %c0_3 = arith.constant 0 : index
    %c0_4 = arith.constant 0 : index
    %2 = vector.load %arg2[%c0_2, %c0_3, %c0_4] : memref<5x160x128xbf16, #tpu.memory_space<vmem>>, vector<1x160x128xbf16>
    %3 = vector.shape_cast %2 : vector<1x160x128xbf16> to vector<160x128xbf16>
    %cst = arith.constant dense<0.000000e+00> : vector<256x128xf32>
    %4 = tpu.matmul %1, %3, %cst {dimension_numbers = #tpu.dot_dimension_numbers<[1], [0], [0], [1], [0, 0, 1, 1], [], []>} : vector<256x160xbf16>, vector<160x128xbf16>, vector<256x128xf32> -> vector<256x128xf32>
    %c0_5 = arith.constant 0 : index
    %c16 = arith.constant 16 : index
    %c0_6 = arith.constant 0 : index
    %5 = vector.load %arg1[%c0_5, %c16, %c0_6] : memref<1x320x160xbf16, #tpu.memory_space<vmem>>, vector<1x256x160xbf16>
    %6 = vector.shape_cast %5 : vector<1x256x160xbf16> to vector<256x160xbf16>
    %c1 = arith.constant 1 : index
    %c0_7 = arith.constant 0 : index
    %c0_8 = arith.constant 0 : index
    %7 = vector.load %arg2[%c1, %c0_7, %c0_8] : memref<5x160x128xbf16, #tpu.memory_space<vmem>>, vector<1x160x128xbf16>
    %8 = vector.shape_cast %7 : vector<1x160x128xbf16> to vector<160x128xbf16>
    %cst_9 = arith.constant dense<0.000000e+00> : vector<256x128xf32>
    %9 = tpu.matmul %6, %8, %cst_9 {dimension_numbers = #tpu.dot_dimension_numbers<[1], [0], [0], [1], [0, 0, 1, 1], [], []>} : vector<256x160xbf16>, vector<160x128xbf16>, vector<256x128xf32> -> vector<256x128xf32>
    %10 = arith.addf %4, %9 : vector<256x128xf32>
    %c0_10 = arith.constant 0 : index
    %c32 = arith.constant 32 : index
    %c0_11 = arith.constant 0 : index
    %11 = vector.load %arg1[%c0_10, %c32, %c0_11] : memref<1x320x160xbf16, #tpu.memory_space<vmem>>, vector<1x256x160xbf16>
    %12 = vector.shape_cast %11 : vector<1x256x160xbf16> to vector<256x160xbf16>
    %c2 = arith.constant 2 : index
    %c0_12 = arith.constant 0 : index
    %c0_13 = arith.constant 0 : index
    %13 = vector.load %arg2[%c2, %c0_12, %c0_13] : memref<5x160x128xbf16, #tpu.memory_space<vmem>>, vector<1x160x128xbf16>
    %14 = vector.shape_cast %13 : vector<1x160x128xbf16> to vector<160x128xbf16>
    %cst_14 = arith.constant dense<0.000000e+00> : vector<256x128xf32>
    %15 = tpu.matmul %12, %14, %cst_14 {dimension_numbers = #tpu.dot_dimension_numbers<[1], [0], [0], [1], [0, 0, 1, 1], [], []>} : vector<256x160xbf16>, vector<160x128xbf16>, vector<256x128xf32> -> vector<256x128xf32>
    %16 = arith.addf %10, %15 : vector<256x128xf32>
    %c0_15 = arith.constant 0 : index
    %c48 = arith.constant 48 : index
    %c0_16 = arith.constant 0 : index
    %17 = vector.load %arg1[%c0_15, %c48, %c0_16] : memref<1x320x160xbf16, #tpu.memory_space<vmem>>, vector<1x256x160xbf16>
    %18 = vector.shape_cast %17 : vector<1x256x160xbf16> to vector<256x160xbf16>
    %c3 = arith.constant 3 : index
    %c0_17 = arith.constant 0 : index
    %c0_18 = arith.constant 0 : index
    %19 = vector.load %arg2[%c3, %c0_17, %c0_18] : memref<5x160x128xbf16, #tpu.memory_space<vmem>>, vector<1x160x128xbf16>
    %20 = vector.shape_cast %19 : vector<1x160x128xbf16> to vector<160x128xbf16>
    %cst_19 = arith.constant dense<0.000000e+00> : vector<256x128xf32>
    %21 = tpu.matmul %18, %20, %cst_19 {dimension_numbers = #tpu.dot_dimension_numbers<[1], [0], [0], [1], [0, 0, 1, 1], [], []>} : vector<256x160xbf16>, vector<160x128xbf16>, vector<256x128xf32> -> vector<256x128xf32>
    %22 = arith.addf %16, %21 : vector<256x128xf32>
    %c0_20 = arith.constant 0 : index
    %c64 = arith.constant 64 : index
    %c0_21 = arith.constant 0 : index
    %23 = vector.load %arg1[%c0_20, %c64, %c0_21] : memref<1x320x160xbf16, #tpu.memory_space<vmem>>, vector<1x256x160xbf16>
    %24 = vector.shape_cast %23 : vector<1x256x160xbf16> to vector<256x160xbf16>
    %c4 = arith.constant 4 : index
    %c0_22 = arith.constant 0 : index
    %c0_23 = arith.constant 0 : index
    %25 = vector.load %arg2[%c4, %c0_22, %c0_23] : memref<5x160x128xbf16, #tpu.memory_space<vmem>>, vector<1x160x128xbf16>
    %26 = vector.shape_cast %25 : vector<1x160x128xbf16> to vector<160x128xbf16>
    %cst_24 = arith.constant dense<0.000000e+00> : vector<256x128xf32>
    %27 = tpu.matmul %24, %26, %cst_24 {dimension_numbers = #tpu.dot_dimension_numbers<[1], [0], [0], [1], [0, 0, 1, 1], [], []>} : vector<256x160xbf16>, vector<160x128xbf16>, vector<256x128xf32> -> vector<256x128xf32>
    %28 = arith.addf %22, %27 : vector<256x128xf32>
    %29 = vector.shape_cast %28 : vector<256x128xf32> to vector<8x32x128xf32>
    %30 = vector.extract_strided_slice %29 {offsets = [0, 0, 0], sizes = [8, 16, 128], strides = [1, 1, 1]} : vector<8x32x128xf32> to vector<8x16x128xf32>
    %31 = vector.extract_strided_slice %29 {offsets = [0, 16, 0], sizes = [8, 16, 128], strides = [1, 1, 1]} : vector<8x32x128xf32> to vector<8x16x128xf32>
    %32 = arith.maximumf %30, %31 : vector<8x16x128xf32>
    %33 = vector.shape_cast %32 : vector<8x16x128xf32> to vector<128x128xf32>
    %c0_25 = arith.constant 0 : index
    %c0_26 = arith.constant 0 : index
    %34 = vector.load %arg3[%c0_25, %c0_26] : memref<1x128xf32, #tpu.memory_space<vmem>>, vector<1x128xf32>
    %35 = vector.broadcast %34 : vector<1x128xf32> to vector<128x128xf32>
    %36 = arith.addf %33, %35 : vector<128x128xf32>
    %37 = vector.extract_strided_slice %36 {offsets = [0, 0], sizes = [128, 32], strides = [1, 1]} : vector<128x128xf32> to vector<128x32xf32>
    %38 = arith.truncf %37 : vector<128x32xf32> to vector<128x32xbf16>
    %39 = vector.shape_cast %38 : vector<128x32xbf16> to vector<1x128x32xbf16>
    %c0_27 = arith.constant 0 : index
    %c0_28 = arith.constant 0 : index
    %c0_29 = arith.constant 0 : index
    %40 = vector.load %arg4[%c0_27, %c0_28, %c0_29] : memref<1x128x32xbf16, #tpu.memory_space<vmem>>, vector<1x128x32xbf16>
    tpu.vector_store %arg4[%c0_27, %c0_28, %c0_29], %39 {strides = array<i32>} : memref<1x128x32xbf16, #tpu.memory_space<vmem>>, vector<1x128x32xbf16>,
    return
  }
  func.func @transform_0(%arg0: i32) -> (i32, i32, i32) {
    %c0_i32 = arith.constant 0 : i32
    %c0_i32_0 = arith.constant 0 : i32
    %c0_i32_1 = arith.constant 0 : i32
    return %arg0, %c0_i32, %c0_i32_0 : i32, i32, i32
  }
  func.func @transform_1(%arg0: i32) -> (i32, i32, i32) {
    %c0_i32 = arith.constant 0 : i32
    %c0_i32_0 = arith.constant 0 : i32
    %c0_i32_1 = arith.constant 0 : i32
    %c0_i32_2 = arith.constant 0 : i32
    return %c0_i32, %c0_i32_0, %c0_i32_1 : i32, i32, i32
  }
  func.func @transform_2(%arg0: i32) -> (i32, i32) {
    %c0_i32 = arith.constant 0 : i32
    %c0_i32_0 = arith.constant 0 : i32
    %c0_i32_1 = arith.constant 0 : i32
    return %c0_i32, %c0_i32_0 : i32, i32
  }
  func.func @transform_3(%arg0: i32) -> (i32, i32, i32) {
    %c0_i32 = arith.constant 0 : i32
    %c0_i32_0 = arith.constant 0 : i32
    %c0_i32_1 = arith.constant 0 : i32
    return %arg0, %c0_i32, %c0_i32_0 : i32, i32, i32
  }
}

module attributes {stable_mosaic.version = 11 : i64} {
  func.func @kernel(%arg0: i32, %arg1: memref<1x96x160xbf16, #tpu.memory_space<vmem>>, %arg2: memref<5x160x128xbf16, #tpu.memory_space<vmem>>, %arg3: memref<1x128xf32, #tpu.memory_space<vmem>>, %arg4: memref<1x32x64xbf16, #tpu.memory_space<vmem>>) attributes {dimension_semantics = [#tpu.dimension_semantics<parallel>], iteration_bounds = array<i64: 2>, scalar_prefetch = 0 : i64, scratch_operands = 0 : i64, tpu.core_type = #tpu.core_type<tc>, window_params = [{transform_indices = @transform_0, window_bounds = array<i64: 1, 96, 160>}, {pipeline_mode = #tpu.pipeline_mode<synchronous>, transform_indices = @transform_1, window_bounds = array<i64: 5, 160, 128>}, {pipeline_mode = #tpu.pipeline_mode<synchronous>, transform_indices = @transform_2, window_bounds = array<i64: 1, 128>}, {transform_indices = @transform_3, window_bounds = array<i64: 1, 32, 64>}]} {
    %c0 = arith.constant 0 : index
    %c0_0 = arith.constant 0 : index
    %c0_1 = arith.constant 0 : index
    %0 = vector.load %arg1[%c0, %c0_0, %c0_1] : memref<1x96x160xbf16, #tpu.memory_space<vmem>>, vector<1x64x160xbf16>
    %1 = vector.shape_cast %0 : vector<1x64x160xbf16> to vector<64x160xbf16>
    %c0_2 = arith.constant 0 : index
    %c0_3 = arith.constant 0 : index
    %c0_4 = arith.constant 0 : index
    %2 = vector.load %arg2[%c0_2, %c0_3, %c0_4] : memref<5x160x128xbf16, #tpu.memory_space<vmem>>, vector<1x160x128xbf16>
    %3 = vector.shape_cast %2 : vector<1x160x128xbf16> to vector<160x128xbf16>
    %cst = arith.constant dense<0.000000e+00> : vector<64x128xf32>
    %4 = tpu.matmul %1, %3, %cst {dimension_numbers = #tpu.dot_dimension_numbers<[1], [0], [0], [1], [0, 0, 1, 1], [], []>} : vector<64x160xbf16>, vector<160x128xbf16>, vector<64x128xf32> -> vector<64x128xf32>
    %c0_5 = arith.constant 0 : index
    %c8 = arith.constant 8 : index
    %c0_6 = arith.constant 0 : index
    %5 = vector.load %arg1[%c0_5, %c8, %c0_6] : memref<1x96x160xbf16, #tpu.memory_space<vmem>>, vector<1x64x160xbf16>
    %6 = vector.shape_cast %5 : vector<1x64x160xbf16> to vector<64x160xbf16>
    %c1 = arith.constant 1 : index
    %c0_7 = arith.constant 0 : index
    %c0_8 = arith.constant 0 : index
    %7 = vector.load %arg2[%c1, %c0_7, %c0_8] : memref<5x160x128xbf16, #tpu.memory_space<vmem>>, vector<1x160x128xbf16>
    %8 = vector.shape_cast %7 : vector<1x160x128xbf16> to vector<160x128xbf16>
    %cst_9 = arith.constant dense<0.000000e+00> : vector<64x128xf32>
    %9 = tpu.matmul %6, %8, %cst_9 {dimension_numbers = #tpu.dot_dimension_numbers<[1], [0], [0], [1], [0, 0, 1, 1], [], []>} : vector<64x160xbf16>, vector<160x128xbf16>, vector<64x128xf32> -> vector<64x128xf32>
    %10 = arith.addf %4, %9 : vector<64x128xf32>
    %c0_10 = arith.constant 0 : index
    %c16 = arith.constant 16 : index
    %c0_11 = arith.constant 0 : index
    %11 = vector.load %arg1[%c0_10, %c16, %c0_11] : memref<1x96x160xbf16, #tpu.memory_space<vmem>>, vector<1x64x160xbf16>
    %12 = vector.shape_cast %11 : vector<1x64x160xbf16> to vector<64x160xbf16>
    %c2 = arith.constant 2 : index
    %c0_12 = arith.constant 0 : index
    %c0_13 = arith.constant 0 : index
    %13 = vector.load %arg2[%c2, %c0_12, %c0_13] : memref<5x160x128xbf16, #tpu.memory_space<vmem>>, vector<1x160x128xbf16>
    %14 = vector.shape_cast %13 : vector<1x160x128xbf16> to vector<160x128xbf16>
    %cst_14 = arith.constant dense<0.000000e+00> : vector<64x128xf32>
    %15 = tpu.matmul %12, %14, %cst_14 {dimension_numbers = #tpu.dot_dimension_numbers<[1], [0], [0], [1], [0, 0, 1, 1], [], []>} : vector<64x160xbf16>, vector<160x128xbf16>, vector<64x128xf32> -> vector<64x128xf32>
    %16 = arith.addf %10, %15 : vector<64x128xf32>
    %c0_15 = arith.constant 0 : index
    %c24 = arith.constant 24 : index
    %c0_16 = arith.constant 0 : index
    %17 = vector.load %arg1[%c0_15, %c24, %c0_16] : memref<1x96x160xbf16, #tpu.memory_space<vmem>>, vector<1x64x160xbf16>
    %18 = vector.shape_cast %17 : vector<1x64x160xbf16> to vector<64x160xbf16>
    %c3 = arith.constant 3 : index
    %c0_17 = arith.constant 0 : index
    %c0_18 = arith.constant 0 : index
    %19 = vector.load %arg2[%c3, %c0_17, %c0_18] : memref<5x160x128xbf16, #tpu.memory_space<vmem>>, vector<1x160x128xbf16>
    %20 = vector.shape_cast %19 : vector<1x160x128xbf16> to vector<160x128xbf16>
    %cst_19 = arith.constant dense<0.000000e+00> : vector<64x128xf32>
    %21 = tpu.matmul %18, %20, %cst_19 {dimension_numbers = #tpu.dot_dimension_numbers<[1], [0], [0], [1], [0, 0, 1, 1], [], []>} : vector<64x160xbf16>, vector<160x128xbf16>, vector<64x128xf32> -> vector<64x128xf32>
    %22 = arith.addf %16, %21 : vector<64x128xf32>
    %c0_20 = arith.constant 0 : index
    %c32 = arith.constant 32 : index
    %c0_21 = arith.constant 0 : index
    %23 = vector.load %arg1[%c0_20, %c32, %c0_21] : memref<1x96x160xbf16, #tpu.memory_space<vmem>>, vector<1x64x160xbf16>
    %24 = vector.shape_cast %23 : vector<1x64x160xbf16> to vector<64x160xbf16>
    %c4 = arith.constant 4 : index
    %c0_22 = arith.constant 0 : index
    %c0_23 = arith.constant 0 : index
    %25 = vector.load %arg2[%c4, %c0_22, %c0_23] : memref<5x160x128xbf16, #tpu.memory_space<vmem>>, vector<1x160x128xbf16>
    %26 = vector.shape_cast %25 : vector<1x160x128xbf16> to vector<160x128xbf16>
    %cst_24 = arith.constant dense<0.000000e+00> : vector<64x128xf32>
    %27 = tpu.matmul %24, %26, %cst_24 {dimension_numbers = #tpu.dot_dimension_numbers<[1], [0], [0], [1], [0, 0, 1, 1], [], []>} : vector<64x160xbf16>, vector<160x128xbf16>, vector<64x128xf32> -> vector<64x128xf32>
    %28 = arith.addf %22, %27 : vector<64x128xf32>
    %29 = vector.shape_cast %28 : vector<64x128xf32> to vector<4x16x128xf32>
    %30 = vector.extract_strided_slice %29 {offsets = [0, 0, 0], sizes = [4, 8, 128], strides = [1, 1, 1]} : vector<4x16x128xf32> to vector<4x8x128xf32>
    %31 = vector.extract_strided_slice %29 {offsets = [0, 8, 0], sizes = [4, 8, 128], strides = [1, 1, 1]} : vector<4x16x128xf32> to vector<4x8x128xf32>
    %32 = arith.maximumf %30, %31 : vector<4x8x128xf32>
    %33 = vector.shape_cast %32 : vector<4x8x128xf32> to vector<32x128xf32>
    %c0_25 = arith.constant 0 : index
    %c0_26 = arith.constant 0 : index
    %34 = vector.load %arg3[%c0_25, %c0_26] : memref<1x128xf32, #tpu.memory_space<vmem>>, vector<1x128xf32>
    %35 = vector.broadcast %34 : vector<1x128xf32> to vector<32x128xf32>
    %36 = arith.addf %33, %35 : vector<32x128xf32>
    %37 = vector.extract_strided_slice %36 {offsets = [0, 0], sizes = [32, 64], strides = [1, 1]} : vector<32x128xf32> to vector<32x64xf32>
    %38 = arith.truncf %37 : vector<32x64xf32> to vector<32x64xbf16>
    %39 = vector.shape_cast %38 : vector<32x64xbf16> to vector<1x32x64xbf16>
    %c0_27 = arith.constant 0 : index
    %c0_28 = arith.constant 0 : index
    %c0_29 = arith.constant 0 : index
    %40 = vector.load %arg4[%c0_27, %c0_28, %c0_29] : memref<1x32x64xbf16, #tpu.memory_space<vmem>>, vector<1x32x64xbf16>
    tpu.vector_store %arg4[%c0_27, %c0_28, %c0_29], %39 {strides = array<i32>} : memref<1x32x64xbf16, #tpu.memory_space<vmem>>, vector<1x32x64xbf16>,
    return
  }
  func.func @transform_0(%arg0: i32) -> (i32, i32, i32) {
    %c0_i32 = arith.constant 0 : i32
    %c0_i32_0 = arith.constant 0 : i32
    %c0_i32_1 = arith.constant 0 : i32
    return %arg0, %c0_i32, %c0_i32_0 : i32, i32, i32
  }
  func.func @transform_1(%arg0: i32) -> (i32, i32, i32) {
    %c0_i32 = arith.constant 0 : i32
    %c0_i32_0 = arith.constant 0 : i32
    %c0_i32_1 = arith.constant 0 : i32
    %c0_i32_2 = arith.constant 0 : i32
    return %c0_i32, %c0_i32_0, %c0_i32_1 : i32, i32, i32
  }
  func.func @transform_2(%arg0: i32) -> (i32, i32) {
    %c0_i32 = arith.constant 0 : i32
    %c0_i32_0 = arith.constant 0 : i32
    %c0_i32_1 = arith.constant 0 : i32
    return %c0_i32, %c0_i32_0 : i32, i32
  }
  func.func @transform_3(%arg0: i32) -> (i32, i32, i32) {
    %c0_i32 = arith.constant 0 : i32
    %c0_i32_0 = arith.constant 0 : i32
    %c0_i32_1 = arith.constant 0 : i32
    return %arg0, %c0_i32, %c0_i32_0 : i32, i32, i32
  }
}

module attributes {stable_mosaic.version = 11 : i64} {
  func.func @_fc_fused_kernel(%arg0: i32, %arg1: memref<8x1024xbf16, #tpu.memory_space<vmem>>, %arg2: memref<1024x128xbf16, #tpu.memory_space<vmem>>, %arg3: memref<1x128xf32, #tpu.memory_space<vmem>>, %arg4: memref<128x128xbf16, #tpu.memory_space<vmem>>, %arg5: memref<1x128xf32, #tpu.memory_space<vmem>>, %arg6: memref<8x128xf32, #tpu.memory_space<vmem>>) attributes {dimension_semantics = [#tpu.dimension_semantics<parallel>], iteration_bounds = array<i64: 1>, scalar_prefetch = 0 : i64, scratch_operands = 0 : i64, tpu.core_type = #tpu.core_type<tc>, window_params = [{transform_indices = @transform_0, window_bounds = array<i64: 8, 1024>}, {pipeline_mode = #tpu.pipeline_mode<synchronous>, transform_indices = @transform_1, window_bounds = array<i64: 1024, 128>}, {pipeline_mode = #tpu.pipeline_mode<synchronous>, transform_indices = @transform_2, window_bounds = array<i64: 1, 128>}, {pipeline_mode = #tpu.pipeline_mode<synchronous>, transform_indices = @transform_3, window_bounds = array<i64: 128, 128>}, {pipeline_mode = #tpu.pipeline_mode<synchronous>, transform_indices = @transform_4, window_bounds = array<i64: 1, 128>}, {transform_indices = @transform_5, window_bounds = array<i64: 8, 128>}]} {
    %c0 = arith.constant 0 : index
    %c0_0 = arith.constant 0 : index
    %0 = vector.load %arg1[%c0, %c0_0] : memref<8x1024xbf16, #tpu.memory_space<vmem>>, vector<8x1024xbf16>
    %c0_1 = arith.constant 0 : index
    %c0_2 = arith.constant 0 : index
    %1 = vector.load %arg2[%c0_1, %c0_2] : memref<1024x128xbf16, #tpu.memory_space<vmem>>, vector<1024x128xbf16>
    %cst = arith.constant dense<0.000000e+00> : vector<8x128xf32>
    %2 = tpu.matmul %0, %1, %cst {dimension_numbers = #tpu.dot_dimension_numbers<[1], [0], [0], [1], [0, 0, 1, 1], [], []>} : vector<8x1024xbf16>, vector<1024x128xbf16>, vector<8x128xf32> -> vector<8x128xf32>
    %c0_3 = arith.constant 0 : index
    %c0_4 = arith.constant 0 : index
    %3 = vector.load %arg3[%c0_3, %c0_4] : memref<1x128xf32, #tpu.memory_space<vmem>>, vector<1x128xf32>
    %4 = vector.broadcast %3 : vector<1x128xf32> to vector<8x128xf32>
    %5 = arith.addf %2, %4 : vector<8x128xf32>
    %6 = arith.truncf %5 : vector<8x128xf32> to vector<8x128xbf16>
    %c0_5 = arith.constant 0 : index
    %c0_6 = arith.constant 0 : index
    %7 = vector.load %arg4[%c0_5, %c0_6] : memref<128x128xbf16, #tpu.memory_space<vmem>>, vector<128x128xbf16>
    %cst_7 = arith.constant dense<0.000000e+00> : vector<8x128xf32>
    %8 = tpu.matmul %6, %7, %cst_7 {dimension_numbers = #tpu.dot_dimension_numbers<[1], [0], [0], [1], [0, 0, 1, 1], [], []>} : vector<8x128xbf16>, vector<128x128xbf16>, vector<8x128xf32> -> vector<8x128xf32>
    %c0_8 = arith.constant 0 : index
    %c0_9 = arith.constant 0 : index
    %9 = vector.load %arg5[%c0_8, %c0_9] : memref<1x128xf32, #tpu.memory_space<vmem>>, vector<1x128xf32>
    %10 = vector.broadcast %9 : vector<1x128xf32> to vector<8x128xf32>
    %11 = arith.addf %8, %10 : vector<8x128xf32>
    %c0_10 = arith.constant 0 : index
    %c0_11 = arith.constant 0 : index
    %12 = vector.load %arg6[%c0_10, %c0_11] : memref<8x128xf32, #tpu.memory_space<vmem>>, vector<8x128xf32>
    tpu.vector_store %arg6[%c0_10, %c0_11], %11 {strides = array<i32>} : memref<8x128xf32, #tpu.memory_space<vmem>>, vector<8x128xf32>,
    return
  }
  func.func @transform_0(%arg0: i32) -> (i32, i32) {
    %c0_i32 = arith.constant 0 : i32
    %c0_i32_0 = arith.constant 0 : i32
    return %arg0, %c0_i32 : i32, i32
  }
  func.func @transform_1(%arg0: i32) -> (i32, i32) {
    %c0_i32 = arith.constant 0 : i32
    %c0_i32_0 = arith.constant 0 : i32
    %c0_i32_1 = arith.constant 0 : i32
    return %c0_i32, %c0_i32_0 : i32, i32
  }
  func.func @transform_2(%arg0: i32) -> (i32, i32) {
    %c0_i32 = arith.constant 0 : i32
    %c0_i32_0 = arith.constant 0 : i32
    %c0_i32_1 = arith.constant 0 : i32
    return %c0_i32, %c0_i32_0 : i32, i32
  }
  func.func @transform_3(%arg0: i32) -> (i32, i32) {
    %c0_i32 = arith.constant 0 : i32
    %c0_i32_0 = arith.constant 0 : i32
    %c0_i32_1 = arith.constant 0 : i32
    return %c0_i32, %c0_i32_0 : i32, i32
  }
  func.func @transform_4(%arg0: i32) -> (i32, i32) {
    %c0_i32 = arith.constant 0 : i32
    %c0_i32_0 = arith.constant 0 : i32
    %c0_i32_1 = arith.constant 0 : i32
    return %c0_i32, %c0_i32_0 : i32, i32
  }
  func.func @transform_5(%arg0: i32) -> (i32, i32) {
    %c0_i32 = arith.constant 0 : i32
    %c0_i32_0 = arith.constant 0 : i32
    return %arg0, %c0_i32 : i32, i32
  }
}

</mosaic_0001>

<bundles_post_ra>
// kernel: network_forward.4
= control target key start
LH: loop header
LB: loop body
LE: loop exit
PB: predicated region body
PF: predicated region fallthrough
CT: control target
= control target key end

     0   :  { %s2506_s12 = smov 0   ;;  %s2871_s0 = inlined_call_operand.vmem [shape: bf16[2,1024,80], index: 0, kind: input, shape index: {}]   ;;  %s2872_s1 = inlined_call_operand.vmem [shape: bf16[1,80,128], index: 1, kind: input, shape index: {}]   ;;  %s2873_s2 = inlined_call_operand.vmem [shape: f32[1,128], index: 2, kind: input, shape index: {}]   ;;  %s2874_s3 = inlined_call_operand.vmem [shape: bf16[2,512,32], index: 3, kind: output, shape index: {}]  }
   0x1 LB: > { %s1909_s13 = sadd.s32 4294967295, %s2484_s12   ;;  %p1913_p0 = scmp.ge.s32.totalorder %s2484_s12, 1  ;;  %s2484_s12 = sphi %s2506_s12, %s13_s12  }
   0x2   : > { %p137_p1 = scmp.lt.s32.totalorder %s2484_s12, 3 }
   0x4   : > { %p138_p2 = pnand %p1913_p0, %p137_p1 }
   0x5   : > { %p161_p3 = scmp.lt.s32.totalorder (!%p138_p2), %s1909_s13, 1 }
   0x6   : > { %141 = sbr.rel (%p138_p2) target bundleno = 359 (0x167), region = 32 }
   0xb   : > { %v2409_v0 = vld [vmem:[%s2872_s1 + $0x20] sm:$0xff]   ;;  %v2410_v1 = vld [vmem:[%s2872_s1 + $0x18] sm:$0xff]   ;;  %s2876_s13 = smov (!%p161_p3, %s1909_s13), 1  ;;  %v2411_v2 = vld [vmem:[%s2872_s1 + $0x10] sm:$0xff]   ;;  %vm660_vm0 = vcmask 654336   ;;  %vm1789_vm1 = vcmask 257024  }
   0xc   : > { %2253 = vmatprep.subr.bf16.mxu0 %v2409_v0  ;;  %2391 = vmatprep.subr.bf16.mxu1 %v2409_v0  ;;  %s2118_s20 = sshll.u32 %s2876_s13, 9  ;;  %v2412_v5 = vld [vmem:[%s2872_s1 + $0x8] sm:$0xff]   ;;  %v2413_v6 = vld [vmem:[%s2872_s1] sm:$0xff]   ;;  %s2119_s30 = sshll.u32 %s2876_s13, 8 }
   0xd   : > { %2254 = vmatpush3.bf16.msra.mxu0 %v2409_v0  ;;  %2396 = vmatpush3.bf16.msra.mxu1 %v2409_v0  ;;  %s2529_s23 = scalar_lea.vmem %s2871_s0, %s2118_s20  ;;  %s2676_s6 = scalar_lea.vmem %s2874_s3, %s2119_s30 }
   0xe   : > { %2255 = vmatprep.subr.bf16.mxu0 %v2410_v1  ;;  %2392 = vmatprep.subr.bf16.mxu1 %v2410_v1  ;;  %v2414_v3 = vld [vmem:[%s2529_s23] sm:$0xff]   ;;  %v2416_v7 = vld [vmem:[%s2529_s23 + $0x8] sm:$0xff]   ;;  %v2418_v9 = vld [vmem:[%s2529_s23 + $0x10] sm:$0xff]  }
   0xf   : > { %v2415_v4 = vld [vmem:[%s2529_s23 + $0x100] sm:$0xff]   ;;  %2263 = vmatprep.mubr.msk.bf16.mxu0 %vm660_vm0, %v2414_v3  ;;  %v2417_v8 = vld [vmem:[%s2529_s23 + $0x108] sm:$0xff]   ;;  %v2419_v10 = vld [vmem:[%s2529_s23 + $0x110] sm:$0xff]  }
  0x10   : > { %2327 = vmatprep.mubr.msk.bf16.mxu1 %vm660_vm0, %v2415_v4  ;;  %v2420_v11 = vld [vmem:[%s2529_s23 + $0x18] sm:$0xff]   ;;  %v2422_v13 = vld [vmem:[%s2529_s23 + $0x20] sm:$0xff]   ;;  %v2424_v15 = vld [vmem:[%s2529_s23 + $0x28] sm:$0xff]  }
  0x11   : > { %2256 = vmatpush3.bf16.msra.mxu0 %v2410_v1  ;;  %2397 = vmatpush3.bf16.msra.mxu1 %v2410_v1  ;;  %v2421_v12 = vld [vmem:[%s2529_s23 + $0x118] sm:$0xff]   ;;  %v2423_v14 = vld [vmem:[%s2529_s23 + $0x120] sm:$0xff]   ;;  %v2425_v16 = vld [vmem:[%s2529_s23 + $0x128] sm:$0xff]  }
  0x12   : > { %2257 = vmatprep.subr.bf16.mxu0 %v2411_v2  ;;  %2393 = vmatprep.subr.bf16.mxu1 %v2411_v2  ;;  %v2426_v17 = vld [vmem:[%s2529_s23 + $0x30] sm:$0xff]   ;;  %v2428_v19 = vld [vmem:[%s2529_s23 + $0x38] sm:$0xff]   ;;  %v2430_v21 = vld [vmem:[%s2529_s23 + $0x40] sm:$0xff]  }
  0x13   : > { %v2427_v18 = vld [vmem:[%s2529_s23 + $0x130] sm:$0xff]   ;;  %v2429_v20 = vld [vmem:[%s2529_s23 + $0x138] sm:$0xff]   ;;  %v2431_v22 = vld [vmem:[%s2529_s23 + $0x140] sm:$0xff]  }
  0x14   : > { %v2432_v23 = vld [vmem:[%s2529_s23 + $0x48] sm:$0xff]   ;;  %v2434_v25 = vld [vmem:[%s2529_s23 + $0x50] sm:$0xff]   ;;  %v2436_v27 = vld [vmem:[%s2529_s23 + $0x58] sm:$0xff]  }
  0x15   : > { %2258 = vmatpush3.bf16.msra.mxu0 %v2411_v2  ;;  %2398 = vmatpush3.bf16.msra.mxu1 %v2411_v2  ;;  %v2433_v24 = vld [vmem:[%s2529_s23 + $0x148] sm:$0xff]   ;;  %v2435_v26 = vld [vmem:[%s2529_s23 + $0x150] sm:$0xff]   ;;  %v2437_v28 = vld [vmem:[%s2529_s23 + $0x158] sm:$0xff]  }
  0x16   : > { %2259 = vmatprep.subr.bf16.mxu0 %v2412_v5  ;;  %2394 = vmatprep.subr.bf16.mxu1 %v2412_v5  ;;  %v2438_v29 = vld [vmem:[%s2529_s23 + $0x60] sm:$0xff]   ;;  %v2440_v31 = vld [vmem:[%s2529_s23 + $0x68] sm:$0xff]   ;;  %v2442_v33 = vld [vmem:[%s2529_s23 + $0x70] sm:$0xff]  }
  0x17   : > { %v2439_v30 = vld [vmem:[%s2529_s23 + $0x160] sm:$0xff]   ;;  %v2441_v32 = vld [vmem:[%s2529_s23 + $0x168] sm:$0xff]   ;;  %v2443_v34 = vld [vmem:[%s2529_s23 + $0x170] sm:$0xff]  }
  0x18   : > { %v2444_v35 = vld [vmem:[%s2529_s23 + $0x78] sm:$0xff]   ;;  %v2446_v37 = vld [vmem:[%s2529_s23 + $0x80] sm:$0xff]   ;;  %v2448_v39 = vld [vmem:[%s2529_s23 + $0x88] sm:$0xff]  }
  0x19   : > { %2260 = vmatpush3.bf16.msra.mxu0 %v2412_v5  ;;  %2399 = vmatpush3.bf16.msra.mxu1 %v2412_v5  ;;  %v2445_v36 = vld [vmem:[%s2529_s23 + $0x178] sm:$0xff]   ;;  %v2447_v38 = vld [vmem:[%s2529_s23 + $0x180] sm:$0xff]   ;;  %v2449_v40 = vld [vmem:[%s2529_s23 + $0x188] sm:$0xff]  }
  0x1a   : > { %2261 = vmatprep.subr.bf16.mxu0 %v2413_v6  ;;  %2395 = vmatprep.subr.bf16.mxu1 %v2413_v6  ;;  %v2450_v41 = vld [vmem:[%s2529_s23 + $0x90] sm:$0xff]   ;;  %v2452_v43 = vld [vmem:[%s2529_s23 + $0x98] sm:$0xff]   ;;  %v2454_v45 = vld [vmem:[%s2529_s23 + $0xa0] sm:$0xff]  }
  0x1b   : > { %v2451_v42 = vld [vmem:[%s2529_s23 + $0x190] sm:$0xff]   ;;  %v2453_v44 = vld [vmem:[%s2529_s23 + $0x198] sm:$0xff]   ;;  %v2455_v46 = vld [vmem:[%s2529_s23 + $0x1a0] sm:$0xff]  }
  0x1c   : > { %v2456_v47 = vld [vmem:[%s2529_s23 + $0xa8] sm:$0xff]   ;;  %v2458_v49 = vld [vmem:[%s2529_s23 + $0xb0] sm:$0xff]   ;;  %v2460_v51 = vld [vmem:[%s2529_s23 + $0xb8] sm:$0xff]  }
  0x1d   : > { %2262 = vmatpush3.bf16.msra.mxu0 %v2413_v6  ;;  %2400 = vmatpush3.bf16.msra.mxu1 %v2413_v6  ;;  %v2457_v48 = vld [vmem:[%s2529_s23 + $0x1a8] sm:$0xff]   ;;  %v2459_v50 = vld [vmem:[%s2529_s23 + $0x1b0] sm:$0xff]   ;;  %v2461_v52 = vld [vmem:[%s2529_s23 + $0x1b8] sm:$0xff]  }
  0x1e   : > { %v2462_v53 = vld [vmem:[%s2529_s23 + $0xc0] sm:$0xff]   ;;  %v2464_v55 = vld [vmem:[%s2529_s23 + $0xc8] sm:$0xff]   ;;  %v2466_v57 = vld [vmem:[%s2529_s23 + $0xd0] sm:$0xff]  }
  0x1f   : > { %v2463_v54 = vld [vmem:[%s2529_s23 + $0x1c0] sm:$0xff]   ;;  %v2465_v56 = vld [vmem:[%s2529_s23 + $0x1c8] sm:$0xff]   ;;  %v2467_v58 = vld [vmem:[%s2529_s23 + $0x1d0] sm:$0xff]  }
  0x20   : > { %2264 = vmatmul.mubr.msk.bf16.vlgmr.msra.gmra.mxu0 %vm660_vm0, %v2416_v7  ;;  %2328 = vmatmul.mubr.msk.bf16.vlgmr.msra.gmra.mxu1 %vm660_vm0, %v2417_v8  ;;  %v2468_v59 = vld [vmem:[%s2529_s23 + $0xd8] sm:$0xff]   ;;  %v2470_v61 = vld [vmem:[%s2529_s23 + $0xe0] sm:$0xff]   ;;  %v2472_v63 = vld [vmem:[%s2529_s23 + $0xe8] sm:$0xff]  }
  0x21   : > { %2267 = vmatprep.mubr.msk.bf16.mxu0 %vm660_vm0, %v2418_v9  ;;  %2331 = vmatprep.mubr.msk.bf16.mxu1 %vm660_vm0, %v2419_v10  ;;  %v2469_v60 = vld [vmem:[%s2529_s23 + $0x1d8] sm:$0xff]   ;;  %v2471_v62 = vld [vmem:[%s2529_s23 + $0x1e0] sm:$0xff]   ;;  %v2473_v0 = vld [vmem:[%s2529_s23 + $0x1e8] sm:$0xff]  }
  0x22   : > { %v2474_v1 = vld [vmem:[%s2529_s23 + $0xf0] sm:$0xff]   ;;  %v2476_v3 = vld [vmem:[%s2529_s23 + $0xf8] sm:$0xff]  }
  0x23   : > { %v2475_v2 = vld [vmem:[%s2529_s23 + $0x1f0] sm:$0xff]   ;;  %v2477_v4 = vld [vmem:[%s2529_s23 + $0x1f8] sm:$0xff]  }
  0x28   : > { %2268 = vmatmul.mubr.msk.bf16.gmra.mxu0 %vm660_vm0, %v2420_v11  ;;  %2332 = vmatmul.mubr.msk.bf16.gmra.mxu1 %vm660_vm0, %v2421_v12 }
  0x29   : > { %2271 = vmatprep.mubr.msk.bf16.mxu0 %vm660_vm0, %v2422_v13  ;;  %2335 = vmatprep.mubr.msk.bf16.mxu1 %vm660_vm0, %v2423_v14  ;;  %v2668_v14 = vld [vmem:[%s2873_s2] ss:$0 sm:$0xff] }
  0x30   : > { %2272 = vmatmul.mubr.msk.bf16.gmra.mxu0 %vm660_vm0, %v2424_v15  ;;  %2336 = vmatmul.mubr.msk.bf16.gmra.mxu1 %vm660_vm0, %v2425_v16 }
  0x31   : > { %2275 = vmatprep.mubr.msk.bf16.mxu0 %vm660_vm0, %v2426_v17  ;;  %2339 = vmatprep.mubr.msk.bf16.mxu1 %vm660_vm0, %v2427_v18 }
  0x38   : > { %2276 = vmatmul.mubr.msk.bf16.gmra.mxu0 %vm660_vm0, %v2428_v19  ;;  %2340 = vmatmul.mubr.msk.bf16.gmra.mxu1 %vm660_vm0, %v2429_v20 }
  0x39   : > { %2279 = vmatprep.mubr.msk.bf16.mxu0 %vm660_vm0, %v2430_v21  ;;  %2343 = vmatprep.mubr.msk.bf16.mxu1 %vm660_vm0, %v2431_v22 }
  0x40   : > { %2280 = vmatmul.mubr.msk.bf16.gmra.mxu0 %vm660_vm0, %v2432_v23  ;;  %2344 = vmatmul.mubr.msk.bf16.gmra.mxu1 %vm660_vm0, %v2433_v24 }
  0x41   : > { %2283 = vmatprep.mubr.msk.bf16.mxu0 %vm660_vm0, %v2434_v25  ;;  %2347 = vmatprep.mubr.msk.bf16.mxu1 %vm660_vm0, %v2435_v26 }
  0x48   : > { %2284 = vmatmul.mubr.msk.bf16.gmra.mxu0 %vm660_vm0, %v2436_v27  ;;  %2348 = vmatmul.mubr.msk.bf16.gmra.mxu1 %vm660_vm0, %v2437_v28 }
  0x49   : > { %2287 = vmatprep.mubr.msk.bf16.mxu0 %vm660_vm0, %v2438_v29  ;;  %2351 = vmatprep.mubr.msk.bf16.mxu1 %vm660_vm0, %v2439_v30 }
  0x50   : > { %2288 = vmatmul.mubr.msk.bf16.gmra.mxu0 %vm660_vm0, %v2440_v31  ;;  %2352 = vmatmul.mubr.msk.bf16.gmra.mxu1 %vm660_vm0, %v2441_v32 }
  0x51   : > { %2291 = vmatprep.mubr.msk.bf16.mxu0 %vm660_vm0, %v2442_v33  ;;  %2355 = vmatprep.mubr.msk.bf16.mxu1 %vm660_vm0, %v2443_v34 }
  0x58   : > { %2292 = vmatmul.mubr.msk.bf16.gmra.mxu0 %vm660_vm0, %v2444_v35  ;;  %2356 = vmatmul.mubr.msk.bf16.gmra.mxu1 %vm660_vm0, %v2445_v36 }
  0x59   : > { %2295 = vmatprep.mubr.msk.bf16.mxu0 %vm660_vm0, %v2446_v37  ;;  %2359 = vmatprep.mubr.msk.bf16.mxu1 %vm660_vm0, %v2447_v38 }
  0x60   : > { %2296 = vmatmul.mubr.msk.bf16.gmra.mxu0 %vm660_vm0, %v2448_v39  ;;  %2360 = vmatmul.mubr.msk.bf16.gmra.mxu1 %vm660_vm0, %v2449_v40 }
  0x61   : > { %2299 = vmatprep.mubr.msk.bf16.mxu0 %vm660_vm0, %v2450_v41  ;;  %2363 = vmatprep.mubr.msk.bf16.mxu1 %vm660_vm0, %v2451_v42 }
  0x68   : > { %2300 = vmatmul.mubr.msk.bf16.gmra.mxu0 %vm660_vm0, %v2452_v43  ;;  %2364 = vmatmul.mubr.msk.bf16.gmra.mxu1 %vm660_vm0, %v2453_v44 }
  0x69   : > { %2303 = vmatprep.mubr.msk.bf16.mxu0 %vm660_vm0, %v2454_v45  ;;  %2367 = vmatprep.mubr.msk.bf16.mxu1 %vm660_vm0, %v2455_v46 }
  0x70   : > { %2304 = vmatmul.mubr.msk.bf16.gmra.mxu0 %vm660_vm0, %v2456_v47  ;;  %2368 = vmatmul.mubr.msk.bf16.gmra.mxu1 %vm660_vm0, %v2457_v48 }
  0x71   : > { %2307 = vmatprep.mubr.msk.bf16.mxu0 %vm660_vm0, %v2458_v49  ;;  %2371 = vmatprep.mubr.msk.bf16.mxu1 %vm660_vm0, %v2459_v50 }
  0x78   : > { %2308 = vmatmul.mubr.msk.bf16.gmra.mxu0 %vm660_vm0, %v2460_v51  ;;  %2372 = vmatmul.mubr.msk.bf16.gmra.mxu1 %vm660_vm0, %v2461_v52 }
  0x79   : > { %2311 = vmatprep.mubr.msk.bf16.mxu0 %vm660_vm0, %v2462_v53  ;;  %2375 = vmatprep.mubr.msk.bf16.mxu1 %vm660_vm0, %v2463_v54 }
  0x80   : > { %2312 = vmatmul.mubr.msk.bf16.gmra.mxu0 %vm660_vm0, %v2464_v55  ;;  %2376 = vmatmul.mubr.msk.bf16.gmra.mxu1 %vm660_vm0, %v2465_v56 }
  0x81   : > { %2315 = vmatprep.mubr.msk.bf16.mxu0 %vm660_vm0, %v2466_v57  ;;  %2379 = vmatprep.mubr.msk.bf16.mxu1 %vm660_vm0, %v2467_v58 }
  0x88   : > { %2316 = vmatmul.mubr.msk.bf16.gmra.mxu0 %vm660_vm0, %v2468_v59  ;;  %2380 = vmatmul.mubr.msk.bf16.gmra.mxu1 %vm660_vm0, %v2469_v60 }
  0x89   : > { %2319 = vmatprep.mubr.msk.bf16.mxu0 %vm660_vm0, %v2470_v61  ;;  %2383 = vmatprep.mubr.msk.bf16.mxu1 %vm660_vm0, %v2471_v62 }
  0x90   : > { %2320 = vmatmul.mubr.msk.bf16.gmra.mxu0 %vm660_vm0, %v2472_v63  ;;  %2384 = vmatmul.mubr.msk.bf16.gmra.mxu1 %vm660_vm0, %v2473_v0 }
  0x91   : > { %2323 = vmatprep.mubr.msk.bf16.mxu0 %vm660_vm0, %v2474_v1  ;;  %2387 = vmatprep.mubr.msk.bf16.mxu1 %vm660_vm0, %v2475_v2 }
  0x98   : > { %2324 = vmatmul.mubr.msk.bf16.gmra.mxu0 %vm660_vm0, %v2476_v3  ;;  %2388 = vmatmul.mubr.msk.bf16.gmra.mxu1 %vm660_vm0, %v2477_v4 }
  0xe0   : > { %v2265_v5 = vpop.f32.mrf.mxu0  ;;  %v2329_v6 = vpop.f32.mrf.mxu1 }
  0xe2   : > { %v887_v7 = vpop.f32.mrf.mxu0  ;;  %v1143_v8 = vpop.f32.mrf.mxu1 }
  0xe4   : > { %v2266_v9 = vpop.f32.mrf.mxu0  ;;  %v2330_v10 = vpop.f32.mrf.mxu1 }
  0xe6   : > { %v890_v11 = vpop.f32.mrf.mxu0  ;;  %v1146_v12 = vpop.f32.mrf.mxu1 }
  0xe8   : > { %v2269_v13 = vpop.f32.mrf.mxu0  ;;  %v2333_v15 = vpop.f32.mrf.mxu1 }
  0xe9   : > { %v1400_v16 = vmax.f32 %v2265_v5, %v2269_v13  ;;  %v1432_v17 = vmax.f32 %v2329_v6, %v2333_v15 }
  0xea   : > { %v903_v18 = vpop.f32.mrf.mxu0  ;;  %v1159_v19 = vpop.f32.mrf.mxu1 }
  0xeb   : > { %v1471_v20 = vadd.f32 %v2668_v14, %v1400_v16  ;;  %v1503_v21 = vadd.f32 %v2668_v14, %v1432_v17  ;;  %v1398_v22 = vmax.f32 %v887_v7, %v903_v18  ;;  %v1430_v23 = vmax.f32 %v1143_v8, %v1159_v19 }
  0xec   : > { %v2270_v24 = vpop.f32.mrf.mxu0  ;;  %v2334_v25 = vpop.f32.mrf.mxu1 }
  0xed   : > { %v2122_v26 = vpack.c.bf16 %v1471_v20, %v1471_v20  ;;  %v2154_v27 = vpack.c.bf16 %v1503_v21, %v1503_v21  ;;  %v1469_v28 = vadd.f32 %v2668_v14, %v1398_v22  ;;  %v1501_v29 = vadd.f32 %v2668_v14, %v1430_v23 }
  0xee   : > { %v1401_v30 = vmax.f32 %v2266_v9, %v2270_v24  ;;  %v1433_v31 = vmax.f32 %v2330_v10, %v2334_v25  ;;  %v906_v32 = vpop.f32.mrf.mxu0  ;;  %v1162_v33 = vpop.f32.mrf.mxu1 }
  0xef   : > { %1792 = vst.msk [vmem:[%s2676_s6 + $0x8] sm:$0xf] %vm1789_vm1, %v2122_v26  ;;  %1824 = vst.msk [vmem:[%s2676_s6 + $0x88] sm:$0xf] %vm1789_vm1, %v2154_v27  ;;  %v2120_v34 = vpack.c.bf16 %v1469_v28, %v1469_v28  ;;  %v2152_v35 = vpack.c.bf16 %v1501_v29, %v1501_v29  ;;  %v1399_v36 = vmax.f32 %v890_v11, %v906_v32 }
  0xf0   : > { %v1431_v37 = vmax.f32 %v1146_v12, %v1162_v33  ;;  %v1472_v38 = vadd.f32 %v2668_v14, %v1401_v30  ;;  %v1504_v39 = vadd.f32 %v2668_v14, %v1433_v31  ;;  %v2273_v40 = vpop.f32.mrf.mxu0  ;;  %v2337_v41 = vpop.f32.mrf.mxu1 }
  0xf1   : > { %1790 = vst.msk [vmem:[%s2676_s6] sm:$0xf] %vm1789_vm1, %v2120_v34  ;;  %1822 = vst.msk [vmem:[%s2676_s6 + $0x80] sm:$0xf] %vm1789_vm1, %v2152_v35  ;;  %v1470_v42 = vadd.f32 %v2668_v14, %v1399_v36 }
  0xf2   : > { %v1502_v43 = vadd.f32 %v2668_v14, %v1431_v37  ;;  %v2123_v44 = vpack.c.bf16 %v1472_v38, %v1472_v38  ;;  %v2155_v45 = vpack.c.bf16 %v1504_v39, %v1504_v39  ;;  %v919_v46 = vpop.f32.mrf.mxu0  ;;  %v1175_v47 = vpop.f32.mrf.mxu1 }
  0xf3   : > { %v2121_v48 = vpack.c.bf16 %v1470_v42, %v1470_v42 }
  0xf4   : > { %v2153_v49 = vpack.c.bf16 %v1502_v43, %v1502_v43  ;;  %1793 = vst.msk [vmem:[%s2676_s6 + $0xc] sm:$0xf] %vm1789_vm1, %v2123_v44  ;;  %1825 = vst.msk [vmem:[%s2676_s6 + $0x8c] sm:$0xf] %vm1789_vm1, %v2155_v45  ;;  %v2274_v50 = vpop.f32.mrf.mxu0  ;;  %v2338_v51 = vpop.f32.mrf.mxu1 }
  0xf5   : > { %1791 = vst.msk [vmem:[%s2676_s6 + $0x4] sm:$0xf] %vm1789_vm1, %v2121_v48 }
  0xf6   : > { %1823 = vst.msk [vmem:[%s2676_s6 + $0x84] sm:$0xf] %vm1789_vm1, %v2153_v49  ;;  %v922_v52 = vpop.f32.mrf.mxu0  ;;  %v1178_v53 = vpop.f32.mrf.mxu1 }
  0xf8   : > { %v2277_v54 = vpop.f32.mrf.mxu0  ;;  %v2341_v55 = vpop.f32.mrf.mxu1 }
  0xf9   : > { %v1404_v56 = vmax.f32 %v2273_v40, %v2277_v54  ;;  %v1436_v57 = vmax.f32 %v2337_v41, %v2341_v55 }
  0xfa   : > { %v935_v58 = vpop.f32.mrf.mxu0  ;;  %v1191_v59 = vpop.f32.mrf.mxu1 }
  0xfb   : > { %v1475_v60 = vadd.f32 %v2668_v14, %v1404_v56  ;;  %v1507_v61 = vadd.f32 %v2668_v14, %v1436_v57  ;;  %v1402_v62 = vmax.f32 %v919_v46, %v935_v58  ;;  %v1434_v63 = vmax.f32 %v1175_v47, %v1191_v59 }
  0xfc   : > { %v2278_v0 = vpop.f32.mrf.mxu0  ;;  %v2342_v1 = vpop.f32.mrf.mxu1 }
  0xfd   : > { %v2126_v2 = vpack.c.bf16 %v1475_v60, %v1475_v60  ;;  %v2158_v3 = vpack.c.bf16 %v1507_v61, %v1507_v61  ;;  %v1473_v4 = vadd.f32 %v2668_v14, %v1402_v62  ;;  %v1505_v5 = vadd.f32 %v2668_v14, %v1434_v63 }
  0xfe   : > { %v1405_v6 = vmax.f32 %v2274_v50, %v2278_v0  ;;  %v1437_v7 = vmax.f32 %v2338_v51, %v2342_v1  ;;  %v938_v8 = vpop.f32.mrf.mxu0  ;;  %v1194_v9 = vpop.f32.mrf.mxu1 }
  0xff   : > { %1796 = vst.msk [vmem:[%s2676_s6 + $0x18] sm:$0xf] %vm1789_vm1, %v2126_v2  ;;  %1828 = vst.msk [vmem:[%s2676_s6 + $0x98] sm:$0xf] %vm1789_vm1, %v2158_v3  ;;  %v2124_v10 = vpack.c.bf16 %v1473_v4, %v1473_v4  ;;  %v2156_v11 = vpack.c.bf16 %v1505_v5, %v1505_v5  ;;  %v1403_v12 = vmax.f32 %v922_v52, %v938_v8 }
 0x100   : > { %v1435_v13 = vmax.f32 %v1178_v53, %v1194_v9  ;;  %v1476_v15 = vadd.f32 %v2668_v14, %v1405_v6  ;;  %v1508_v16 = vadd.f32 %v2668_v14, %v1437_v7  ;;  %v2281_v17 = vpop.f32.mrf.mxu0  ;;  %v2345_v18 = vpop.f32.mrf.mxu1 }
 0x101   : > { %1794 = vst.msk [vmem:[%s2676_s6 + $0x10] sm:$0xf] %vm1789_vm1, %v2124_v10  ;;  %1826 = vst.msk [vmem:[%s2676_s6 + $0x90] sm:$0xf] %vm1789_vm1, %v2156_v11  ;;  %v1474_v19 = vadd.f32 %v2668_v14, %v1403_v12 }
 0x102   : > { %v1506_v20 = vadd.f32 %v2668_v14, %v1435_v13  ;;  %v2127_v21 = vpack.c.bf16 %v1476_v15, %v1476_v15  ;;  %v2159_v22 = vpack.c.bf16 %v1508_v16, %v1508_v16  ;;  %v951_v23 = vpop.f32.mrf.mxu0  ;;  %v1207_v24 = vpop.f32.mrf.mxu1 }
 0x103   : > { %v2125_v25 = vpack.c.bf16 %v1474_v19, %v1474_v19 }
 0x104   : > { %v2157_v26 = vpack.c.bf16 %v1506_v20, %v1506_v20  ;;  %1797 = vst.msk [vmem:[%s2676_s6 + $0x1c] sm:$0xf] %vm1789_vm1, %v2127_v21  ;;  %1829 = vst.msk [vmem:[%s2676_s6 + $0x9c] sm:$0xf] %vm1789_vm1, %v2159_v22  ;;  %v2282_v27 = vpop.f32.mrf.mxu0  ;;  %v2346_v28 = vpop.f32.mrf.mxu1 }
 0x105   : > { %1795 = vst.msk [vmem:[%s2676_s6 + $0x14] sm:$0xf] %vm1789_vm1, %v2125_v25 }
 0x106   : > { %1827 = vst.msk [vmem:[%s2676_s6 + $0x94] sm:$0xf] %vm1789_vm1, %v2157_v26  ;;  %v954_v29 = vpop.f32.mrf.mxu0  ;;  %v1210_v30 = vpop.f32.mrf.mxu1 }
 0x108   : > { %v2285_v31 = vpop.f32.mrf.mxu0  ;;  %v2349_v32 = vpop.f32.mrf.mxu1 }
 0x109   : > { %v1408_v33 = vmax.f32 %v2281_v17, %v2285_v31  ;;  %v1440_v34 = vmax.f32 %v2345_v18, %v2349_v32 }
 0x10a   : > { %v967_v35 = vpop.f32.mrf.mxu0  ;;  %v1223_v36 = vpop.f32.mrf.mxu1 }
 0x10b   : > { %v1479_v37 = vadd.f32 %v2668_v14, %v1408_v33  ;;  %v1511_v38 = vadd.f32 %v2668_v14, %v1440_v34  ;;  %v1406_v39 = vmax.f32 %v951_v23, %v967_v35  ;;  %v1438_v40 = vmax.f32 %v1207_v24, %v1223_v36 }
 0x10c   : > { %v2286_v41 = vpop.f32.mrf.mxu0  ;;  %v2350_v42 = vpop.f32.mrf.mxu1 }
 0x10d   : > { %v2130_v43 = vpack.c.bf16 %v1479_v37, %v1479_v37  ;;  %v2162_v44 = vpack.c.bf16 %v1511_v38, %v1511_v38  ;;  %v1477_v45 = vadd.f32 %v2668_v14, %v1406_v39  ;;  %v1509_v46 = vadd.f32 %v2668_v14, %v1438_v40 }
 0x10e   : > { %v1409_v47 = vmax.f32 %v2282_v27, %v2286_v41  ;;  %v1441_v48 = vmax.f32 %v2346_v28, %v2350_v42  ;;  %v970_v49 = vpop.f32.mrf.mxu0  ;;  %v1226_v50 = vpop.f32.mrf.mxu1 }
 0x10f   : > { %1800 = vst.msk [vmem:[%s2676_s6 + $0x28] sm:$0xf] %vm1789_vm1, %v2130_v43  ;;  %1832 = vst.msk [vmem:[%s2676_s6 + $0xa8] sm:$0xf] %vm1789_vm1, %v2162_v44  ;;  %v2128_v51 = vpack.c.bf16 %v1477_v45, %v1477_v45  ;;  %v2160_v52 = vpack.c.bf16 %v1509_v46, %v1509_v46  ;;  %v1407_v53 = vmax.f32 %v954_v29, %v970_v49 }
 0x110   : > { %v1439_v54 = vmax.f32 %v1210_v30, %v1226_v50  ;;  %v1480_v55 = vadd.f32 %v2668_v14, %v1409_v47  ;;  %v1512_v56 = vadd.f32 %v2668_v14, %v1441_v48  ;;  %v2289_v57 = vpop.f32.mrf.mxu0  ;;  %v2353_v58 = vpop.f32.mrf.mxu1 }
 0x111   : > { %1798 = vst.msk [vmem:[%s2676_s6 + $0x20] sm:$0xf] %vm1789_vm1, %v2128_v51  ;;  %1830 = vst.msk [vmem:[%s2676_s6 + $0xa0] sm:$0xf] %vm1789_vm1, %v2160_v52  ;;  %v1478_v59 = vadd.f32 %v2668_v14, %v1407_v53 }
 0x112   : > { %v1510_v60 = vadd.f32 %v2668_v14, %v1439_v54  ;;  %v2131_v61 = vpack.c.bf16 %v1480_v55, %v1480_v55  ;;  %v2163_v62 = vpack.c.bf16 %v1512_v56, %v1512_v56  ;;  %v983_v63 = vpop.f32.mrf.mxu0  ;;  %v1239_v0 = vpop.f32.mrf.mxu1 }
 0x113   : > { %v2129_v1 = vpack.c.bf16 %v1478_v59, %v1478_v59 }
 0x114   : > { %v2161_v2 = vpack.c.bf16 %v1510_v60, %v1510_v60  ;;  %1801 = vst.msk [vmem:[%s2676_s6 + $0x2c] sm:$0xf] %vm1789_vm1, %v2131_v61  ;;  %1833 = vst.msk [vmem:[%s2676_s6 + $0xac] sm:$0xf] %vm1789_vm1, %v2163_v62  ;;  %v2290_v3 = vpop.f32.mrf.mxu0  ;;  %v2354_v4 = vpop.f32.mrf.mxu1 }
 0x115   : > { %1799 = vst.msk [vmem:[%s2676_s6 + $0x24] sm:$0xf] %vm1789_vm1, %v2129_v1 }
 0x116   : > { %1831 = vst.msk [vmem:[%s2676_s6 + $0xa4] sm:$0xf] %vm1789_vm1, %v2161_v2  ;;  %v986_v5 = vpop.f32.mrf.mxu0  ;;  %v1242_v6 = vpop.f32.mrf.mxu1 }
 0x118   : > { %v2293_v7 = vpop.f32.mrf.mxu0  ;;  %v2357_v8 = vpop.f32.mrf.mxu1 }
 0x119   : > { %v1412_v9 = vmax.f32 %v2289_v57, %v2293_v7  ;;  %v1444_v10 = vmax.f32 %v2353_v58, %v2357_v8 }
 0x11a   : > { %v999_v11 = vpop.f32.mrf.mxu0  ;;  %v1255_v12 = vpop.f32.mrf.mxu1 }
 0x11b   : > { %v1483_v13 = vadd.f32 %v2668_v14, %v1412_v9  ;;  %v1515_v15 = vadd.f32 %v2668_v14, %v1444_v10  ;;  %v1410_v16 = vmax.f32 %v983_v63, %v999_v11  ;;  %v1442_v17 = vmax.f32 %v1239_v0, %v1255_v12 }
 0x11c   : > { %v2294_v18 = vpop.f32.mrf.mxu0  ;;  %v2358_v19 = vpop.f32.mrf.mxu1 }
 0x11d   : > { %v2134_v20 = vpack.c.bf16 %v1483_v13, %v1483_v13  ;;  %v2166_v21 = vpack.c.bf16 %v1515_v15, %v1515_v15  ;;  %v1481_v22 = vadd.f32 %v2668_v14, %v1410_v16  ;;  %v1513_v23 = vadd.f32 %v2668_v14, %v1442_v17 }
 0x11e   : > { %v1413_v24 = vmax.f32 %v2290_v3, %v2294_v18  ;;  %v1445_v25 = vmax.f32 %v2354_v4, %v2358_v19  ;;  %v1002_v26 = vpop.f32.mrf.mxu0  ;;  %v1258_v27 = vpop.f32.mrf.mxu1 }
 0x11f   : > { %1804 = vst.msk [vmem:[%s2676_s6 + $0x38] sm:$0xf] %vm1789_vm1, %v2134_v20  ;;  %1836 = vst.msk [vmem:[%s2676_s6 + $0xb8] sm:$0xf] %vm1789_vm1, %v2166_v21  ;;  %v2132_v28 = vpack.c.bf16 %v1481_v22, %v1481_v22  ;;  %v2164_v29 = vpack.c.bf16 %v1513_v23, %v1513_v23  ;;  %v1411_v30 = vmax.f32 %v986_v5, %v1002_v26 }
 0x120   : > { %v1443_v31 = vmax.f32 %v1242_v6, %v1258_v27  ;;  %v1484_v32 = vadd.f32 %v2668_v14, %v1413_v24  ;;  %v1516_v33 = vadd.f32 %v2668_v14, %v1445_v25  ;;  %v2297_v34 = vpop.f32.mrf.mxu0  ;;  %v2361_v35 = vpop.f32.mrf.mxu1 }
 0x121   : > { %1802 = vst.msk [vmem:[%s2676_s6 + $0x30] sm:$0xf] %vm1789_vm1, %v2132_v28  ;;  %1834 = vst.msk [vmem:[%s2676_s6 + $0xb0] sm:$0xf] %vm1789_vm1, %v2164_v29  ;;  %v1482_v36 = vadd.f32 %v2668_v14, %v1411_v30 }
 0x122   : > { %v1514_v37 = vadd.f32 %v2668_v14, %v1443_v31  ;;  %v2135_v38 = vpack.c.bf16 %v1484_v32, %v1484_v32  ;;  %v2167_v39 = vpack.c.bf16 %v1516_v33, %v1516_v33  ;;  %v1015_v40 = vpop.f32.mrf.mxu0  ;;  %v1271_v41 = vpop.f32.mrf.mxu1 }
 0x123   : > { %v2133_v42 = vpack.c.bf16 %v1482_v36, %v1482_v36 }
 0x124   : > { %v2165_v43 = vpack.c.bf16 %v1514_v37, %v1514_v37  ;;  %1805 = vst.msk [vmem:[%s2676_s6 + $0x3c] sm:$0xf] %vm1789_vm1, %v2135_v38  ;;  %1837 = vst.msk [vmem:[%s2676_s6 + $0xbc] sm:$0xf] %vm1789_vm1, %v2167_v39  ;;  %v2298_v44 = vpop.f32.mrf.mxu0  ;;  %v2362_v45 = vpop.f32.mrf.mxu1 }
 0x125   : > { %1803 = vst.msk [vmem:[%s2676_s6 + $0x34] sm:$0xf] %vm1789_vm1, %v2133_v42 }
 0x126   : > { %1835 = vst.msk [vmem:[%s2676_s6 + $0xb4] sm:$0xf] %vm1789_vm1, %v2165_v43  ;;  %v1018_v46 = vpop.f32.mrf.mxu0  ;;  %v1274_v47 = vpop.f32.mrf.mxu1 }
 0x128   : > { %v2301_v48 = vpop.f32.mrf.mxu0  ;;  %v2365_v49 = vpop.f32.mrf.mxu1 }
 0x129   : > { %v1416_v50 = vmax.f32 %v2297_v34, %v2301_v48  ;;  %v1448_v51 = vmax.f32 %v2361_v35, %v2365_v49 }
 0x12a   : > { %v1031_v52 = vpop.f32.mrf.mxu0  ;;  %v1287_v53 = vpop.f32.mrf.mxu1 }
 0x12b   : > { %v1487_v54 = vadd.f32 %v2668_v14, %v1416_v50  ;;  %v1519_v55 = vadd.f32 %v2668_v14, %v1448_v51  ;;  %v1414_v56 = vmax.f32 %v1015_v40, %v1031_v52  ;;  %v1446_v57 = vmax.f32 %v1271_v41, %v1287_v53 }
 0x12c   : > { %v2302_v58 = vpop.f32.mrf.mxu0  ;;  %v2366_v59 = vpop.f32.mrf.mxu1 }
 0x12d   : > { %v2138_v60 = vpack.c.bf16 %v1487_v54, %v1487_v54  ;;  %v2170_v61 = vpack.c.bf16 %v1519_v55, %v1519_v55  ;;  %v1485_v62 = vadd.f32 %v2668_v14, %v1414_v56  ;;  %v1517_v63 = vadd.f32 %v2668_v14, %v1446_v57 }
 0x12e   : > { %v1417_v0 = vmax.f32 %v2298_v44, %v2302_v58  ;;  %v1449_v1 = vmax.f32 %v2362_v45, %v2366_v59  ;;  %v1034_v2 = vpop.f32.mrf.mxu0  ;;  %v1290_v3 = vpop.f32.mrf.mxu1 }
 0x12f   : > { %1808 = vst.msk [vmem:[%s2676_s6 + $0x48] sm:$0xf] %vm1789_vm1, %v2138_v60  ;;  %1840 = vst.msk [vmem:[%s2676_s6 + $0xc8] sm:$0xf] %vm1789_vm1, %v2170_v61  ;;  %v2136_v4 = vpack.c.bf16 %v1485_v62, %v1485_v62  ;;  %v2168_v5 = vpack.c.bf16 %v1517_v63, %v1517_v63  ;;  %v1415_v6 = vmax.f32 %v1018_v46, %v1034_v2 }
 0x130   : > { %v1447_v7 = vmax.f32 %v1274_v47, %v1290_v3  ;;  %v1488_v8 = vadd.f32 %v2668_v14, %v1417_v0  ;;  %v1520_v9 = vadd.f32 %v2668_v14, %v1449_v1  ;;  %v2305_v10 = vpop.f32.mrf.mxu0  ;;  %v2369_v11 = vpop.f32.mrf.mxu1 }
 0x131   : > { %1806 = vst.msk [vmem:[%s2676_s6 + $0x40] sm:$0xf] %vm1789_vm1, %v2136_v4  ;;  %1838 = vst.msk [vmem:[%s2676_s6 + $0xc0] sm:$0xf] %vm1789_vm1, %v2168_v5  ;;  %v1486_v12 = vadd.f32 %v2668_v14, %v1415_v6 }
 0x132   : > { %v1518_v13 = vadd.f32 %v2668_v14, %v1447_v7  ;;  %v2139_v15 = vpack.c.bf16 %v1488_v8, %v1488_v8  ;;  %v2171_v16 = vpack.c.bf16 %v1520_v9, %v1520_v9  ;;  %v1047_v17 = vpop.f32.mrf.mxu0  ;;  %v1303_v18 = vpop.f32.mrf.mxu1 }
 0x133   : > { %v2137_v19 = vpack.c.bf16 %v1486_v12, %v1486_v12 }
 0x134   : > { %v2169_v20 = vpack.c.bf16 %v1518_v13, %v1518_v13  ;;  %1809 = vst.msk [vmem:[%s2676_s6 + $0x4c] sm:$0xf] %vm1789_vm1, %v2139_v15  ;;  %1841 = vst.msk [vmem:[%s2676_s6 + $0xcc] sm:$0xf] %vm1789_vm1, %v2171_v16  ;;  %v2306_v21 = vpop.f32.mrf.mxu0  ;;  %v2370_v22 = vpop.f32.mrf.mxu1 }
 0x135   : > { %1807 = vst.msk [vmem:[%s2676_s6 + $0x44] sm:$0xf] %vm1789_vm1, %v2137_v19 }
 0x136   : > { %1839 = vst.msk [vmem:[%s2676_s6 + $0xc4] sm:$0xf] %vm1789_vm1, %v2169_v20  ;;  %v1050_v23 = vpop.f32.mrf.mxu0  ;;  %v1306_v24 = vpop.f32.mrf.mxu1 }
 0x138   : > { %v2309_v25 = vpop.f32.mrf.mxu0  ;;  %v2373_v26 = vpop.f32.mrf.mxu1 }
 0x139   : > { %v1420_v27 = vmax.f32 %v2305_v10, %v2309_v25  ;;  %v1452_v28 = vmax.f32 %v2369_v11, %v2373_v26 }
 0x13a   : > { %v1063_v29 = vpop.f32.mrf.mxu0  ;;  %v1319_v30 = vpop.f32.mrf.mxu1 }
 0x13b   : > { %v1491_v31 = vadd.f32 %v2668_v14, %v1420_v27  ;;  %v1523_v32 = vadd.f32 %v2668_v14, %v1452_v28  ;;  %v1418_v33 = vmax.f32 %v1047_v17, %v1063_v29  ;;  %v1450_v34 = vmax.f32 %v1303_v18, %v1319_v30 }
 0x13c   : > { %v2310_v35 = vpop.f32.mrf.mxu0  ;;  %v2374_v36 = vpop.f32.mrf.mxu1 }
 0x13d   : > { %v2142_v37 = vpack.c.bf16 %v1491_v31, %v1491_v31  ;;  %v2174_v38 = vpack.c.bf16 %v1523_v32, %v1523_v32  ;;  %v1489_v39 = vadd.f32 %v2668_v14, %v1418_v33  ;;  %v1521_v40 = vadd.f32 %v2668_v14, %v1450_v34 }
 0x13e   : > { %v1421_v41 = vmax.f32 %v2306_v21, %v2310_v35  ;;  %v1453_v42 = vmax.f32 %v2370_v22, %v2374_v36  ;;  %v1066_v43 = vpop.f32.mrf.mxu0  ;;  %v1322_v44 = vpop.f32.mrf.mxu1 }
 0x13f   : > { %1812 = vst.msk [vmem:[%s2676_s6 + $0x58] sm:$0xf] %vm1789_vm1, %v2142_v37  ;;  %1844 = vst.msk [vmem:[%s2676_s6 + $0xd8] sm:$0xf] %vm1789_vm1, %v2174_v38  ;;  %v2140_v45 = vpack.c.bf16 %v1489_v39, %v1489_v39  ;;  %v2172_v46 = vpack.c.bf16 %v1521_v40, %v1521_v40  ;;  %v1419_v47 = vmax.f32 %v1050_v23, %v1066_v43 }
 0x140   : > { %v1451_v48 = vmax.f32 %v1306_v24, %v1322_v44  ;;  %v1492_v49 = vadd.f32 %v2668_v14, %v1421_v41  ;;  %v1524_v50 = vadd.f32 %v2668_v14, %v1453_v42  ;;  %v2313_v51 = vpop.f32.mrf.mxu0  ;;  %v2377_v52 = vpop.f32.mrf.mxu1 }
 0x141   : > { %1810 = vst.msk [vmem:[%s2676_s6 + $0x50] sm:$0xf] %vm1789_vm1, %v2140_v45  ;;  %1842 = vst.msk [vmem:[%s2676_s6 + $0xd0] sm:$0xf] %vm1789_vm1, %v2172_v46  ;;  %v1490_v53 = vadd.f32 %v2668_v14, %v1419_v47 }
 0x142   : > { %v1522_v54 = vadd.f32 %v2668_v14, %v1451_v48  ;;  %v2143_v55 = vpack.c.bf16 %v1492_v49, %v1492_v49  ;;  %v2175_v56 = vpack.c.bf16 %v1524_v50, %v1524_v50  ;;  %v1079_v57 = vpop.f32.mrf.mxu0  ;;  %v1335_v58 = vpop.f32.mrf.mxu1 }
 0x143   : > { %v2141_v59 = vpack.c.bf16 %v1490_v53, %v1490_v53 }
 0x144   : > { %v2173_v60 = vpack.c.bf16 %v1522_v54, %v1522_v54  ;;  %1813 = vst.msk [vmem:[%s2676_s6 + $0x5c] sm:$0xf] %vm1789_vm1, %v2143_v55  ;;  %1845 = vst.msk [vmem:[%s2676_s6 + $0xdc] sm:$0xf] %vm1789_vm1, %v2175_v56  ;;  %v2314_v61 = vpop.f32.mrf.mxu0  ;;  %v2378_v62 = vpop.f32.mrf.mxu1 }
 0x145   : > { %1811 = vst.msk [vmem:[%s2676_s6 + $0x54] sm:$0xf] %vm1789_vm1, %v2141_v59 }
 0x146   : > { %1843 = vst.msk [vmem:[%s2676_s6 + $0xd4] sm:$0xf] %vm1789_vm1, %v2173_v60  ;;  %v1082_v63 = vpop.f32.mrf.mxu0  ;;  %v1338_v0 = vpop.f32.mrf.mxu1 }
 0x148   : > { %v2317_v1 = vpop.f32.mrf.mxu0  ;;  %v2381_v2 = vpop.f32.mrf.mxu1 }
 0x149   : > { %v1424_v3 = vmax.f32 %v2313_v51, %v2317_v1  ;;  %v1456_v4 = vmax.f32 %v2377_v52, %v2381_v2 }
 0x14a   : > { %v1095_v5 = vpop.f32.mrf.mxu0  ;;  %v1351_v6 = vpop.f32.mrf.mxu1 }
 0x14b   : > { %v1495_v7 = vadd.f32 %v2668_v14, %v1424_v3  ;;  %v1527_v8 = vadd.f32 %v2668_v14, %v1456_v4  ;;  %v1422_v9 = vmax.f32 %v1079_v57, %v1095_v5  ;;  %v1454_v10 = vmax.f32 %v1335_v58, %v1351_v6 }
 0x14c   : > { %v2318_v11 = vpop.f32.mrf.mxu0  ;;  %v2382_v12 = vpop.f32.mrf.mxu1 }
 0x14d   : > { %v2146_v13 = vpack.c.bf16 %v1495_v7, %v1495_v7  ;;  %v2178_v15 = vpack.c.bf16 %v1527_v8, %v1527_v8  ;;  %v1493_v16 = vadd.f32 %v2668_v14, %v1422_v9  ;;  %v1525_v17 = vadd.f32 %v2668_v14, %v1454_v10 }
 0x14e   : > { %v1425_v18 = vmax.f32 %v2314_v61, %v2318_v11  ;;  %v1457_v19 = vmax.f32 %v2378_v62, %v2382_v12  ;;  %v1098_v20 = vpop.f32.mrf.mxu0  ;;  %v1354_v21 = vpop.f32.mrf.mxu1 }
 0x14f   : > { %1816 = vst.msk [vmem:[%s2676_s6 + $0x68] sm:$0xf] %vm1789_vm1, %v2146_v13  ;;  %1848 = vst.msk [vmem:[%s2676_s6 + $0xe8] sm:$0xf] %vm1789_vm1, %v2178_v15  ;;  %v2144_v22 = vpack.c.bf16 %v1493_v16, %v1493_v16  ;;  %v2176_v23 = vpack.c.bf16 %v1525_v17, %v1525_v17  ;;  %v1423_v24 = vmax.f32 %v1082_v63, %v1098_v20 }
 0x150   : > { %v1455_v25 = vmax.f32 %v1338_v0, %v1354_v21  ;;  %v1496_v26 = vadd.f32 %v2668_v14, %v1425_v18  ;;  %v1528_v27 = vadd.f32 %v2668_v14, %v1457_v19  ;;  %v2321_v28 = vpop.f32.mrf.mxu0  ;;  %v2385_v29 = vpop.f32.mrf.mxu1 }
 0x151   : > { %1814 = vst.msk [vmem:[%s2676_s6 + $0x60] sm:$0xf] %vm1789_vm1, %v2144_v22  ;;  %1846 = vst.msk [vmem:[%s2676_s6 + $0xe0] sm:$0xf] %vm1789_vm1, %v2176_v23  ;;  %v1494_v30 = vadd.f32 %v2668_v14, %v1423_v24 }
 0x152   : > { %v1526_v31 = vadd.f32 %v2668_v14, %v1455_v25  ;;  %v2147_v32 = vpack.c.bf16 %v1496_v26, %v1496_v26  ;;  %v2179_v33 = vpack.c.bf16 %v1528_v27, %v1528_v27  ;;  %v1111_v34 = vpop.f32.mrf.mxu0  ;;  %v1367_v35 = vpop.f32.mrf.mxu1 }
 0x153   : > { %v2145_v36 = vpack.c.bf16 %v1494_v30, %v1494_v30 }
 0x154   : > { %v2177_v37 = vpack.c.bf16 %v1526_v31, %v1526_v31  ;;  %1817 = vst.msk [vmem:[%s2676_s6 + $0x6c] sm:$0xf] %vm1789_vm1, %v2147_v32  ;;  %1849 = vst.msk [vmem:[%s2676_s6 + $0xec] sm:$0xf] %vm1789_vm1, %v2179_v33  ;;  %v2322_v38 = vpop.f32.mrf.mxu0  ;;  %v2386_v39 = vpop.f32.mrf.mxu1 }
 0x155   : > { %1815 = vst.msk [vmem:[%s2676_s6 + $0x64] sm:$0xf] %vm1789_vm1, %v2145_v36 }
 0x156   : > { %1847 = vst.msk [vmem:[%s2676_s6 + $0xe4] sm:$0xf] %vm1789_vm1, %v2177_v37  ;;  %v1114_v40 = vpop.f32.mrf.mxu0  ;;  %v1370_v41 = vpop.f32.mrf.mxu1 }
 0x158   : > { %v2325_v42 = vpop.f32.mrf.mxu0  ;;  %v2389_v43 = vpop.f32.mrf.mxu1 }
 0x159   : > { %v1428_v44 = vmax.f32 %v2321_v28, %v2325_v42  ;;  %v1460_v45 = vmax.f32 %v2385_v29, %v2389_v43 }
 0x15a   : > { %v1127_v46 = vpop.f32.mrf.mxu0  ;;  %v1383_v47 = vpop.f32.mrf.mxu1 }
 0x15b   : > { %v1499_v48 = vadd.f32 %v2668_v14, %v1428_v44  ;;  %v1531_v49 = vadd.f32 %v2668_v14, %v1460_v45  ;;  %v1426_v50 = vmax.f32 %v1111_v34, %v1127_v46  ;;  %v1458_v51 = vmax.f32 %v1367_v35, %v1383_v47 }
 0x15c   : > { %v2326_v52 = vpop.f32.mrf.mxu0  ;;  %v2390_v53 = vpop.f32.mrf.mxu1 }
 0x15d   : > { %v2150_v54 = vpack.c.bf16 %v1499_v48, %v1499_v48  ;;  %v2182_v55 = vpack.c.bf16 %v1531_v49, %v1531_v49  ;;  %v1497_v56 = vadd.f32 %v2668_v14, %v1426_v50  ;;  %v1529_v57 = vadd.f32 %v2668_v14, %v1458_v51 }
 0x15e   : > { %v1429_v58 = vmax.f32 %v2322_v38, %v2326_v52  ;;  %v1461_v59 = vmax.f32 %v2386_v39, %v2390_v53  ;;  %v1130_v60 = vpop.f32.mrf.mxu0  ;;  %v1386_v61 = vpop.f32.mrf.mxu1 }
 0x15f   : > { %1820 = vst.msk [vmem:[%s2676_s6 + $0x78] sm:$0xf] %vm1789_vm1, %v2150_v54  ;;  %1852 = vst.msk [vmem:[%s2676_s6 + $0xf8] sm:$0xf] %vm1789_vm1, %v2182_v55  ;;  %v2148_v62 = vpack.c.bf16 %v1497_v56, %v1497_v56  ;;  %v2180_v63 = vpack.c.bf16 %v1529_v57, %v1529_v57  ;;  %v1427_v0 = vmax.f32 %v1114_v40, %v1130_v60 }
 0x160   : > { %v1459_v1 = vmax.f32 %v1370_v41, %v1386_v61  ;;  %v1500_v2 = vadd.f32 %v2668_v14, %v1429_v58  ;;  %v1532_v3 = vadd.f32 %v2668_v14, %v1461_v59 }
 0x161   : > { %1818 = vst.msk [vmem:[%s2676_s6 + $0x70] sm:$0xf] %vm1789_vm1, %v2148_v62  ;;  %1850 = vst.msk [vmem:[%s2676_s6 + $0xf0] sm:$0xf] %vm1789_vm1, %v2180_v63  ;;  %v1498_v4 = vadd.f32 %v2668_v14, %v1427_v0 }
 0x162   : > { %v1530_v5 = vadd.f32 %v2668_v14, %v1459_v1  ;;  %v2151_v6 = vpack.c.bf16 %v1500_v2, %v1500_v2  ;;  %v2183_v7 = vpack.c.bf16 %v1532_v3, %v1532_v3 }
 0x163   : > { %v2149_v8 = vpack.c.bf16 %v1498_v4, %v1498_v4 }
 0x164   : > { %v2181_v9 = vpack.c.bf16 %v1530_v5, %v1530_v5  ;;  %1821 = vst.msk [vmem:[%s2676_s6 + $0x7c] sm:$0xf] %vm1789_vm1, %v2151_v6  ;;  %1853 = vst.msk [vmem:[%s2676_s6 + $0xfc] sm:$0xf] %vm1789_vm1, %v2183_v7 }
 0x165   : > { %1819 = vst.msk [vmem:[%s2676_s6 + $0x74] sm:$0xf] %vm1789_vm1, %v2149_v8 }
 0x166   : > { %1851 = vst.msk [vmem:[%s2676_s6 + $0xf4] sm:$0xf] %vm1789_vm1, %v2181_v9 }
 0x167 PF: > { %s13_s12 = sadd.s32 1, %s2484_s12  }
 0x168   : > { %p10_p4 = scmp.ge.s32.totalorder %s13_s12, 4  }
 0x16a   :  { %12 = sbr.rel (!%p10_p4) target bundleno = 1 (0x1), region = 62 }

// kernel: network_forward.5
= control target key start
LH: loop header
LB: loop body
LE: loop exit
PB: predicated region body
PF: predicated region fallthrough
CT: control target
= control target key end

     0   :  { %s3140_s12 = smov 0   ;;  %s3944_s0 = inlined_call_operand.vmem [shape: bf16[2,320,160], index: 0, kind: input, shape index: {}]   ;;  %s3945_s1 = inlined_call_operand.vmem [shape: bf16[5,160,128], index: 1, kind: input, shape index: {}]   ;;  %s3946_s2 = inlined_call_operand.vmem [shape: f32[1,128], index: 2, kind: input, shape index: {}]   ;;  %s3947_s3 = inlined_call_operand.vmem [shape: bf16[2,128,32], index: 3, kind: output, shape index: {}]  }
   0x1 LB: > { %s2563_s13 = sadd.s32 4294967295, %s3117_s12   ;;  %p2567_p0 = scmp.ge.s32.totalorder %s3117_s12, 1  ;;  %s3117_s12 = sphi %s3140_s12, %s13_s12  }
   0x2   : > { %p137_p1 = scmp.lt.s32.totalorder %s3117_s12, 3 }
   0x4   : > { %p138_p2 = pnand %p2567_p0, %p137_p1 }
   0x5   : > { %p161_p3 = scmp.lt.s32.totalorder (!%p138_p2), %s2563_s13, 1 }
   0x6   : > { %141 = sbr.rel (%p138_p2) target bundleno = 572 (0x23c), region = 32 }
   0xb   : > { %v2977_v0 = vld [vmem:[%s3945_s1 + $0x88] sm:$0xff]   ;;  %v3119_v1 = vmov 0   ;;  %v2978_v2 = vld [vmem:[%s3945_s1 + $0x80] sm:$0xff]   ;;  %s3949_s13 = smov (!%p161_p3, %s2563_s13), 1  ;;  %v2979_v3 = vld [vmem:[%s3945_s1 + $0x78] sm:$0xff]   ;;  %vm451_vm0 = vcmask 261120  }
   0xc   : > { %500 = vmatprep.subr.bf16.mxu0 %v3119_v1  ;;  %2947 = vmatprep.subr.bf16.mxu1 %v3119_v1  ;;  %s2967_s18 = smul.u32 320, %s3949_s13  ;;  %v2980_v4 = vld [vmem:[%s3945_s1 + $0x70] sm:$0xff]   ;;  %v2981_v7 = vld [vmem:[%s3945_s1 + $0x68] sm:$0xff]   ;;  %v2982_v8 = vld [vmem:[%s3945_s1 + $0x60] sm:$0xff]   ;;  %s2930_s22 = sshll.u32 %s3949_s13, 6  ;;  %vm2491_vm1 = vcmask 257024  }
   0xd   : > { %501 = vmatpush1.bf16.msra.mxu0 %v2977_v0  ;;  %2957 = vmatpush1.bf16.msra.mxu1 %v2977_v0  ;;  %v2983_v9 = vld [vmem:[%s3945_s1 + $0x58] sm:$0xff]   ;;  %v2984_v10 = vld [vmem:[%s3945_s1 + $0x50] sm:$0xff]   ;;  %v3003_v23 = vld [vmem:[%s3945_s1 + $0x28] sm:$0xff]   ;;  %s3864_s26 = scalar_lea.vmem %s3947_s3, %s2930_s22 }
   0xe   : > { %502 = vmatprep.subr.bf16.mxu0 %v3119_v1  ;;  %2948 = vmatprep.subr.bf16.mxu1 %v3119_v1  ;;  %s3169_s23 = scalar_lea.vmem %s3944_s0, %s2967_s18  ;;  %v2985_v11 = vld [vmem:[%s3945_s1 + $0x98] sm:$0xff]   ;;  %v2986_v12 = vld [vmem:[%s3945_s1 + $0x90] sm:$0xff]   ;;  %v3010_v26 = vld [vmem:[%s3945_s1 + $0xc8] sm:$0xff]  }
   0xf   : > { %v3177_v5 = vld [vmem:[%s3169_s23 + $0x14] ss:$8 sps:$4 sm:$0xff]   ;;  %v3217_v13 = vld [vmem:[%s3169_s23 + $0x10] ss:$8 sps:$4 sm:$0xff]   ;;  %v3229_v17 = vld [vmem:[%s3169_s23 + $0x24] ss:$8 sps:$4 sm:$0xff]  }
  0x10   : > { %v3180_v6 = vld [vmem:[%s3169_s23 + $0x94] ss:$8 sps:$4 sm:$0xff]   ;;  %2633 = vmatprep.mubr.msk.bf16.mxu0 %vm451_vm0, %v3177_v5  ;;  %v3220_v14 = vld [vmem:[%s3169_s23 + $0x90] ss:$8 sps:$4 sm:$0xff]   ;;  %v3234_v18 = vld [vmem:[%s3169_s23 + $0xa4] ss:$8 sps:$4 sm:$0xff]  }
  0x11   : > { %503 = vmatpush1.bf16.msra.mxu0 %v2978_v2  ;;  %2958 = vmatpush1.bf16.msra.mxu1 %v2978_v2  ;;  %v2993_v15 = vld [vmem:[%s3945_s1 + $0x38] sm:$0xff]   ;;  %v3001_v19 = vld [vmem:[%s3945_s1 + $0x30] sm:$0xff]   ;;  %v3249_v21 = vld [vmem:[%s3169_s23 + $0x20] ss:$8 sps:$4 sm:$0xff]  }
  0x12   : > { %504 = vmatprep.subr.bf16.mxu0 %v3119_v1  ;;  %2949 = vmatprep.subr.bf16.mxu1 %v3119_v1  ;;  %v2994_v16 = vld [vmem:[%s3945_s1 + $0xd8] sm:$0xff]   ;;  %v3002_v20 = vld [vmem:[%s3945_s1 + $0xd0] sm:$0xff]   ;;  %v3252_v22 = vld [vmem:[%s3169_s23 + $0xa0] ss:$8 sps:$4 sm:$0xff]  }
  0x13   : > { %2641 = vmatprep.mubr.msk.bf16.mxu1 %vm451_vm0, %v3180_v6  ;;  %v3260_v24 = vld [vmem:[%s3169_s23 + $0x34] ss:$8 sps:$4 sm:$0xff]   ;;  %v3011_v27 = vld [vmem:[%s3945_s1 + $0x20] sm:$0xff]   ;;  %v3280_v28 = vld [vmem:[%s3169_s23 + $0x30] ss:$8 sps:$4 sm:$0xff]  }
  0x14   : > { %v3263_v25 = vld [vmem:[%s3169_s23 + $0xb4] ss:$8 sps:$4 sm:$0xff]   ;;  %v3016_v29 = vld [vmem:[%s3945_s1 + $0xc0] sm:$0xff]   ;;  %v3286_v30 = vld [vmem:[%s3169_s23 + $0xb0] ss:$8 sps:$4 sm:$0xff]  }
  0x15   : > { %505 = vmatpush1.bf16.msra.mxu0 %v2979_v3  ;;  %2959 = vmatpush1.bf16.msra.mxu1 %v2979_v3  ;;  %v3291_v31 = vld [vmem:[%s3169_s23 + $0x44] ss:$8 sps:$4 sm:$0xff]   ;;  %v3019_v33 = vld [vmem:[%s3945_s1 + $0x18] sm:$0xff]   ;;  %v3027_v35 = vld [vmem:[%s3945_s1 + $0x10] sm:$0xff]  }
  0x16   : > { %506 = vmatprep.subr.bf16.mxu0 %v3119_v1  ;;  %2950 = vmatprep.subr.bf16.mxu1 %v3119_v1  ;;  %v3294_v32 = vld [vmem:[%s3169_s23 + $0xc4] ss:$8 sps:$4 sm:$0xff]   ;;  %v3020_v34 = vld [vmem:[%s3945_s1 + $0xb8] sm:$0xff]   ;;  %v3314_v36 = vld [vmem:[%s3169_s23 + $0x40] ss:$8 sps:$4 sm:$0xff]  }
  0x17   : > { %v3317_v37 = vld [vmem:[%s3169_s23 + $0xc0] ss:$8 sps:$4 sm:$0xff]   ;;  %v3028_v38 = vld [vmem:[%s3945_s1 + $0xb0] sm:$0xff]   ;;  %v3357_v47 = vld [vmem:[%s3169_s23 + $0x64] ss:$8 sps:$4 sm:$0xff]  }
  0x18   : > { %v3323_v39 = vld [vmem:[%s3169_s23 + $0x54] ss:$8 sps:$4 sm:$0xff]   ;;  %v3035_v41 = vld [vmem:[%s3945_s1 + $0x8] sm:$0xff]   ;;  %v3037_v43 = vld [vmem:[%s3945_s1] sm:$0xff]  }
  0x19   : > { %507 = vmatpush1.bf16.msra.mxu0 %v2980_v4  ;;  %2960 = vmatpush1.bf16.msra.mxu1 %v2980_v4  ;;  %v3328_v40 = vld [vmem:[%s3169_s23 + $0xd4] ss:$8 sps:$4 sm:$0xff]   ;;  %v3036_v42 = vld [vmem:[%s3945_s1 + $0xa8] sm:$0xff]   ;;  %v3348_v44 = vld [vmem:[%s3169_s23 + $0x50] ss:$8 sps:$4 sm:$0xff]  }
  0x1a   : > { %508 = vmatprep.subr.bf16.mxu0 %v3119_v1  ;;  %2951 = vmatprep.subr.bf16.mxu1 %v3119_v1  ;;  %v3351_v45 = vld [vmem:[%s3169_s23 + $0xd0] ss:$8 sps:$4 sm:$0xff]   ;;  %v3044_v46 = vld [vmem:[%s3945_s1 + $0xa0] sm:$0xff]   ;;  %v3045_v49 = vld [vmem:[%s3945_s1 + $0x48] sm:$0xff]  }
  0x1b   : > { %v3360_v48 = vld [vmem:[%s3169_s23 + $0xe4] ss:$8 sps:$4 sm:$0xff]   ;;  %v3385_v53 = vld [vmem:[%s3169_s23 + $0x60] ss:$8 sps:$4 sm:$0xff]   ;;  %v3391_v55 = vld [vmem:[%s3169_s23 + $0x74] ss:$8 sps:$4 sm:$0xff]  }
  0x1c   : > { %v3050_v50 = vld [vmem:[%s3945_s1 + $0xe8] sm:$0xff]   ;;  %v3053_v51 = vld [vmem:[%s3945_s1 + $0x40] sm:$0xff]   ;;  %v3396_v56 = vld [vmem:[%s3169_s23 + $0xf4] ss:$8 sps:$4 sm:$0xff]  }
  0x1d   : > { %509 = vmatpush1.bf16.msra.mxu0 %v2981_v7  ;;  %2961 = vmatpush1.bf16.msra.mxu1 %v2981_v7  ;;  %v3054_v52 = vld [vmem:[%s3945_s1 + $0xe0] sm:$0xff]   ;;  %v3407_v57 = vld [vmem:[%s3169_s23 + $0x70] ss:$8 sps:$4 sm:$0xff]   ;;  %v3058_v2 = vld [vmem:[%s3945_s1 + $0x128] sm:$0xff]  }
  0x1e   : > { %510 = vmatprep.subr.bf16.mxu0 %v3119_v1  ;;  %2952 = vmatprep.subr.bf16.mxu1 %v3119_v1  ;;  %v3388_v54 = vld [vmem:[%s3169_s23 + $0xe0] ss:$8 sps:$4 sm:$0xff]   ;;  %v3410_v58 = vld [vmem:[%s3169_s23 + $0xf0] ss:$8 sps:$4 sm:$0xff]   ;;  %v3413_v59 = vld [vmem:[%s3169_s23 + $0x84] ss:$8 sps:$4 sm:$0xff]  }
  0x1f   : > { %v3416_v60 = vld [vmem:[%s3169_s23 + $0x104] ss:$8 sps:$4 sm:$0xff]   ;;  %v3425_v61 = vld [vmem:[%s3169_s23 + $0x80] ss:$8 sps:$4 sm:$0xff]   ;;  %v3059_v3 = vld [vmem:[%s3945_s1 + $0x178] sm:$0xff]  }
  0x20   : > { %v3428_v62 = vld [vmem:[%s3169_s23 + $0x100] ss:$8 sps:$4 sm:$0xff]   ;;  %v3057_v63 = vld [vmem:[%s3169_s23 + $0x4] ss:$8 sps:$4 sm:$0xff]   ;;  %v3061_v7 = vld [vmem:[%s3945_s1 + $0x170] sm:$0xff]  }
  0x21   : > { %511 = vmatpush1.bf16.msra.mxu0 %v2982_v8  ;;  %2962 = vmatpush1.bf16.msra.mxu1 %v2982_v8  ;;  %v3055_v0 = vld [vmem:[%s3169_s23] ss:$8 sps:$4 sm:$0xff]   ;;  %v3062_v8 = vld [vmem:[%s3945_s1 + $0x118] sm:$0xff]  }
  0x22   : > { %512 = vmatprep.subr.bf16.mxu0 %v3119_v1  ;;  %2953 = vmatprep.subr.bf16.mxu1 %v3119_v1  ;;  %v3060_v4 = vld [vmem:[%s3945_s1 + $0x120] sm:$0xff]  }
  0x25   : > { %513 = vmatpush1.bf16.msra.mxu0 %v2983_v9  ;;  %2963 = vmatpush1.bf16.msra.mxu1 %v2983_v9  ;;  %v3064_v9 = vld [vmem:[%s3945_s1 + $0x110] sm:$0xff]  }
  0x26   : > { %514 = vmatprep.subr.bf16.mxu0 %v3119_v1  ;;  %2954 = vmatprep.subr.bf16.mxu1 %v3119_v1 }
  0x29   : > { %515 = vmatpush1.bf16.msra.mxu0 %v2984_v10  ;;  %2964 = vmatpush1.bf16.msra.mxu1 %v2984_v10  ;;  %v3065_v10 = vld [vmem:[%s3945_s1 + $0x160] sm:$0xff]  }
  0x2a   : > { %528 = vmatprep.subr.bf16.mxu0 %v3119_v1  ;;  %2955 = vmatprep.subr.bf16.mxu1 %v3119_v1 }
  0x2d   : > { %529 = vmatpush2.bf16.msra.mxu0 %v2985_v11  ;;  %2965 = vmatpush2.bf16.msra.mxu1 %v2985_v11  ;;  %v3066_v11 = vld [vmem:[%s3945_s1 + $0x108] sm:$0xff]  }
  0x2e   : > { %530 = vmatprep.subr.bf16.mxu0 %v3119_v1  ;;  %2956 = vmatprep.subr.bf16.mxu1 %v3119_v1 }
  0x31   : > { %531 = vmatpush2.bf16.msra.mxu0 %v2986_v12  ;;  %2966 = vmatpush2.bf16.msra.mxu1 %v2986_v12  ;;  %v3067_v12 = vld [vmem:[%s3945_s1 + $0x158] sm:$0xff]  }
  0x32   : > { %733 = vmatprep.subr.bf16.mxu1 %v3119_v1  ;;  %1199 = vmatprep.subr.bf16.mxu0 %v3119_v1 }
  0x34   : > { %533 = vmatmul.mubr.bf16.vlgmr.msra.gmra.mxu0 %v3217_v13  ;;  %597 = vmatmul.mubr.bf16.vlgmr.msra.gmra.mxu1 %v3220_v14 }
  0x35   : > { %734 = vmatpush1.bf16.msra.mxu1 %v2993_v15  ;;  %1200 = vmatpush1.bf16.msra.mxu0 %v2994_v16  ;;  %v3069_v15 = vld [vmem:[%s3945_s1 + $0x150] sm:$0xff]   ;;  %v3070_v16 = vld [vmem:[%s3945_s1 + $0xf8] sm:$0xff]  }
  0x36   : > { %2634 = vmatprep.mubr.msk.bf16.mxu0 %vm451_vm0, %v3229_v17  ;;  %2642 = vmatprep.mubr.msk.bf16.mxu1 %vm451_vm0, %v3234_v18 }
  0x37   : > { %735 = vmatprep.subr.bf16.mxu1 %v3119_v1  ;;  %1201 = vmatprep.subr.bf16.mxu0 %v3119_v1 }
  0x39   : > { %736 = vmatpush1.bf16.msra.mxu1 %v3001_v19  ;;  %1202 = vmatpush1.bf16.msra.mxu0 %v3002_v20  ;;  %v3072_v19 = vld [vmem:[%s3945_s1 + $0xf0] sm:$0xff]   ;;  %v3073_v20 = vld [vmem:[%s3945_s1 + $0x140] sm:$0xff]  }
  0x3a   : > { %737 = vmatprep.subr.bf16.mxu1 %v3119_v1  ;;  %1203 = vmatprep.subr.bf16.mxu0 %v3119_v1 }
  0x3c   : > { %541 = vmatmul.mubr.bf16.gmra.mxu0 %v3249_v21  ;;  %605 = vmatmul.mubr.bf16.gmra.mxu1 %v3252_v22 }
  0x3d   : > { %738 = vmatpush1.bf16.msra.mxu1 %v3003_v23  ;;  %2635 = vmatprep.mubr.msk.bf16.mxu0 %vm451_vm0, %v3260_v24  ;;  %v3075_v23 = vld [vmem:[%s3945_s1 + $0x188] sm:$0xff]  }
  0x3e   : > { %2643 = vmatprep.mubr.msk.bf16.mxu1 %vm451_vm0, %v3263_v25  ;;  %1204 = vmatpush1.bf16.msra.mxu0 %v3010_v26  ;;  %v3076_v26 = vld [vmem:[%s3945_s1 + $0x130] sm:$0xff]  }
  0x3f   : > { %739 = vmatprep.subr.bf16.mxu1 %v3119_v1  ;;  %1205 = vmatprep.subr.bf16.mxu0 %v3119_v1 }
  0x41   : > { %740 = vmatpush1.bf16.msra.mxu1 %v3011_v27  ;;  %v3079_v27 = vld [vmem:[%s3945_s1 + $0x180] sm:$0xff]  }
  0x42   : > { %1206 = vmatpush1.bf16.msra.mxu0 %v3016_v29  ;;  %741 = vmatprep.subr.bf16.mxu1 %v3119_v1 }
  0x43   : > { %1207 = vmatprep.subr.bf16.mxu0 %v3119_v1 }
  0x44   : > { %549 = vmatmul.mubr.bf16.gmra.mxu0 %v3280_v28  ;;  %613 = vmatmul.mubr.bf16.gmra.mxu1 %v3286_v30 }
  0x45   : > { %2636 = vmatprep.mubr.msk.bf16.mxu0 %vm451_vm0, %v3291_v31  ;;  %2644 = vmatprep.mubr.msk.bf16.mxu1 %vm451_vm0, %v3294_v32 }
  0x46   : > { %742 = vmatpush1.bf16.msra.mxu1 %v3019_v33  ;;  %1208 = vmatpush1.bf16.msra.mxu0 %v3020_v34 }
  0x47   : > { %743 = vmatprep.subr.bf16.mxu1 %v3119_v1  ;;  %1209 = vmatprep.subr.bf16.mxu0 %v3119_v1 }
  0x4a   : > { %744 = vmatpush1.bf16.msra.mxu1 %v3027_v35  ;;  %1210 = vmatpush1.bf16.msra.mxu0 %v3028_v38 }
  0x4b   : > { %745 = vmatprep.subr.bf16.mxu1 %v3119_v1  ;;  %1211 = vmatprep.subr.bf16.mxu0 %v3119_v1 }
  0x4c   : > { %557 = vmatmul.mubr.bf16.gmra.mxu0 %v3314_v36  ;;  %621 = vmatmul.mubr.bf16.gmra.mxu1 %v3317_v37 }
  0x4d   : > { %2637 = vmatprep.mubr.msk.bf16.mxu0 %vm451_vm0, %v3323_v39  ;;  %2645 = vmatprep.mubr.msk.bf16.mxu1 %vm451_vm0, %v3328_v40 }
  0x4e   : > { %746 = vmatpush1.bf16.msra.mxu1 %v3035_v41  ;;  %1212 = vmatpush1.bf16.msra.mxu0 %v3036_v42 }
  0x4f   : > { %747 = vmatprep.subr.bf16.mxu1 %v3119_v1  ;;  %1213 = vmatprep.subr.bf16.mxu0 %v3119_v1 }
  0x52   : > { %748 = vmatpush1.bf16.msra.mxu1 %v3037_v43  ;;  %1214 = vmatpush1.bf16.msra.mxu0 %v3044_v46 }
  0x53   : > { %761 = vmatprep.subr.bf16.mxu1 %v3119_v1  ;;  %1227 = vmatprep.subr.bf16.mxu0 %v3119_v1 }
  0x54   : > { %565 = vmatmul.mubr.bf16.gmra.mxu0 %v3348_v44  ;;  %629 = vmatmul.mubr.bf16.gmra.mxu1 %v3351_v45 }
  0x55   : > { %2638 = vmatprep.mubr.msk.bf16.mxu0 %vm451_vm0, %v3357_v47  ;;  %2646 = vmatprep.mubr.msk.bf16.mxu1 %vm451_vm0, %v3360_v48 }
  0x56   : > { %762 = vmatpush2.bf16.msra.mxu1 %v3045_v49  ;;  %1228 = vmatpush2.bf16.msra.mxu0 %v3050_v50 }
  0x57   : > { %763 = vmatprep.subr.bf16.mxu1 %v3119_v1  ;;  %1229 = vmatprep.subr.bf16.mxu0 %v3119_v1 }
  0x5a   : > { %764 = vmatpush2.bf16.msra.mxu1 %v3053_v51  ;;  %1230 = vmatpush2.bf16.msra.mxu0 %v3054_v52 }
  0x5b   : > { %1697 = vmatprep.subr.bf16.mxu1 %v3119_v1  ;;  %2195 = vmatprep.subr.bf16.mxu0 %v3119_v1 }
  0x5c   : > { %573 = vmatmul.mubr.bf16.gmra.mxu0 %v3385_v53  ;;  %637 = vmatmul.mubr.bf16.gmra.mxu1 %v3388_v54 }
  0x5d   : > { %2639 = vmatprep.mubr.msk.bf16.mxu0 %vm451_vm0, %v3391_v55  ;;  %2647 = vmatprep.mubr.msk.bf16.mxu1 %vm451_vm0, %v3396_v56 }
  0x64   : > { %581 = vmatmul.mubr.bf16.gmra.mxu0 %v3407_v57  ;;  %645 = vmatmul.mubr.bf16.gmra.mxu1 %v3410_v58 }
  0x65   : > { %2640 = vmatprep.mubr.msk.bf16.mxu0 %vm451_vm0, %v3413_v59  ;;  %2648 = vmatprep.mubr.msk.bf16.mxu1 %vm451_vm0, %v3416_v60 }
  0x6c   : > { %589 = vmatmul.mubr.bf16.gmra.mxu0 %v3425_v61  ;;  %653 = vmatmul.mubr.bf16.gmra.mxu1 %v3428_v62 }
  0x6d   : > { %2661 = vmatprep.mubr.msk.bf16.mxu1 %vm451_vm0, %v3057_v63  ;;  %2739 = vmatprep.mubr.msk.bf16.mxu0 %vm451_vm0, %v3229_v17 }
  0x74   : > { %766 = vmatmul.mubr.bf16.vlgmr.msra.gmra.mxu1 %v3055_v0  ;;  %1232 = vmatmul.mubr.bf16.vlgmr.msra.gmra.mxu0 %v3249_v21 }
  0x75   : > { %1698 = vmatpush1.bf16.msra.mxu1 %v3058_v2  ;;  %2196 = vmatpush1.bf16.msra.mxu0 %v3059_v3  ;;  %v3083_v2 = vld [vmem:[%s3169_s23 + $0x90] ss:$8 sps:$4 sm:$0xff]   ;;  %v3084_v3 = vld [vmem:[%s3169_s23 + $0xa4] ss:$8 sps:$4 sm:$0xff]  }
  0x76   : > { %2662 = vmatprep.mubr.msk.bf16.mxu1 %vm451_vm0, %v3177_v5  ;;  %2740 = vmatprep.mubr.msk.bf16.mxu0 %vm451_vm0, %v3260_v24  ;;  %v3063_v5 = vld [vmem:[%s3945_s1 + $0x168] sm:$0xff]  }
  0x77   : > { %1699 = vmatprep.subr.bf16.mxu1 %v3119_v1  ;;  %2197 = vmatprep.subr.bf16.mxu0 %v3119_v1 }
  0x79   : > { %1700 = vmatpush1.bf16.msra.mxu1 %v3060_v4  ;;  %2198 = vmatpush1.bf16.msra.mxu0 %v3061_v7 }
  0x7a   : > { %1701 = vmatprep.subr.bf16.mxu1 %v3119_v1  ;;  %2199 = vmatprep.subr.bf16.mxu0 %v3119_v1 }
  0x7c   : > { %774 = vmatmul.mubr.bf16.gmra.mxu1 %v3217_v13  ;;  %1240 = vmatmul.mubr.bf16.gmra.mxu0 %v3280_v28  ;;  %v3068_v13 = vld [vmem:[%s3945_s1 + $0x100] sm:$0xff]  }
  0x7d   : > { %2663 = vmatprep.mubr.msk.bf16.mxu1 %vm451_vm0, %v3229_v17  ;;  %2741 = vmatprep.mubr.msk.bf16.mxu0 %vm451_vm0, %v3291_v31  ;;  %v3071_v17 = vld [vmem:[%s3945_s1 + $0x148] sm:$0xff]  }
  0x7e   : > { %1702 = vmatpush1.bf16.msra.mxu1 %v3062_v8  ;;  %2200 = vmatpush1.bf16.msra.mxu0 %v3063_v5 }
  0x7f   : > { %1703 = vmatprep.subr.bf16.mxu1 %v3119_v1  ;;  %2201 = vmatprep.subr.bf16.mxu0 %v3119_v1 }
  0x82   : > { %1704 = vmatpush1.bf16.msra.mxu1 %v3064_v9  ;;  %2202 = vmatpush1.bf16.msra.mxu0 %v3065_v10 }
  0x83   : > { %1705 = vmatprep.subr.bf16.mxu1 %v3119_v1  ;;  %2203 = vmatprep.subr.bf16.mxu0 %v3119_v1 }
  0x84   : > { %782 = vmatmul.mubr.bf16.gmra.mxu1 %v3249_v21  ;;  %1248 = vmatmul.mubr.bf16.gmra.mxu0 %v3314_v36  ;;  %v3074_v21 = vld [vmem:[%s3945_s1 + $0x138] sm:$0xff]  }
  0x85   : > { %2664 = vmatprep.mubr.msk.bf16.mxu1 %vm451_vm0, %v3260_v24  ;;  %2742 = vmatprep.mubr.msk.bf16.mxu0 %vm451_vm0, %v3323_v39 }
  0x86   : > { %1706 = vmatpush1.bf16.msra.mxu1 %v3066_v11  ;;  %2204 = vmatpush1.bf16.msra.mxu0 %v3067_v12  ;;  %v3086_v11 = vld [vmem:[%s3169_s23 + $0xa0] ss:$8 sps:$4 sm:$0xff]   ;;  %v3087_v12 = vld [vmem:[%s3169_s23 + $0xb4] ss:$8 sps:$4 sm:$0xff]  }
  0x87   : > { %1707 = vmatprep.subr.bf16.mxu1 %v3119_v1  ;;  %2205 = vmatprep.subr.bf16.mxu0 %v3119_v1 }
  0x8a   : > { %1708 = vmatpush1.bf16.msra.mxu1 %v3068_v13  ;;  %2206 = vmatpush1.bf16.msra.mxu0 %v3069_v15 }
  0x8b   : > { %1709 = vmatprep.subr.bf16.mxu1 %v3119_v1  ;;  %2207 = vmatprep.subr.bf16.mxu0 %v3119_v1 }
  0x8c   : > { %790 = vmatmul.mubr.bf16.gmra.mxu1 %v3280_v28  ;;  %1256 = vmatmul.mubr.bf16.gmra.mxu0 %v3348_v44 }
  0x8d   : > { %2665 = vmatprep.mubr.msk.bf16.mxu1 %vm451_vm0, %v3291_v31  ;;  %2743 = vmatprep.mubr.msk.bf16.mxu0 %vm451_vm0, %v3357_v47 }
  0x8e   : > { %1710 = vmatpush1.bf16.msra.mxu1 %v3070_v16  ;;  %2208 = vmatpush1.bf16.msra.mxu0 %v3071_v17 }
  0x8f   : > { %1711 = vmatprep.subr.bf16.mxu1 %v3119_v1  ;;  %2209 = vmatprep.subr.bf16.mxu0 %v3119_v1 }
  0x92   : > { %1712 = vmatpush1.bf16.msra.mxu1 %v3072_v19  ;;  %2210 = vmatpush1.bf16.msra.mxu0 %v3073_v20 }
  0x93   : > { %1725 = vmatprep.subr.bf16.mxu1 %v3119_v1  ;;  %2223 = vmatprep.subr.bf16.mxu0 %v3119_v1 }
  0x94   : > { %798 = vmatmul.mubr.bf16.gmra.mxu1 %v3314_v36  ;;  %1264 = vmatmul.mubr.bf16.gmra.mxu0 %v3385_v53 }
  0x95   : > { %2666 = vmatprep.mubr.msk.bf16.mxu1 %vm451_vm0, %v3323_v39  ;;  %2744 = vmatprep.mubr.msk.bf16.mxu0 %vm451_vm0, %v3391_v55 }
  0x96   : > { %1726 = vmatpush2.bf16.msra.mxu1 %v3074_v21  ;;  %2224 = vmatpush2.bf16.msra.mxu0 %v3075_v23  ;;  %v3089_v23 = vld [vmem:[%s3169_s23 + $0xb0] ss:$8 sps:$4 sm:$0xff]  }
  0x97   : > { %1727 = vmatprep.subr.bf16.mxu1 %v3119_v1  ;;  %2225 = vmatprep.subr.bf16.mxu0 %v3119_v1  ;;  %v3599_v1 = vld [vmem:[%s3169_s23 + $0x114] ss:$8 sps:$4 sm:$0xff]  }
  0x9a   : > { %1728 = vmatpush2.bf16.msra.mxu1 %v3076_v26  ;;  %2226 = vmatpush2.bf16.msra.mxu0 %v3079_v27  ;;  %v3090_v26 = vld [vmem:[%s3169_s23 + $0xc4] ss:$8 sps:$4 sm:$0xff]  }
  0x9c   : > { %806 = vmatmul.mubr.bf16.gmra.mxu1 %v3348_v44  ;;  %1272 = vmatmul.mubr.bf16.gmra.mxu0 %v3407_v57 }
  0x9d   : > { %2667 = vmatprep.mubr.msk.bf16.mxu1 %vm451_vm0, %v3357_v47  ;;  %2745 = vmatprep.mubr.msk.bf16.mxu0 %vm451_vm0, %v3413_v59 }
  0xa4   : > { %814 = vmatmul.mubr.bf16.gmra.mxu1 %v3385_v53  ;;  %1280 = vmatmul.mubr.bf16.gmra.mxu0 %v3425_v61 }
  0xa5   : > { %2668 = vmatprep.mubr.msk.bf16.mxu1 %vm451_vm0, %v3391_v55  ;;  %2746 = vmatprep.mubr.msk.bf16.mxu0 %vm451_vm0, %v3180_v6 }
  0xac   : > { %822 = vmatmul.mubr.bf16.gmra.mxu1 %v3407_v57  ;;  %1288 = vmatmul.mubr.bf16.gmra.mxu0 %v3220_v14 }
  0xad   : > { %2669 = vmatprep.mubr.msk.bf16.mxu1 %vm451_vm0, %v3413_v59  ;;  %2747 = vmatprep.mubr.msk.bf16.mxu0 %vm451_vm0, %v3234_v18 }
  0xb4   : > { %830 = vmatmul.mubr.bf16.gmra.mxu1 %v3425_v61  ;;  %1296 = vmatmul.mubr.bf16.gmra.mxu0 %v3252_v22 }
  0xb5   : > { %2670 = vmatprep.mubr.msk.bf16.mxu1 %vm451_vm0, %v3180_v6  ;;  %2748 = vmatprep.mubr.msk.bf16.mxu0 %vm451_vm0, %v3263_v25  ;;  %v3608_v6 = vld [vmem:[%s3169_s23 + $0x110] ss:$8 sps:$4 sm:$0xff]  }
  0xbc   : > { %838 = vmatmul.mubr.bf16.gmra.mxu1 %v3220_v14  ;;  %1304 = vmatmul.mubr.bf16.gmra.mxu0 %v3286_v30 }
  0xbd   : > { %2671 = vmatprep.mubr.msk.bf16.mxu1 %vm451_vm0, %v3234_v18  ;;  %2749 = vmatprep.mubr.msk.bf16.mxu0 %vm451_vm0, %v3294_v32 }
  0xc4   : > { %846 = vmatmul.mubr.bf16.gmra.mxu1 %v3252_v22  ;;  %1312 = vmatmul.mubr.bf16.gmra.mxu0 %v3317_v37 }
  0xc5   : > { %2672 = vmatprep.mubr.msk.bf16.mxu1 %vm451_vm0, %v3263_v25  ;;  %2750 = vmatprep.mubr.msk.bf16.mxu0 %vm451_vm0, %v3328_v40 }
  0xcc   : > { %854 = vmatmul.mubr.bf16.gmra.mxu1 %v3286_v30  ;;  %1320 = vmatmul.mubr.bf16.gmra.mxu0 %v3351_v45 }
  0xcd   : > { %2673 = vmatprep.mubr.msk.bf16.mxu1 %vm451_vm0, %v3294_v32  ;;  %2751 = vmatprep.mubr.msk.bf16.mxu0 %vm451_vm0, %v3360_v48 }
  0xd4   : > { %862 = vmatmul.mubr.bf16.gmra.mxu1 %v3317_v37  ;;  %1328 = vmatmul.mubr.bf16.gmra.mxu0 %v3388_v54 }
  0xd5   : > { %2674 = vmatprep.mubr.msk.bf16.mxu1 %vm451_vm0, %v3328_v40  ;;  %2752 = vmatprep.mubr.msk.bf16.mxu0 %vm451_vm0, %v3396_v56 }
  0xdc   : > { %870 = vmatmul.mubr.bf16.gmra.mxu1 %v3351_v45  ;;  %1336 = vmatmul.mubr.bf16.gmra.mxu0 %v3410_v58 }
  0xdd   : > { %2675 = vmatprep.mubr.msk.bf16.mxu1 %vm451_vm0, %v3360_v48  ;;  %2753 = vmatprep.mubr.msk.bf16.mxu0 %vm451_vm0, %v3416_v60 }
  0xe4   : > { %878 = vmatmul.mubr.bf16.gmra.mxu1 %v3388_v54  ;;  %1344 = vmatmul.mubr.bf16.gmra.mxu0 %v3428_v62  ;;  %v3081_v54 = vld [vmem:[%s3169_s23 + $0x94] ss:$8 sps:$4 sm:$0xff]  }
  0xe5   : > { %2676 = vmatprep.mubr.msk.bf16.mxu1 %vm451_vm0, %v3396_v56  ;;  %2754 = vmatprep.mubr.msk.bf16.mxu0 %vm451_vm0, %v3599_v1 }
  0xec   : > { %886 = vmatmul.mubr.bf16.gmra.mxu1 %v3410_v58  ;;  %1352 = vmatmul.mubr.bf16.gmra.mxu0 %v3608_v6 }
  0xed   : > { %2817 = vmatprep.mubr.msk.bf16.mxu1 %vm451_vm0, %v3260_v24  ;;  %2895 = vmatprep.mubr.msk.bf16.mxu0 %vm451_vm0, %v3291_v31 }
  0xf4   : > { %v3616_v14 = vpop.f32.mrf.mxu0  ;;  %v3618_v18 = vpop.f32.mrf.mxu1  ;;  %1730 = vmatmul.mubr.bf16.vlgmr.msra.gmra.mxu1 %v3280_v28  ;;  %2228 = vmatmul.mubr.bf16.vlgmr.msra.gmra.mxu0 %v3314_v36 }
  0xf5   : > { %2818 = vmatprep.mubr.msk.bf16.mxu1 %vm451_vm0, %v3291_v31  ;;  %2896 = vmatprep.mubr.msk.bf16.mxu0 %vm451_vm0, %v3323_v39 }
  0xf6   : > { %v536_v22 = vpop.f32.mrf.mxu0  ;;  %v600_v25 = vpop.f32.mrf.mxu1 }
  0xf8   : > { %v3626_v24 = vpop.f32.mrf.mxu0  ;;  %v3628_v29 = vpop.f32.mrf.mxu1 }
  0xfa   : > { %v539_v30 = vpop.f32.mrf.mxu0  ;;  %v603_v32 = vpop.f32.mrf.mxu1 }
  0xfc   : > { %v3630_v33 = vpop.f32.mrf.mxu0  ;;  %v3632_v34 = vpop.f32.mrf.mxu1  ;;  %1738 = vmatmul.mubr.bf16.gmra.mxu1 %v3314_v36  ;;  %2236 = vmatmul.mubr.bf16.gmra.mxu0 %v3348_v44 }
  0xfd   : > { %2819 = vmatprep.mubr.msk.bf16.mxu1 %vm451_vm0, %v3323_v39  ;;  %2897 = vmatprep.mubr.msk.bf16.mxu0 %vm451_vm0, %v3357_v47 }
  0xfe   : > { %v544_v28 = vpop.f32.mrf.mxu0  ;;  %v608_v31 = vpop.f32.mrf.mxu1 }
 0x100   : > { %v3640_v35 = vpop.f32.mrf.mxu0  ;;  %v3642_v37 = vpop.f32.mrf.mxu1 }
 0x102   : > { %v547_v38 = vpop.f32.mrf.mxu0  ;;  %v611_v40 = vpop.f32.mrf.mxu1 }
 0x103   : > { %v3092_v40 = vld [vmem:[%s3169_s23 + $0xc0] ss:$8 sps:$4 sm:$0xff]  }
 0x104   : > { %v3644_v41 = vpop.f32.mrf.mxu0  ;;  %v3646_v42 = vpop.f32.mrf.mxu1  ;;  %1746 = vmatmul.mubr.bf16.gmra.mxu1 %v3348_v44  ;;  %2244 = vmatmul.mubr.bf16.gmra.mxu0 %v3385_v53 }
 0x105   : > { %2820 = vmatprep.mubr.msk.bf16.mxu1 %vm451_vm0, %v3357_v47  ;;  %2898 = vmatprep.mubr.msk.bf16.mxu0 %vm451_vm0, %v3391_v55 }
 0x106   : > { %v552_v36 = vpop.f32.mrf.mxu0  ;;  %v616_v39 = vpop.f32.mrf.mxu1 }
 0x107   : > { %v3093_v36 = vld [vmem:[%s3169_s23 + $0xd4] ss:$8 sps:$4 sm:$0xff]  }
 0x108   : > { %v3654_v43 = vpop.f32.mrf.mxu0  ;;  %v3656_v45 = vpop.f32.mrf.mxu1 }
 0x10a   : > { %v555_v46 = vpop.f32.mrf.mxu0  ;;  %v619_v48 = vpop.f32.mrf.mxu1 }
 0x10c   : > { %v3658_v49 = vpop.f32.mrf.mxu0  ;;  %v3660_v44 = vpop.f32.mrf.mxu1  ;;  %1754 = vmatmul.mubr.bf16.gmra.mxu1 %v3385_v53  ;;  %2252 = vmatmul.mubr.bf16.gmra.mxu0 %v3407_v57 }
 0x10d   : > { %2821 = vmatprep.mubr.msk.bf16.mxu1 %vm451_vm0, %v3391_v55  ;;  %2899 = vmatprep.mubr.msk.bf16.mxu0 %vm451_vm0, %v3413_v59 }
 0x10e   : > { %v560_v47 = vpop.f32.mrf.mxu0  ;;  %v624_v50 = vpop.f32.mrf.mxu1 }
 0x110   : > { %v3668_v51 = vpop.f32.mrf.mxu0  ;;  %v3670_v52 = vpop.f32.mrf.mxu1 }
 0x112   : > { %v563_v56 = vpop.f32.mrf.mxu0  ;;  %v627_v58 = vpop.f32.mrf.mxu1 }
 0x114   : > { %v3673_v53 = vpop.f32.mrf.mxu0  ;;  %v3675_v60 = vpop.f32.mrf.mxu1  ;;  %1762 = vmatmul.mubr.bf16.gmra.mxu1 %v3407_v57  ;;  %2260 = vmatmul.mubr.bf16.gmra.mxu0 %v3425_v61 }
 0x115   : > { %2822 = vmatprep.mubr.msk.bf16.mxu1 %vm451_vm0, %v3413_v59  ;;  %2900 = vmatprep.mubr.msk.bf16.mxu0 %vm451_vm0, %v3081_v54 }
 0x116   : > { %v568_v55 = vpop.f32.mrf.mxu0  ;;  %v632_v62 = vpop.f32.mrf.mxu1 }
 0x118   : > { %v3682_v63 = vpop.f32.mrf.mxu0  ;;  %v3684_v0 = vpop.f32.mrf.mxu1 }
 0x11a   : > { %v571_v4 = vpop.f32.mrf.mxu0  ;;  %v635_v7 = vpop.f32.mrf.mxu1 }
 0x11b   : > { %v3096_v4 = vld [vmem:[%s3169_s23 + $0xe4] ss:$8 sps:$4 sm:$0xff]  }
 0x11c   : > { %v3688_v57 = vpop.f32.mrf.mxu0  ;;  %v3690_v8 = vpop.f32.mrf.mxu1  ;;  %1770 = vmatmul.mubr.bf16.gmra.mxu1 %v3425_v61  ;;  %2268 = vmatmul.mubr.bf16.gmra.mxu0 %v3083_v2 }
 0x11d   : > { %2823 = vmatprep.mubr.msk.bf16.mxu1 %vm451_vm0, %v3081_v54  ;;  %2901 = vmatprep.mubr.msk.bf16.mxu0 %vm451_vm0, %v3084_v3 }
 0x11e   : > { %v576_v59 = vpop.f32.mrf.mxu0  ;;  %v640_v5 = vpop.f32.mrf.mxu1 }
 0x120   : > { %v3695_v9 = vpop.f32.mrf.mxu0  ;;  %v3697_v10 = vpop.f32.mrf.mxu1 }
 0x122   : > { %v579_v13 = vpop.f32.mrf.mxu0  ;;  %v643_v15 = vpop.f32.mrf.mxu1 }
 0x124   : > { %v3701_v16 = vpop.f32.mrf.mxu0  ;;  %v3703_v61 = vpop.f32.mrf.mxu1  ;;  %1778 = vmatmul.mubr.bf16.gmra.mxu1 %v3083_v2  ;;  %2276 = vmatmul.mubr.bf16.gmra.mxu0 %v3086_v11  ;;  %v3095_v2 = vld [vmem:[%s3169_s23 + $0xd0] ss:$8 sps:$4 sm:$0xff]  }
 0x125   : > { %2824 = vmatprep.mubr.msk.bf16.mxu1 %vm451_vm0, %v3084_v3  ;;  %2902 = vmatprep.mubr.msk.bf16.mxu0 %vm451_vm0, %v3087_v12 }
 0x126   : > { %v584_v17 = vpop.f32.mrf.mxu0  ;;  %v648_v19 = vpop.f32.mrf.mxu1 }
 0x128   : > { %v3707_v20 = vpop.f32.mrf.mxu0  ;;  %v3709_v21 = vpop.f32.mrf.mxu1 }
 0x12a   : > { %v587_v27 = vpop.f32.mrf.mxu0  ;;  %v651_v22 = vpop.f32.mrf.mxu1 }
 0x12b   : > { %v3099_v27 = vld [vmem:[%s3169_s23 + $0xf4] ss:$8 sps:$4 sm:$0xff]  }
 0x12c   : > { %v3713_v25 = vpop.f32.mrf.mxu0  ;;  %v3715_v30 = vpop.f32.mrf.mxu1  ;;  %1786 = vmatmul.mubr.bf16.gmra.mxu1 %v3086_v11  ;;  %2284 = vmatmul.mubr.bf16.gmra.mxu0 %v3089_v23 }
 0x12d   : > { %2825 = vmatprep.mubr.msk.bf16.mxu1 %vm451_vm0, %v3087_v12  ;;  %2903 = vmatprep.mubr.msk.bf16.mxu0 %vm451_vm0, %v3090_v26 }
 0x12e   : > { %v592_v32 = vpop.f32.mrf.mxu0  ;;  %v656_v28 = vpop.f32.mrf.mxu1 }
 0x130   : > { %v3719_v31 = vpop.f32.mrf.mxu0  ;;  %v3721_v38 = vpop.f32.mrf.mxu1 }
 0x132   : > { %v595_v39 = vpop.f32.mrf.mxu0  ;;  %v659_v46 = vpop.f32.mrf.mxu1 }
 0x134   : > { %v767_v48 = vpop.f32.mrf.mxu1  ;;  %v1233_v47 = vpop.f32.mrf.mxu0  ;;  %1794 = vmatmul.mubr.bf16.gmra.mxu1 %v3089_v23  ;;  %2292 = vmatmul.mubr.bf16.gmra.mxu0 %v3092_v40  ;;  %v3098_v23 = vld [vmem:[%s3169_s23 + $0xe0] ss:$8 sps:$4 sm:$0xff]  }
 0x135   : > { %v768_v50 = vadd.f32 %v767_v48, %v3616_v14  ;;  %2826 = vmatprep.mubr.msk.bf16.mxu1 %vm451_vm0, %v3090_v26  ;;  %2904 = vmatprep.mubr.msk.bf16.mxu0 %vm451_vm0, %v3093_v36 }
 0x136   : > { %v769_v54 = vpop.f32.mrf.mxu1  ;;  %v1235_v56 = vpop.f32.mrf.mxu0 }
 0x137   : > { %v3728_v58 = vadd.f32 %v1233_v47, %v768_v50  ;;  %v3101_v50 = vld [vmem:[%s3169_s23 + $0xf0] ss:$8 sps:$4 sm:$0xff]   ;;  %v3102_v56 = vld [vmem:[%s3169_s23 + $0x104] ss:$8 sps:$4 sm:$0xff]  }
 0x138   : > { %v770_v55 = vpop.f32.mrf.mxu1  ;;  %v1236_v62 = vpop.f32.mrf.mxu0 }
 0x139   : > { %v771_v3 = vadd.f32 %v770_v55, %v3626_v24 }
 0x13a   : > { %v772_v7 = vpop.f32.mrf.mxu1  ;;  %v1238_v59 = vpop.f32.mrf.mxu0 }
 0x13b   : > { %v3733_v5 = vadd.f32 %v1236_v62, %v771_v3 }
 0x13c   : > { %v775_v14 = vpop.f32.mrf.mxu1  ;;  %v1241_v11 = vpop.f32.mrf.mxu0  ;;  %1802 = vmatmul.mubr.bf16.gmra.mxu1 %v3092_v40  ;;  %2300 = vmatmul.mubr.bf16.gmra.mxu0 %v3095_v2 }
 0x13d   : > { %v776_v12 = vadd.f32 %v775_v14, %v3630_v33  ;;  %2827 = vmatprep.mubr.msk.bf16.mxu1 %vm451_vm0, %v3093_v36  ;;  %2905 = vmatprep.mubr.msk.bf16.mxu0 %vm451_vm0, %v3096_v4 }
 0x13e   : > { %v777_v13 = vpop.f32.mrf.mxu1  ;;  %v1243_v15 = vpop.f32.mrf.mxu0 }
 0x13f   : > { %v3738_v24 = vadd.f32 %v1241_v11, %v776_v12  ;;  %v3104_v12 = vld [vmem:[%s3169_s23 + $0x100] ss:$8 sps:$4 sm:$0xff]  }
 0x140   : > { %v778_v17 = vpop.f32.mrf.mxu1  ;;  %v1244_v19 = vpop.f32.mrf.mxu0 }
 0x141   : > { %v779_v26 = vadd.f32 %v778_v17, %v3640_v35 }
 0x142   : > { %v780_v22 = vpop.f32.mrf.mxu1  ;;  %v1246_v32 = vpop.f32.mrf.mxu0 }
 0x143   : > { %v3743_v28 = vadd.f32 %v1244_v19, %v779_v26 }
 0x144   : > { %v783_v33 = vpop.f32.mrf.mxu1  ;;  %v1249_v40 = vpop.f32.mrf.mxu0  ;;  %1810 = vmatmul.mubr.bf16.gmra.mxu1 %v3095_v2  ;;  %2308 = vmatmul.mubr.bf16.gmra.mxu0 %v3098_v23 }
 0x145   : > { %v784_v36 = vadd.f32 %v783_v33, %v3644_v41  ;;  %2828 = vmatprep.mubr.msk.bf16.mxu1 %vm451_vm0, %v3096_v4  ;;  %2906 = vmatprep.mubr.msk.bf16.mxu0 %vm451_vm0, %v3099_v27 }
 0x146   : > { %v785_v39 = vpop.f32.mrf.mxu1  ;;  %v1251_v46 = vpop.f32.mrf.mxu0 }
 0x147   : > { %v3748_v35 = vadd.f32 %v1249_v40, %v784_v36  ;;  %v3105_v36 = vld [vmem:[%s3169_s23 + $0x124] ss:$8 sps:$4 sm:$0xff]  }
 0x148   : > { %v786_v48 = vpop.f32.mrf.mxu1  ;;  %v1252_v47 = vpop.f32.mrf.mxu0 }
 0x149   : > { %v787_v54 = vadd.f32 %v786_v48, %v3654_v43 }
 0x14a   : > { %v788_v55 = vpop.f32.mrf.mxu1  ;;  %v1254_v62 = vpop.f32.mrf.mxu0 }
 0x14b   : > { %v3753_v2 = vadd.f32 %v1252_v47, %v787_v54 }
 0x14c   : > { %v791_v41 = vpop.f32.mrf.mxu1  ;;  %v1257_v3 = vpop.f32.mrf.mxu0  ;;  %1818 = vmatmul.mubr.bf16.gmra.mxu1 %v3098_v23  ;;  %2316 = vmatmul.mubr.bf16.gmra.mxu0 %v3101_v50 }
 0x14d   : > { %v792_v4 = vadd.f32 %v791_v41, %v3658_v49  ;;  %2829 = vmatprep.mubr.msk.bf16.mxu1 %vm451_vm0, %v3099_v27  ;;  %2907 = vmatprep.mubr.msk.bf16.mxu0 %vm451_vm0, %v3102_v56  ;;  %v3107_v41 = vld [vmem:[%s3169_s23 + $0x120] ss:$8 sps:$4 sm:$0xff]  }
 0x14e   : > { %v793_v7 = vpop.f32.mrf.mxu1  ;;  %v1259_v59 = vpop.f32.mrf.mxu0 }
 0x14f   : > { %v3758_v14 = vadd.f32 %v1257_v3, %v792_v4  ;;  %v3108_v4 = vld [vmem:[%s3169_s23 + $0x134] ss:$8 sps:$4 sm:$0xff]  }
 0x150   : > { %v794_v43 = vpop.f32.mrf.mxu1  ;;  %v1260_v11 = vpop.f32.mrf.mxu0 }
 0x151   : > { %v795_v13 = vadd.f32 %v794_v43, %v3668_v51 }
 0x152   : > { %v796_v15 = vpop.f32.mrf.mxu1  ;;  %v1262_v17 = vpop.f32.mrf.mxu0 }
 0x153   : > { %v3762_v19 = vadd.f32 %v1260_v11, %v795_v13 }
 0x154   : > { %v799_v23 = vpop.f32.mrf.mxu1  ;;  %v1265_v49 = vpop.f32.mrf.mxu0  ;;  %1826 = vmatmul.mubr.bf16.gmra.mxu1 %v3101_v50  ;;  %2324 = vmatmul.mubr.bf16.gmra.mxu0 %v3104_v12 }
 0x155   : > { %v800_v26 = vadd.f32 %v799_v23, %v3673_v53  ;;  %2830 = vmatprep.mubr.msk.bf16.mxu1 %vm451_vm0, %v3102_v56  ;;  %2908 = vmatprep.mubr.msk.bf16.mxu0 %vm451_vm0, %v3599_v1  ;;  %v3110_v23 = vld [vmem:[%s3169_s23 + $0x130] ss:$8 sps:$4 sm:$0xff]  }
 0x156   : > { %v801_v27 = vpop.f32.mrf.mxu1  ;;  %v1267_v22 = vpop.f32.mrf.mxu0 }
 0x157   : > { %v3768_v32 = vadd.f32 %v1265_v49, %v800_v26 }
 0x158   : > { %v802_v51 = vpop.f32.mrf.mxu1  ;;  %v1268_v33 = vpop.f32.mrf.mxu0 }
 0x159   : > { %v803_v40 = vadd.f32 %v802_v51, %v3682_v63 }
 0x15a   : > { %v804_v39 = vpop.f32.mrf.mxu1  ;;  %v1270_v46 = vpop.f32.mrf.mxu0 }
 0x15b   : > { %v3772_v48 = vadd.f32 %v1268_v33, %v803_v40 }
 0x15c   : > { %v807_v53 = vpop.f32.mrf.mxu1  ;;  %v1273_v47 = vpop.f32.mrf.mxu0  ;;  %1834 = vmatmul.mubr.bf16.gmra.mxu1 %v3104_v12  ;;  %2332 = vmatmul.mubr.bf16.gmra.mxu0 %v3608_v6 }
 0x15d   : > { %v808_v50 = vadd.f32 %v807_v53, %v3688_v57  ;;  %2831 = vmatprep.mubr.msk.bf16.mxu1 %vm451_vm0, %v3599_v1  ;;  %2909 = vmatprep.mubr.msk.bf16.mxu0 %vm451_vm0, %v3105_v36 }
 0x15e   : > { %v809_v63 = vpop.f32.mrf.mxu1  ;;  %v1275_v54 = vpop.f32.mrf.mxu0 }
 0x15f   : > { %v3779_v56 = vadd.f32 %v1273_v47, %v808_v50 }
 0x160   : > { %v810_v55 = vpop.f32.mrf.mxu1  ;;  %v1276_v62 = vpop.f32.mrf.mxu0 }
 0x161   : > { %v811_v3 = vadd.f32 %v810_v55, %v3695_v9 }
 0x162   : > { %v812_v7 = vpop.f32.mrf.mxu1  ;;  %v1278_v59 = vpop.f32.mrf.mxu0 }
 0x163   : > { %v3784_v43 = vadd.f32 %v1276_v62, %v811_v3 }
 0x164   : > { %v815_v57 = vpop.f32.mrf.mxu1  ;;  %v1281_v11 = vpop.f32.mrf.mxu0  ;;  %1842 = vmatmul.mubr.bf16.gmra.mxu1 %v3608_v6  ;;  %2340 = vmatmul.mubr.bf16.gmra.mxu0 %v3107_v41 }
 0x165   : > { %v816_v1 = vadd.f32 %v815_v57, %v3701_v16  ;;  %2832 = vmatprep.mubr.msk.bf16.mxu1 %vm451_vm0, %v3105_v36  ;;  %2910 = vmatprep.mubr.msk.bf16.mxu0 %vm451_vm0, %v3108_v4 }
 0x166   : > { %v817_v12 = vpop.f32.mrf.mxu1  ;;  %v1283_v13 = vpop.f32.mrf.mxu0 }
 0x167   : > { %v3790_v9 = vadd.f32 %v1281_v11, %v816_v1 }
 0x168   : > { %v818_v15 = vpop.f32.mrf.mxu1  ;;  %v1284_v17 = vpop.f32.mrf.mxu0 }
 0x169   : > { %v819_v49 = vadd.f32 %v818_v15, %v3707_v20 }
 0x16a   : > { %v820_v26 = vpop.f32.mrf.mxu1  ;;  %v1286_v27 = vpop.f32.mrf.mxu0 }
 0x16b   : > { %v3794_v22 = vadd.f32 %v1284_v17, %v819_v49 }
 0x16c   : > { %v823_v6 = vpop.f32.mrf.mxu1  ;;  %v1289_v51 = vpop.f32.mrf.mxu0  ;;  %1850 = vmatmul.mubr.bf16.gmra.mxu1 %v3107_v41  ;;  %2348 = vmatmul.mubr.bf16.gmra.mxu0 %v3110_v23 }
 0x16d   : > { %v824_v16 = vadd.f32 %v823_v6, %v3713_v25 }
 0x16e   : > { %v825_v33 = vpop.f32.mrf.mxu1  ;;  %v1291_v40 = vpop.f32.mrf.mxu0 }
 0x16f   : > { %v3797_v36 = vadd.f32 %v1289_v51, %v824_v16 }
 0x170   : > { %v826_v39 = vpop.f32.mrf.mxu1  ;;  %v1292_v46 = vpop.f32.mrf.mxu0 }
 0x171   : > { %v827_v53 = vadd.f32 %v826_v39, %v3719_v31 }
 0x172   : > { %v828_v47 = vpop.f32.mrf.mxu1  ;;  %v1294_v20 = vpop.f32.mrf.mxu0 }
 0x173   : > { %v3800_v50 = vadd.f32 %v1292_v46, %v827_v53 }
 0x174   : > { %v831_v63 = vpop.f32.mrf.mxu1  ;;  %v1297_v54 = vpop.f32.mrf.mxu0 }
 0x175   : > { %v832_v55 = vadd.f32 %v831_v63, %v3618_v18 }
 0x176   : > { %v833_v62 = vpop.f32.mrf.mxu1  ;;  %v1299_v41 = vpop.f32.mrf.mxu0 }
 0x177   : > { %v3803_v3 = vadd.f32 %v1297_v54, %v832_v55 }
 0x178   : > { %v834_v25 = vpop.f32.mrf.mxu1  ;;  %v1300_v4 = vpop.f32.mrf.mxu0 }
 0x179   : > { %v835_v7 = vadd.f32 %v834_v25, %v3628_v29 }
 0x17a   : > { %v836_v59 = vpop.f32.mrf.mxu1  ;;  %v1302_v57 = vpop.f32.mrf.mxu0 }
 0x17b   : > { %v3806_v11 = vadd.f32 %v1300_v4, %v835_v7 }
 0x17c   : > { %v839_v31 = vpop.f32.mrf.mxu1  ;;  %v1305_v1 = vpop.f32.mrf.mxu0 }
 0x17d   : > { %v840_v12 = vadd.f32 %v839_v31, %v3632_v34 }
 0x17e   : > { %v841_v13 = vpop.f32.mrf.mxu1  ;;  %v1307_v15 = vpop.f32.mrf.mxu0 }
 0x17f   : > { %v3809_v17 = vadd.f32 %v1305_v1, %v840_v12 }
 0x180   : > { %v842_v18 = vpop.f32.mrf.mxu1  ;;  %v1308_v23 = vpop.f32.mrf.mxu0 }
 0x181   : > { %v843_v49 = vadd.f32 %v842_v18, %v3642_v37 }
 0x182   : > { %v844_v26 = vpop.f32.mrf.mxu1  ;;  %v1310_v27 = vpop.f32.mrf.mxu0 }
 0x183   : > { %v3812_v6 = vadd.f32 %v1308_v23, %v843_v49 }
 0x184   : > { %v847_v29 = vpop.f32.mrf.mxu1  ;;  %v1313_v51 = vpop.f32.mrf.mxu0 }
 0x185   : > { %v848_v16 = vadd.f32 %v847_v29, %v3646_v42 }
 0x186   : > { %v849_v33 = vpop.f32.mrf.mxu1  ;;  %v1315_v40 = vpop.f32.mrf.mxu0 }
 0x187   : > { %v3815_v39 = vadd.f32 %v1313_v51, %v848_v16 }
 0x188   : > { %v850_v34 = vpop.f32.mrf.mxu1  ;;  %v1316_v46 = vpop.f32.mrf.mxu0 }
 0x189   : > { %v851_v53 = vadd.f32 %v850_v34, %v3656_v45 }
 0x18a   : > { %v852_v47 = vpop.f32.mrf.mxu1  ;;  %v1318_v20 = vpop.f32.mrf.mxu0 }
 0x18b   : > { %v3818_v63 = vadd.f32 %v1316_v46, %v851_v53 }
 0x18c   : > { %v855_v37 = vpop.f32.mrf.mxu1  ;;  %v1321_v54 = vpop.f32.mrf.mxu0 }
 0x18d   : > { %v856_v55 = vadd.f32 %v855_v37, %v3660_v44 }
 0x18e   : > { %v857_v62 = vpop.f32.mrf.mxu1  ;;  %v1323_v41 = vpop.f32.mrf.mxu0 }
 0x18f   : > { %v3821_v25 = vadd.f32 %v1321_v54, %v856_v55 }
 0x190   : > { %v858_v42 = vpop.f32.mrf.mxu1  ;;  %v1324_v4 = vpop.f32.mrf.mxu0 }
 0x191   : > { %v859_v7 = vadd.f32 %v858_v42, %v3670_v52 }
 0x192   : > { %v860_v59 = vpop.f32.mrf.mxu1  ;;  %v1326_v57 = vpop.f32.mrf.mxu0 }
 0x193   : > { %v3824_v31 = vadd.f32 %v1324_v4, %v859_v7 }
 0x194   : > { %v863_v45 = vpop.f32.mrf.mxu1  ;;  %v1329_v1 = vpop.f32.mrf.mxu0 }
 0x195   : > { %v864_v12 = vadd.f32 %v863_v45, %v3675_v60 }
 0x196   : > { %v865_v13 = vpop.f32.mrf.mxu1  ;;  %v1331_v15 = vpop.f32.mrf.mxu0 }
 0x197   : > { %v3827_v18 = vadd.f32 %v1329_v1, %v864_v12 }
 0x198   : > { %v866_v44 = vpop.f32.mrf.mxu1  ;;  %v1332_v23 = vpop.f32.mrf.mxu0 }
 0x199   : > { %v867_v49 = vadd.f32 %v866_v44, %v3684_v0 }
 0x19a   : > { %v868_v26 = vpop.f32.mrf.mxu1  ;;  %v1334_v27 = vpop.f32.mrf.mxu0 }
 0x19b   : > { %v3830_v29 = vadd.f32 %v1332_v23, %v867_v49 }
 0x19c   : > { %v871_v52 = vpop.f32.mrf.mxu1  ;;  %v1337_v51 = vpop.f32.mrf.mxu0 }
 0x19d   : > { %v872_v16 = vadd.f32 %v871_v52, %v3690_v8 }
 0x19e   : > { %v873_v33 = vpop.f32.mrf.mxu1  ;;  %v1339_v40 = vpop.f32.mrf.mxu0 }
 0x19f   : > { %v3833_v34 = vadd.f32 %v1337_v51, %v872_v16 }
 0x1a0   : > { %v874_v60 = vpop.f32.mrf.mxu1  ;;  %v1340_v46 = vpop.f32.mrf.mxu0 }
 0x1a1   : > { %v875_v53 = vadd.f32 %v874_v60, %v3697_v10 }
 0x1a2   : > { %v876_v47 = vpop.f32.mrf.mxu1  ;;  %v1342_v20 = vpop.f32.mrf.mxu0 }
 0x1a3   : > { %v3836_v37 = vadd.f32 %v1340_v46, %v875_v53 }
 0x1a4   : > { %v879_v0 = vpop.f32.mrf.mxu1  ;;  %v1345_v54 = vpop.f32.mrf.mxu0 }
 0x1a5   : > { %v880_v55 = vadd.f32 %v879_v0, %v3703_v61 }
 0x1a6   : > { %v881_v62 = vpop.f32.mrf.mxu1  ;;  %v1347_v41 = vpop.f32.mrf.mxu0 }
 0x1a7   : > { %v3839_v42 = vadd.f32 %v1345_v54, %v880_v55 }
 0x1a8   : > { %v882_v8 = vpop.f32.mrf.mxu1  ;;  %v1348_v4 = vpop.f32.mrf.mxu0 }
 0x1a9   : > { %v883_v7 = vadd.f32 %v882_v8, %v3709_v21  ;;  %v3856_v8 = vld [vmem:[%s3946_s2] ss:$0 sm:$0xff] }
 0x1aa   : > { %v884_v59 = vpop.f32.mrf.mxu1  ;;  %v1350_v57 = vpop.f32.mrf.mxu0 }
 0x1ab   : > { %v3842_v45 = vadd.f32 %v1348_v4, %v883_v7 }
 0x1ac   : > { %v887_v10 = vpop.f32.mrf.mxu1  ;;  %v1353_v1 = vpop.f32.mrf.mxu0 }
 0x1ad   : > { %v888_v12 = vadd.f32 %v887_v10, %v3715_v30 }
 0x1ae   : > { %v889_v13 = vpop.f32.mrf.mxu1  ;;  %v1355_v15 = vpop.f32.mrf.mxu0 }
 0x1af   : > { %v3845_v44 = vadd.f32 %v1353_v1, %v888_v12 }
 0x1b0   : > { %v890_v61 = vpop.f32.mrf.mxu1  ;;  %v1356_v23 = vpop.f32.mrf.mxu0 }
 0x1b1   : > { %v891_v49 = vadd.f32 %v890_v61, %v3721_v38 }
 0x1b2   : > { %v892_v26 = vpop.f32.mrf.mxu1  ;;  %v1358_v27 = vpop.f32.mrf.mxu0 }
 0x1b3   : > { %v3848_v52 = vadd.f32 %v1356_v23, %v891_v49 }
 0x1b4   : > { %v1731_v21 = vpop.f32.mrf.mxu1  ;;  %v2229_v51 = vpop.f32.mrf.mxu0 }
 0x1b5   : > { %v1858_v53 = vadd.f32 %v1731_v21, %v3728_v58 }
 0x1b6   : > { %v1733_v16 = vpop.f32.mrf.mxu1  ;;  %v2231_v33 = vpop.f32.mrf.mxu0 }
 0x1b7   : > { %v2356_v55 = vadd.f32 %v2229_v51, %v1858_v53 }
 0x1b8   : > { %v1734_v40 = vpop.f32.mrf.mxu1  ;;  %v2232_v60 = vpop.f32.mrf.mxu0 }
 0x1b9   : > { %v1859_v62 = vadd.f32 %v1734_v40, %v3733_v5 }
 0x1ba   : > { %v1736_v30 = vpop.f32.mrf.mxu1  ;;  %v2234_v46 = vpop.f32.mrf.mxu0 }
 0x1bc   : > { %v1739_v47 = vpop.f32.mrf.mxu1  ;;  %v2237_v20 = vpop.f32.mrf.mxu0 }
 0x1bd   : > { %v1860_v0 = vadd.f32 %v1739_v47, %v3738_v24  ;;  %v2357_v24 = vadd.f32 %v2232_v60, %v1859_v62 }
 0x1be   : > { %v1741_v38 = vpop.f32.mrf.mxu1  ;;  %v2239_v54 = vpop.f32.mrf.mxu0 }
 0x1bf   : > { %v2358_v41 = vadd.f32 %v2237_v20, %v1860_v0 }
 0x1c0   : > { %v1742_v4 = vpop.f32.mrf.mxu1  ;;  %v2240_v7 = vpop.f32.mrf.mxu0 }
 0x1c1   : > { %v2388_v59 = vmax.f32 %v2356_v55, %v2358_v41  ;;  %v1861_v58 = vadd.f32 %v1742_v4, %v3743_v28 }
 0x1c2   : > { %v1744_v57 = vpop.f32.mrf.mxu1  ;;  %v2242_v10 = vpop.f32.mrf.mxu0 }
 0x1c3   : > { %v2411_v1 = vadd.f32 %v3856_v8, %v2388_v59  ;;  %v2359_v12 = vadd.f32 %v2240_v7, %v1861_v58 }
 0x1c4   : > { %v1747_v5 = vpop.f32.mrf.mxu1  ;;  %v2245_v13 = vpop.f32.mrf.mxu0 }
 0x1c5   : > { %v2931_v15 = vpack.c.bf16 %v2411_v1, %v2411_v1  ;;  %v2389_v61 = vmax.f32 %v2357_v24, %v2359_v12  ;;  %v1862_v33 = vadd.f32 %v1747_v5, %v3748_v35 }
 0x1c6   : > { %v1749_v23 = vpop.f32.mrf.mxu1  ;;  %v2247_v28 = vpop.f32.mrf.mxu0 }
 0x1c7   : > { %2492 = vst.msk [vmem:[%s3864_s26] sm:$0xf] %vm2491_vm1, %v2931_v15  ;;  %v2412_v49 = vadd.f32 %v3856_v8, %v2389_v61  ;;  %v2360_v47 = vadd.f32 %v2245_v13, %v1862_v33 }
 0x1c8   : > { %v1750_v26 = vpop.f32.mrf.mxu1  ;;  %v2248_v27 = vpop.f32.mrf.mxu0 }
 0x1c9   : > { %v2932_v21 = vpack.c.bf16 %v2412_v49, %v2412_v49  ;;  %v1863_v20 = vadd.f32 %v1750_v26, %v3753_v2 }
 0x1ca   : > { %v1752_v51 = vpop.f32.mrf.mxu1  ;;  %v2250_v16 = vpop.f32.mrf.mxu0 }
 0x1cb   : > { %2493 = vst.msk [vmem:[%s3864_s26 + $0x4] sm:$0xf] %vm2491_vm1, %v2932_v21  ;;  %v2361_v7 = vadd.f32 %v2248_v27, %v1863_v20 }
 0x1cc   : > { %v1755_v40 = vpop.f32.mrf.mxu1  ;;  %v2253_v60 = vpop.f32.mrf.mxu0 }
 0x1cd   : > { %v1864_v30 = vadd.f32 %v1755_v40, %v3758_v14 }
 0x1ce   : > { %v1757_v46 = vpop.f32.mrf.mxu1  ;;  %v2255_v53 = vpop.f32.mrf.mxu0 }
 0x1cf   : > { %v2362_v0 = vadd.f32 %v2253_v60, %v1864_v30 }
 0x1d0   : > { %v1758_v38 = vpop.f32.mrf.mxu1  ;;  %v2256_v54 = vpop.f32.mrf.mxu0 }
 0x1d1   : > { %v2390_v55 = vmax.f32 %v2360_v47, %v2362_v0  ;;  %v1865_v62 = vadd.f32 %v1758_v38, %v3762_v19 }
 0x1d2   : > { %v1760_v41 = vpop.f32.mrf.mxu1  ;;  %v2258_v4 = vpop.f32.mrf.mxu0 }
 0x1d3   : > { %v2413_v35 = vadd.f32 %v3856_v8, %v2390_v55  ;;  %v2363_v59 = vadd.f32 %v2256_v54, %v1865_v62 }
 0x1d4   : > { %v1763_v14 = vpop.f32.mrf.mxu1  ;;  %v2261_v58 = vpop.f32.mrf.mxu0 }
 0x1d5   : > { %v2933_v57 = vpack.c.bf16 %v2413_v35, %v2413_v35  ;;  %v2391_v10 = vmax.f32 %v2361_v7, %v2363_v59  ;;  %v1866_v61 = vadd.f32 %v1763_v14, %v3768_v32 }
 0x1d6   : > { %v1765_v24 = vpop.f32.mrf.mxu1  ;;  %v2263_v2 = vpop.f32.mrf.mxu0 }
 0x1d7   : > { %2494 = vst.msk [vmem:[%s3864_s26 + $0x8] sm:$0xf] %vm2491_vm1, %v2933_v57  ;;  %v2414_v1 = vadd.f32 %v3856_v8, %v2391_v10  ;;  %v2364_v21 = vadd.f32 %v2261_v58, %v1866_v61 }
 0x1d8   : > { %v1766_v12 = vpop.f32.mrf.mxu1  ;;  %v2264_v5 = vpop.f32.mrf.mxu0 }
 0x1d9   : > { %v2934_v19 = vpack.c.bf16 %v2414_v1, %v2414_v1  ;;  %v1867_v51 = vadd.f32 %v1766_v12, %v3772_v48 }
 0x1da   : > { %v1768_v13 = vpop.f32.mrf.mxu1  ;;  %v2266_v15 = vpop.f32.mrf.mxu0 }
 0x1db   : > { %2495 = vst.msk [vmem:[%s3864_s26 + $0xc] sm:$0xf] %vm2491_vm1, %v2934_v19  ;;  %v2365_v47 = vadd.f32 %v2264_v5, %v1867_v51 }
 0x1dc   : > { %v1771_v23 = vpop.f32.mrf.mxu1  ;;  %v2269_v28 = vpop.f32.mrf.mxu0 }
 0x1dd   : > { %v1868_v49 = vadd.f32 %v1771_v23, %v3779_v56 }
 0x1de   : > { %v1773_v26 = vpop.f32.mrf.mxu1  ;;  %v2271_v27 = vpop.f32.mrf.mxu0 }
 0x1df   : > { %v2366_v16 = vadd.f32 %v2269_v28, %v1868_v49 }
 0x1e0   : > { %v1774_v33 = vpop.f32.mrf.mxu1  ;;  %v2272_v40 = vpop.f32.mrf.mxu0 }
 0x1e1   : > { %v2392_v60 = vmax.f32 %v2364_v21, %v2366_v16  ;;  %v1869_v30 = vadd.f32 %v1774_v33, %v3784_v43 }
 0x1e2   : > { %v1776_v46 = vpop.f32.mrf.mxu1  ;;  %v2274_v53 = vpop.f32.mrf.mxu0 }
 0x1e3   : > { %v2415_v32 = vadd.f32 %v3856_v8, %v2392_v60  ;;  %v2367_v20 = vadd.f32 %v2272_v40, %v1869_v30 }
 0x1e4   : > { %v1779_v56 = vpop.f32.mrf.mxu1  ;;  %v2277_v0 = vpop.f32.mrf.mxu0 }
 0x1e5   : > { %v2935_v38 = vpack.c.bf16 %v2415_v32, %v2415_v32  ;;  %v2393_v54 = vmax.f32 %v2365_v47, %v2367_v20  ;;  %v1870_v59 = vadd.f32 %v1779_v56, %v3790_v9 }
 0x1e6   : > { %v1781_v55 = vpop.f32.mrf.mxu1  ;;  %v2279_v48 = vpop.f32.mrf.mxu0 }
 0x1e7   : > { %2496 = vst.msk [vmem:[%s3864_s26 + $0x10] sm:$0xf] %vm2491_vm1, %v2935_v38  ;;  %v2416_v62 = vadd.f32 %v3856_v8, %v2393_v54  ;;  %v2368_v2 = vadd.f32 %v2277_v0, %v1870_v59 }
 0x1e8   : > { %v1782_v41 = vpop.f32.mrf.mxu1  ;;  %v2280_v4 = vpop.f32.mrf.mxu0 }
 0x1e9   : > { %v2936_v43 = vpack.c.bf16 %v2416_v62, %v2416_v62  ;;  %v1871_v1 = vadd.f32 %v1782_v41, %v3794_v22 }
 0x1ea   : > { %v1784_v7 = vpop.f32.mrf.mxu1  ;;  %v2282_v35 = vpop.f32.mrf.mxu0 }
 0x1eb   : > { %2497 = vst.msk [vmem:[%s3864_s26 + $0x14] sm:$0xf] %vm2491_vm1, %v2936_v43  ;;  %v2369_v28 = vadd.f32 %v2280_v4, %v1871_v1 }
 0x1ec   : > { %v1787_v14 = vpop.f32.mrf.mxu1  ;;  %v2285_v58 = vpop.f32.mrf.mxu0 }
 0x1ed   : > { %v1872_v57 = vadd.f32 %v1787_v14, %v3797_v36 }
 0x1ee   : > { %v1789_v10 = vpop.f32.mrf.mxu1  ;;  %v2287_v24 = vpop.f32.mrf.mxu0 }
 0x1ef   : > { %v2370_v12 = vadd.f32 %v2285_v58, %v1872_v57 }
 0x1f0   : > { %v1790_v5 = vpop.f32.mrf.mxu1  ;;  %v2288_v19 = vpop.f32.mrf.mxu0 }
 0x1f1   : > { %v2394_v13 = vmax.f32 %v2368_v2, %v2370_v12  ;;  %v1873_v15 = vadd.f32 %v1790_v5, %v3800_v50 }
 0x1f2   : > { %v1792_v61 = vpop.f32.mrf.mxu1  ;;  %v2290_v23 = vpop.f32.mrf.mxu0 }
 0x1f3   : > { %v2417_v9 = vadd.f32 %v3856_v8, %v2394_v13  ;;  %v2371_v49 = vadd.f32 %v2288_v19, %v1873_v15 }
 0x1f4   : > { %v1795_v36 = vpop.f32.mrf.mxu1  ;;  %v2293_v26 = vpop.f32.mrf.mxu0 }
 0x1f5   : > { %v2937_v27 = vpack.c.bf16 %v2417_v9, %v2417_v9  ;;  %v2395_v21 = vmax.f32 %v2369_v28, %v2371_v49  ;;  %v1874_v46 = vadd.f32 %v1795_v36, %v3803_v3 }
 0x1f6   : > { %v1797_v51 = vpop.f32.mrf.mxu1  ;;  %v2295_v22 = vpop.f32.mrf.mxu0 }
 0x1f7   : > { %2498 = vst.msk [vmem:[%s3864_s26 + $0x18] sm:$0xf] %vm2491_vm1, %v2937_v27  ;;  %v2418_v16 = vadd.f32 %v3856_v8, %v2395_v21  ;;  %v2372_v0 = vadd.f32 %v2293_v26, %v1874_v46 }
 0x1f8   : > { %v1798_v33 = vpop.f32.mrf.mxu1  ;;  %v2296_v40 = vpop.f32.mrf.mxu0 }
 0x1f9   : > { %v2938_v50 = vpack.c.bf16 %v2418_v16, %v2418_v16  ;;  %v1875_v38 = vadd.f32 %v1798_v33, %v3806_v11 }
 0x1fa   : > { %v1800_v60 = vpop.f32.mrf.mxu1  ;;  %v2298_v30 = vpop.f32.mrf.mxu0 }
 0x1fb   : > { %2499 = vst.msk [vmem:[%s3864_s26 + $0x1c] sm:$0xf] %vm2491_vm1, %v2938_v50  ;;  %v2373_v7 = vadd.f32 %v2296_v40, %v1875_v38 }
 0x1fc   : > { %v1803_v53 = vpop.f32.mrf.mxu1  ;;  %v2301_v47 = vpop.f32.mrf.mxu0 }
 0x1fd   : > { %v1876_v32 = vadd.f32 %v1803_v53, %v3809_v17 }
 0x1fe   : > { %v1805_v20 = vpop.f32.mrf.mxu1  ;;  %v2303_v56 = vpop.f32.mrf.mxu0 }
 0x1ff   : > { %v2374_v54 = vadd.f32 %v2301_v47, %v1876_v32 }
 0x200   : > { %v1806_v55 = vpop.f32.mrf.mxu1  ;;  %v2304_v48 = vpop.f32.mrf.mxu0 }
 0x201   : > { %v2396_v62 = vmax.f32 %v2372_v0, %v2374_v54  ;;  %v1877_v41 = vadd.f32 %v1806_v55, %v3812_v6 }
 0x202   : > { %v1808_v4 = vpop.f32.mrf.mxu1  ;;  %v2306_v43 = vpop.f32.mrf.mxu0 }
 0x203   : > { %v2419_v3 = vadd.f32 %v3856_v8, %v2396_v62  ;;  %v2375_v35 = vadd.f32 %v2304_v48, %v1877_v41 }
 0x204   : > { %v1811_v17 = vpop.f32.mrf.mxu1  ;;  %v2309_v59 = vpop.f32.mrf.mxu0 }
 0x205   : > { %v2939_v14 = vpack.c.bf16 %v2419_v3, %v2419_v3  ;;  %v2397_v58 = vmax.f32 %v2373_v7, %v2375_v35  ;;  %v1878_v5 = vadd.f32 %v1811_v17, %v3815_v39 }
 0x206   : > { %v1813_v57 = vpop.f32.mrf.mxu1  ;;  %v2311_v11 = vpop.f32.mrf.mxu0 }
 0x207   : > { %2500 = vst.msk [vmem:[%s3864_s26 + $0x20] sm:$0xf] %vm2491_vm1, %v2939_v14  ;;  %v2420_v10 = vadd.f32 %v3856_v8, %v2397_v58  ;;  %v2376_v28 = vadd.f32 %v2309_v59, %v1878_v5 }
 0x208   : > { %v1814_v24 = vpop.f32.mrf.mxu1  ;;  %v2312_v2 = vpop.f32.mrf.mxu0 }
 0x209   : > { %v2940_v6 = vpack.c.bf16 %v2420_v10, %v2420_v10  ;;  %v1879_v9 = vadd.f32 %v1814_v24, %v3818_v63 }
 0x20a   : > { %v1816_v1 = vpop.f32.mrf.mxu1  ;;  %v2314_v12 = vpop.f32.mrf.mxu0 }
 0x20b   : > { %2501 = vst.msk [vmem:[%s3864_s26 + $0x24] sm:$0xf] %vm2491_vm1, %v2940_v6  ;;  %v2377_v16 = vadd.f32 %v2312_v2, %v1879_v9 }
 0x20c   : > { %v1819_v19 = vpop.f32.mrf.mxu1  ;;  %v2317_v13 = vpop.f32.mrf.mxu0 }
 0x20d   : > { %v1880_v15 = vadd.f32 %v1819_v19, %v3821_v25 }
 0x20e   : > { %v1821_v61 = vpop.f32.mrf.mxu1  ;;  %v2319_v23 = vpop.f32.mrf.mxu0 }
 0x20f   : > { %v2378_v49 = vadd.f32 %v2317_v13, %v1880_v15 }
 0x210   : > { %v1822_v36 = vpop.f32.mrf.mxu1  ;;  %v2320_v26 = vpop.f32.mrf.mxu0 }
 0x211   : > { %v2398_v27 = vmax.f32 %v2376_v28, %v2378_v49  ;;  %v1881_v21 = vadd.f32 %v1822_v36, %v3824_v31 }
 0x212   : > { %v1824_v51 = vpop.f32.mrf.mxu1  ;;  %v2322_v22 = vpop.f32.mrf.mxu0 }
 0x213   : > { %v2421_v39 = vadd.f32 %v3856_v8, %v2398_v27  ;;  %v2379_v33 = vadd.f32 %v2320_v26, %v1881_v21 }
 0x214   : > { %v1827_v25 = vpop.f32.mrf.mxu1  ;;  %v2325_v40 = vpop.f32.mrf.mxu0 }
 0x215   : > { %v2941_v50 = vpack.c.bf16 %v2421_v39, %v2421_v39  ;;  %v2399_v60 = vmax.f32 %v2377_v16, %v2379_v33  ;;  %v1882_v56 = vadd.f32 %v1827_v25, %v3827_v18 }
 0x216   : > { %v1829_v30 = vpop.f32.mrf.mxu1  ;;  %v2327_v63 = vpop.f32.mrf.mxu0 }
 0x217   : > { %2502 = vst.msk [vmem:[%s3864_s26 + $0x28] sm:$0xf] %vm2491_vm1, %v2941_v50  ;;  %v2422_v46 = vadd.f32 %v3856_v8, %v2399_v60  ;;  %v2380_v62 = vadd.f32 %v2325_v40, %v1882_v56 }
 0x218   : > { %v1830_v53 = vpop.f32.mrf.mxu1  ;;  %v2328_v47 = vpop.f32.mrf.mxu0 }
 0x219   : > { %v2942_v31 = vpack.c.bf16 %v2422_v46, %v2422_v46  ;;  %v1883_v41 = vadd.f32 %v1830_v53, %v3830_v29 }
 0x21a   : > { %v1832_v32 = vpop.f32.mrf.mxu1  ;;  %v2330_v20 = vpop.f32.mrf.mxu0 }
 0x21b   : > { %2503 = vst.msk [vmem:[%s3864_s26 + $0x2c] sm:$0xf] %vm2491_vm1, %v2942_v31  ;;  %v2381_v14 = vadd.f32 %v2328_v47, %v1883_v41 }
 0x21c   : > { %v1835_v0 = vpop.f32.mrf.mxu1  ;;  %v2333_v38 = vpop.f32.mrf.mxu0 }
 0x21d   : > { %v1884_v54 = vadd.f32 %v1835_v0, %v3833_v34 }
 0x21e   : > { %v1837_v55 = vpop.f32.mrf.mxu1  ;;  %v2335_v48 = vpop.f32.mrf.mxu0 }
 0x21f   : > { %v2382_v4 = vadd.f32 %v2333_v38, %v1884_v54 }
 0x220   : > { %v1838_v43 = vpop.f32.mrf.mxu1  ;;  %v2336_v7 = vpop.f32.mrf.mxu0 }
 0x221   : > { %v2400_v3 = vmax.f32 %v2380_v62, %v2382_v4  ;;  %v1885_v35 = vadd.f32 %v1838_v43, %v3836_v37 }
 0x222   : > { %v1840_v17 = vpop.f32.mrf.mxu1  ;;  %v2338_v59 = vpop.f32.mrf.mxu0 }
 0x223   : > { %v2423_v18 = vadd.f32 %v3856_v8, %v2400_v3  ;;  %v2383_v58 = vadd.f32 %v2336_v7, %v1885_v35 }
 0x224   : > { %v1843_v34 = vpop.f32.mrf.mxu1  ;;  %v2341_v57 = vpop.f32.mrf.mxu0 }
 0x225   : > { %v2943_v11 = vpack.c.bf16 %v2423_v18, %v2423_v18  ;;  %v2401_v10 = vmax.f32 %v2381_v14, %v2383_v58  ;;  %v1886_v19 = vadd.f32 %v1843_v34, %v3839_v42 }
 0x226   : > { %v1845_v24 = vpop.f32.mrf.mxu1  ;;  %v2343_v29 = vpop.f32.mrf.mxu0 }
 0x227   : > { %2504 = vst.msk [vmem:[%s3864_s26 + $0x30] sm:$0xf] %vm2491_vm1, %v2943_v11  ;;  %v2424_v2 = vadd.f32 %v3856_v8, %v2401_v10  ;;  %v2384_v9 = vadd.f32 %v2341_v57, %v1886_v19 }
 0x228   : > { %v1846_v6 = vpop.f32.mrf.mxu1  ;;  %v2344_v1 = vpop.f32.mrf.mxu0 }
 0x229   : > { %v2944_v37 = vpack.c.bf16 %v2424_v2, %v2424_v2  ;;  %v1887_v49 = vadd.f32 %v1846_v6, %v3842_v45 }
 0x22a   : > { %v1848_v12 = vpop.f32.mrf.mxu1  ;;  %v2346_v5 = vpop.f32.mrf.mxu0 }
 0x22b   : > { %2505 = vst.msk [vmem:[%s3864_s26 + $0x34] sm:$0xf] %vm2491_vm1, %v2944_v37  ;;  %v2385_v42 = vadd.f32 %v2344_v1, %v1887_v49 }
 0x22c   : > { %v1851_v13 = vpop.f32.mrf.mxu1  ;;  %v2349_v15 = vpop.f32.mrf.mxu0 }
 0x22d   : > { %v1888_v61 = vadd.f32 %v1851_v13, %v3845_v44 }
 0x22e   : > { %v1853_v23 = vpop.f32.mrf.mxu1  ;;  %v2351_v28 = vpop.f32.mrf.mxu0 }
 0x22f   : > { %v2386_v36 = vadd.f32 %v2349_v15, %v1888_v61 }
 0x230   : > { %v1854_v26 = vpop.f32.mrf.mxu1  ;;  %v2352_v27 = vpop.f32.mrf.mxu0 }
 0x231   : > { %v2402_v21 = vmax.f32 %v2384_v9, %v2386_v36  ;;  %v1889_v51 = vadd.f32 %v1854_v26, %v3848_v52 }
 0x232   : > { %v1856_v22 = vpop.f32.mrf.mxu1  ;;  %v2354_v16 = vpop.f32.mrf.mxu0 }
 0x233   : > { %v2425_v39 = vadd.f32 %v3856_v8, %v2402_v21  ;;  %v2387_v33 = vadd.f32 %v2352_v27, %v1889_v51 }
 0x235   : > { %v2945_v44 = vpack.c.bf16 %v2425_v39, %v2425_v39  ;;  %v2403_v25 = vmax.f32 %v2385_v42, %v2387_v33 }
 0x237   : > { %2506 = vst.msk [vmem:[%s3864_s26 + $0x38] sm:$0xf] %vm2491_vm1, %v2945_v44  ;;  %v2426_v40 = vadd.f32 %v3856_v8, %v2403_v25 }
 0x239   : > { %v2946_v45 = vpack.c.bf16 %v2426_v40, %v2426_v40 }
 0x23b   : > { %2507 = vst.msk [vmem:[%s3864_s26 + $0x3c] sm:$0xf] %vm2491_vm1, %v2946_v45 }
 0x23c PF: > { %s13_s12 = sadd.s32 1, %s3117_s12  }
 0x23d   : > { %p10_p4 = scmp.ge.s32.totalorder %s13_s12, 4  }
 0x23f   :  { %12 = sbr.rel (!%p10_p4) target bundleno = 1 (0x1), region = 66 }

// kernel: network_forward.6
= control target key start
LH: loop header
LB: loop body
LE: loop exit
PB: predicated region body
PF: predicated region fallthrough
CT: control target
= control target key end

     0   :  { %s1610_s12 = smov 0   ;;  %s1952_s0 = inlined_call_operand.vmem [shape: bf16[2,96,160], index: 0, kind: input, shape index: {}]   ;;  %s1953_s1 = inlined_call_operand.vmem [shape: bf16[5,160,128], index: 1, kind: input, shape index: {}]   ;;  %s1954_s2 = inlined_call_operand.vmem [shape: f32[1,128], index: 2, kind: input, shape index: {}]   ;;  %s1955_s3 = inlined_call_operand.vmem [shape: bf16[2,32,64], index: 3, kind: output, shape index: {}]  }
   0x1 LB: > { %s1269_s13 = sadd.s32 4294967295, %s1587_s12   ;;  %p1273_p0 = scmp.ge.s32.totalorder %s1587_s12, 1  ;;  %s1587_s12 = sphi %s1610_s12, %s13_s12  }
   0x2   : > { %p137_p1 = scmp.lt.s32.totalorder %s1587_s12, 3 }
   0x4   : > { %p138_p2 = pnand %p1273_p0, %p137_p1 }
   0x5   : > { %p161_p3 = scmp.lt.s32.totalorder (!%p138_p2), %s1269_s13, 1 }
   0x6   : > { %141 = sbr.rel (%p138_p2) target bundleno = 346 (0x15a), region = 32 }
   0xb   : > { %v1509_v0 = vld [vmem:[%s1953_s1 + $0x88] sm:$0xff]   ;;  %v1589_v1 = vmov 0   ;;  %v1510_v2 = vld [vmem:[%s1953_s1 + $0x38] sm:$0xff]   ;;  %v1511_v3 = vld [vmem:[%s1953_s1 + $0x80] sm:$0xff]   ;;  %s1957_s13 = smov (!%p161_p3, %s1269_s13), 1  ;;  %vm318_vm0 = vcmask 261120  }
   0xc   : > { %331 = vmatprep.subr.bf16.mxu0 %v1589_v1  ;;  %483 = vmatprep.subr.bf16.mxu1 %v1589_v1  ;;  %v1512_v4 = vld [vmem:[%s1953_s1 + $0x30] sm:$0xff]   ;;  %v1513_v5 = vld [vmem:[%s1953_s1 + $0x78] sm:$0xff]   ;;  %v1514_v6 = vld [vmem:[%s1953_s1 + $0x28] sm:$0xff]   ;;  %s1499_s30 = smul.u32 96, %s1957_s13  ;;  %s1474_s22 = sshll.u32 %s1957_s13, 4  ;;  %vm1209_vm1 = vcmask 519168  }
   0xd   : > { %332 = vmatpush1.bf16.msra.mxu0 %v1509_v0  ;;  %484 = vmatpush1.bf16.msra.mxu1 %v1510_v2  ;;  %v1515_v7 = vld [vmem:[%s1953_s1 + $0x70] sm:$0xff]   ;;  %v1516_v8 = vld [vmem:[%s1953_s1 + $0x20] sm:$0xff]   ;;  %v1517_v9 = vld [vmem:[%s1953_s1 + $0x68] sm:$0xff]   ;;  %s170_s25 = scalar_lea.vmem %s1955_s3, %s1474_s22 }
   0xe   : > { %333 = vmatprep.subr.bf16.mxu0 %v1589_v1  ;;  %485 = vmatprep.subr.bf16.mxu1 %v1589_v1  ;;  %v1518_v10 = vld [vmem:[%s1953_s1 + $0x18] sm:$0xff]   ;;  %s1664_s10 = scalar_lea.vmem %s1952_s0, %s1499_s30  ;;  %v1519_v11 = vld [vmem:[%s1953_s1 + $0x60] sm:$0xff]   ;;  %v1520_v12 = vld [vmem:[%s1953_s1 + $0x10] sm:$0xff]  }
   0xf   : > { %v173_v13 = vld [vmem:[%s1664_s10 + $0x8] sm:$0xff]  ;;  %v174_v14 = vld [vmem:[%s1664_s10 + $0x10] sm:$0xff]  ;;  %v172_v15 = vld [vmem:[%s1664_s10] sm:$0xff] }
  0x10   : > { %v1298_v16 = vcombine.high %v173_v13, %v174_v14  ;;  %v1320_v17 = vcombine.high %v172_v15, %v173_v13  ;;  %v1521_v18 = vld [vmem:[%s1953_s1 + $0x58] sm:$0xff]   ;;  %v1522_v19 = vld [vmem:[%s1953_s1 + $0x8] sm:$0xff]   ;;  %v1523_v20 = vld [vmem:[%s1953_s1 + $0x50] sm:$0xff]   ;;  %v1297_v27 = vcombine.low %v173_v13, %v174_v14  ;;  %v1319_v29 = vcombine.low %v172_v15, %v173_v13 }
  0x11   : > { %334 = vmatpush1.bf16.msra.mxu0 %v1511_v3  ;;  %486 = vmatpush1.bf16.msra.mxu1 %v1512_v4  ;;  %v1524_v21 = vld [vmem:[%s1953_s1] sm:$0xff]   ;;  %v1525_v22 = vld [vmem:[%s1953_s1 + $0x98] sm:$0xff]   ;;  %v1526_v23 = vld [vmem:[%s1953_s1 + $0x48] sm:$0xff]  }
  0x12   : > { %335 = vmatprep.subr.bf16.mxu0 %v1589_v1  ;;  %487 = vmatprep.subr.bf16.mxu1 %v1589_v1  ;;  %v1527_v24 = vld [vmem:[%s1953_s1 + $0x90] sm:$0xff]   ;;  %v1528_v25 = vld [vmem:[%s1953_s1 + $0x40] sm:$0xff]   ;;  %v175_v26 = vld [vmem:[%s1664_s10 + $0x18] sm:$0xff] }
  0x13   : > { %1315 = vmatprep.mubr.msk.bf16.mxu0 %vm318_vm0, %v1298_v16  ;;  %1337 = vmatprep.mubr.msk.bf16.mxu1 %vm318_vm0, %v1320_v17  ;;  %v176_v28 = vld [vmem:[%s1664_s10 + $0x20] sm:$0xff]  ;;  %v1533_v30 = vld [vmem:[%s1953_s1 + $0xd8] sm:$0xff]   ;;  %v1534_v31 = vld [vmem:[%s1953_s1 + $0x128] sm:$0xff]   ;;  %v1723_v33 = vcombine.high %v174_v14, %v175_v26  ;;  %v1744_v40 = vcombine.low %v174_v14, %v175_v26 }
  0x14   : > { %v1721_v32 = vcombine.high %v175_v26, %v176_v28  ;;  %v1535_v34 = vld [vmem:[%s1953_s1 + $0xd0] sm:$0xff]   ;;  %v1536_v35 = vld [vmem:[%s1953_s1 + $0x120] sm:$0xff]   ;;  %v177_v36 = vld [vmem:[%s1664_s10 + $0x28] sm:$0xff]  ;;  %v1738_v37 = vcombine.low %v175_v26, %v176_v28 }
  0x15   : > { %336 = vmatpush1.bf16.msra.mxu0 %v1513_v5  ;;  %488 = vmatpush1.bf16.msra.mxu1 %v1514_v6  ;;  %v178_v38 = vld [vmem:[%s1664_s10 + $0x30] sm:$0xff]  ;;  %v1537_v39 = vld [vmem:[%s1953_s1 + $0xc8] sm:$0xff]   ;;  %v1538_v41 = vld [vmem:[%s1953_s1 + $0x118] sm:$0xff]   ;;  %v1754_v43 = vcombine.high %v176_v28, %v177_v36  ;;  %v1778_v50 = vcombine.low %v176_v28, %v177_v36 }
  0x16   : > { %337 = vmatprep.subr.bf16.mxu0 %v1589_v1  ;;  %489 = vmatprep.subr.bf16.mxu1 %v1589_v1  ;;  %v1751_v42 = vcombine.high %v177_v36, %v178_v38  ;;  %v1543_v44 = vld [vmem:[%s1953_s1 + $0xc0] sm:$0xff]   ;;  %v1544_v45 = vld [vmem:[%s1953_s1 + $0x110] sm:$0xff]   ;;  %v1769_v46 = vcombine.low %v177_v36, %v178_v38  ;;  %v179_v47 = vld [vmem:[%s1664_s10 + $0x38] sm:$0xff] }
  0x17   : > { %v1773_v48 = vld [vmem:[%s1664_s10 + $0x40] sm:$0xff]  ;;  %v1545_v49 = vld [vmem:[%s1953_s1 + $0xb8] sm:$0xff]   ;;  %v1546_v51 = vld [vmem:[%s1953_s1 + $0x108] sm:$0xff]   ;;  %v1789_v53 = vcombine.high %v178_v38, %v179_v47  ;;  %v1810_v58 = vcombine.low %v178_v38, %v179_v47 }
  0x18   : > { %v1786_v52 = vcombine.high %v179_v47, %v1773_v48  ;;  %v1551_v54 = vld [vmem:[%s1953_s1 + $0xb0] sm:$0xff]   ;;  %v1552_v55 = vld [vmem:[%s1953_s1 + $0x100] sm:$0xff]   ;;  %v1805_v56 = vcombine.low %v179_v47, %v1773_v48  ;;  %v1553_v57 = vld [vmem:[%s1953_s1 + $0xa8] sm:$0xff]  }
  0x19   : > { %338 = vmatpush1.bf16.msra.mxu0 %v1515_v7  ;;  %490 = vmatpush1.bf16.msra.mxu1 %v1516_v8  ;;  %v1554_v59 = vld [vmem:[%s1953_s1 + $0xf8] sm:$0xff]   ;;  %v1559_v60 = vld [vmem:[%s1953_s1 + $0xa0] sm:$0xff]   ;;  %v1560_v61 = vld [vmem:[%s1953_s1 + $0xf0] sm:$0xff]  }
  0x1a   : > { %339 = vmatprep.subr.bf16.mxu0 %v1589_v1  ;;  %491 = vmatprep.subr.bf16.mxu1 %v1589_v1  ;;  %v1561_v62 = vld [vmem:[%s1953_s1 + $0xe8] sm:$0xff]   ;;  %v1562_v63 = vld [vmem:[%s1953_s1 + $0x138] sm:$0xff]   ;;  %v1563_v0 = vld [vmem:[%s1953_s1 + $0xe0] sm:$0xff]  }
  0x1b   : > { %v1564_v2 = vld [vmem:[%s1953_s1 + $0x130] sm:$0xff]   ;;  %v1565_v3 = vld [vmem:[%s1953_s1 + $0x178] sm:$0xff]   ;;  %v1567_v5 = vld [vmem:[%s1953_s1 + $0x168] sm:$0xff]  }
  0x1c   : > { %v1566_v4 = vld [vmem:[%s1953_s1 + $0x170] sm:$0xff]   ;;  %v1568_v6 = vld [vmem:[%s1953_s1 + $0x160] sm:$0xff]   ;;  %v555_v7 = vld [vmem:[%s1664_s10 + $0x48] sm:$0xff] }
  0x1d   : > { %340 = vmatpush1.bf16.msra.mxu0 %v1517_v9  ;;  %492 = vmatpush1.bf16.msra.mxu1 %v1518_v10  ;;  %v1569_v8 = vld [vmem:[%s1953_s1 + $0x158] sm:$0xff]   ;;  %v765_v9 = vld [vmem:[%s1664_s10 + $0x50] sm:$0xff]  ;;  %v1368_v10 = vcombine.high %v1773_v48, %v555_v7  ;;  %v1367_v13 = vcombine.low %v1773_v48, %v555_v7  ;;  %v1574_v14 = vld [vmem:[%s1953_s1 + $0x148] sm:$0xff]  }
  0x1e   : > { %341 = vmatprep.subr.bf16.mxu0 %v1589_v1  ;;  %493 = vmatprep.subr.bf16.mxu1 %v1589_v1  ;;  %v1409_v15 = vcombine.low %v555_v7, %v765_v9  ;;  %v1576_v16 = vld [vmem:[%s1953_s1 + $0x140] sm:$0xff]   ;;  %v1577_v17 = vld [vmem:[%s1953_s1 + $0x188] sm:$0xff]  }
  0x21   : > { %342 = vmatpush1.bf16.msra.mxu0 %v1519_v11  ;;  %494 = vmatpush1.bf16.msra.mxu1 %v1520_v12  ;;  %v1410_v11 = vcombine.high %v555_v7, %v765_v9  ;;  %v1570_v12 = vld [vmem:[%s1953_s1 + $0x150] sm:$0xff]  }
  0x22   : > { %343 = vmatprep.subr.bf16.mxu0 %v1589_v1  ;;  %495 = vmatprep.subr.bf16.mxu1 %v1589_v1 }
  0x25   : > { %344 = vmatpush1.bf16.msra.mxu0 %v1521_v18  ;;  %496 = vmatpush1.bf16.msra.mxu1 %v1522_v19  ;;  %v1578_v18 = vld [vmem:[%s1953_s1 + $0x180] sm:$0xff]   ;;  %v975_v19 = vld [vmem:[%s1664_s10 + $0x58] sm:$0xff] }
  0x26   : > { %345 = vmatprep.subr.bf16.mxu0 %v1589_v1  ;;  %497 = vmatprep.subr.bf16.mxu1 %v1589_v1 }
  0x29   : > { %346 = vmatpush1.bf16.msra.mxu0 %v1523_v20  ;;  %498 = vmatpush1.bf16.msra.mxu1 %v1524_v21  ;;  %v1452_v20 = vcombine.high %v765_v9, %v975_v19  ;;  %v1451_v21 = vcombine.low %v765_v9, %v975_v19 }
  0x2a   : > { %359 = vmatprep.subr.bf16.mxu0 %v1589_v1  ;;  %511 = vmatprep.subr.bf16.mxu1 %v1589_v1 }
  0x2d   : > { %360 = vmatpush2.bf16.msra.mxu0 %v1525_v22  ;;  %512 = vmatpush2.bf16.msra.mxu1 %v1526_v23 }
  0x2e   : > { %361 = vmatprep.subr.bf16.mxu0 %v1589_v1  ;;  %513 = vmatprep.subr.bf16.mxu1 %v1589_v1 }
  0x31   : > { %362 = vmatpush2.bf16.msra.mxu0 %v1527_v24  ;;  %514 = vmatpush2.bf16.msra.mxu1 %v1528_v25 }
  0x32   : > { %685 = vmatprep.subr.bf16.mxu0 %v1589_v1  ;;  %895 = vmatprep.subr.bf16.mxu1 %v1589_v1 }
  0x34   : > { %364 = vmatmul.mubr.bf16.vlgmr.msra.gmra.mxu0 %v1297_v27  ;;  %516 = vmatmul.mubr.bf16.vlgmr.msra.gmra.mxu1 %v1319_v29 }
  0x35   : > { %686 = vmatpush1.bf16.msra.mxu0 %v1533_v30  ;;  %896 = vmatpush1.bf16.msra.mxu1 %v1534_v31 }
  0x36   : > { %687 = vmatprep.subr.bf16.mxu0 %v1589_v1  ;;  %897 = vmatprep.subr.bf16.mxu1 %v1589_v1 }
  0x37   : > { %1316 = vmatprep.mubr.msk.bf16.mxu0 %vm318_vm0, %v1721_v32  ;;  %1338 = vmatprep.mubr.msk.bf16.mxu1 %vm318_vm0, %v1723_v33 }
  0x39   : > { %688 = vmatpush1.bf16.msra.mxu0 %v1535_v34  ;;  %898 = vmatpush1.bf16.msra.mxu1 %v1536_v35 }
  0x3a   : > { %689 = vmatprep.subr.bf16.mxu0 %v1589_v1  ;;  %899 = vmatprep.subr.bf16.mxu1 %v1589_v1 }
  0x3c   : > { %372 = vmatmul.mubr.bf16.gmra.mxu0 %v1738_v37  ;;  %524 = vmatmul.mubr.bf16.gmra.mxu1 %v1744_v40 }
  0x3d   : > { %690 = vmatpush1.bf16.msra.mxu0 %v1537_v39  ;;  %900 = vmatpush1.bf16.msra.mxu1 %v1538_v41 }
  0x3e   : > { %691 = vmatprep.subr.bf16.mxu0 %v1589_v1  ;;  %901 = vmatprep.subr.bf16.mxu1 %v1589_v1 }
  0x3f   : > { %1317 = vmatprep.mubr.msk.bf16.mxu0 %vm318_vm0, %v1751_v42  ;;  %1339 = vmatprep.mubr.msk.bf16.mxu1 %vm318_vm0, %v1754_v43 }
  0x41   : > { %692 = vmatpush1.bf16.msra.mxu0 %v1543_v44  ;;  %902 = vmatpush1.bf16.msra.mxu1 %v1544_v45 }
  0x42   : > { %693 = vmatprep.subr.bf16.mxu0 %v1589_v1  ;;  %903 = vmatprep.subr.bf16.mxu1 %v1589_v1 }
  0x44   : > { %380 = vmatmul.mubr.bf16.gmra.mxu0 %v1769_v46  ;;  %532 = vmatmul.mubr.bf16.gmra.mxu1 %v1778_v50 }
  0x45   : > { %694 = vmatpush1.bf16.msra.mxu0 %v1545_v49  ;;  %904 = vmatpush1.bf16.msra.mxu1 %v1546_v51 }
  0x46   : > { %695 = vmatprep.subr.bf16.mxu0 %v1589_v1  ;;  %905 = vmatprep.subr.bf16.mxu1 %v1589_v1 }
  0x47   : > { %1318 = vmatprep.mubr.msk.bf16.mxu0 %vm318_vm0, %v1786_v52  ;;  %1340 = vmatprep.mubr.msk.bf16.mxu1 %vm318_vm0, %v1789_v53 }
  0x49   : > { %696 = vmatpush1.bf16.msra.mxu0 %v1551_v54  ;;  %906 = vmatpush1.bf16.msra.mxu1 %v1552_v55 }
  0x4a   : > { %697 = vmatprep.subr.bf16.mxu0 %v1589_v1  ;;  %907 = vmatprep.subr.bf16.mxu1 %v1589_v1 }
  0x4c   : > { %388 = vmatmul.mubr.bf16.gmra.mxu0 %v1805_v56  ;;  %540 = vmatmul.mubr.bf16.gmra.mxu1 %v1810_v58 }
  0x4d   : > { %698 = vmatpush1.bf16.msra.mxu0 %v1553_v57  ;;  %908 = vmatpush1.bf16.msra.mxu1 %v1554_v59 }
  0x4e   : > { %699 = vmatprep.subr.bf16.mxu0 %v1589_v1  ;;  %909 = vmatprep.subr.bf16.mxu1 %v1589_v1 }
  0x4f   : > { %1379 = vmatprep.mubr.msk.bf16.mxu0 %vm318_vm0, %v1723_v33  ;;  %1421 = vmatprep.mubr.msk.bf16.mxu1 %vm318_vm0, %v1721_v32 }
  0x51   : > { %700 = vmatpush1.bf16.msra.mxu0 %v1559_v60  ;;  %910 = vmatpush1.bf16.msra.mxu1 %v1560_v61 }
  0x52   : > { %713 = vmatprep.subr.bf16.mxu0 %v1589_v1  ;;  %923 = vmatprep.subr.bf16.mxu1 %v1589_v1 }
  0x55   : > { %714 = vmatpush2.bf16.msra.mxu0 %v1561_v62  ;;  %924 = vmatpush2.bf16.msra.mxu1 %v1562_v63 }
  0x56   : > { %715 = vmatprep.subr.bf16.mxu0 %v1589_v1  ;;  %925 = vmatprep.subr.bf16.mxu1 %v1589_v1 }
  0x59   : > { %716 = vmatpush2.bf16.msra.mxu0 %v1563_v0  ;;  %926 = vmatpush2.bf16.msra.mxu1 %v1564_v2 }
  0x5a   : > { %1105 = vmatprep.subr.bf16.mxu0 %v1589_v1  ;;  %1479 = vmatprep.subr.bf16.mxu1 %v1589_v1 }
  0x5c   : > { %718 = vmatmul.mubr.bf16.vlgmr.msra.gmra.mxu0 %v1744_v40  ;;  %928 = vmatmul.mubr.bf16.vlgmr.msra.gmra.mxu1 %v1738_v37 }
  0x5d   : > { %1106 = vmatpush1.bf16.msra.mxu0 %v1565_v3  ;;  %1489 = vmatpush1.bf16.msra.mxu1 %v1565_v3 }
  0x5e   : > { %1107 = vmatprep.subr.bf16.mxu0 %v1589_v1  ;;  %1480 = vmatprep.subr.bf16.mxu1 %v1589_v1 }
  0x5f   : > { %1380 = vmatprep.mubr.msk.bf16.mxu0 %vm318_vm0, %v1754_v43  ;;  %1422 = vmatprep.mubr.msk.bf16.mxu1 %vm318_vm0, %v1751_v42 }
  0x61   : > { %1108 = vmatpush1.bf16.msra.mxu0 %v1566_v4  ;;  %1490 = vmatpush1.bf16.msra.mxu1 %v1566_v4 }
  0x62   : > { %1109 = vmatprep.subr.bf16.mxu0 %v1589_v1  ;;  %1481 = vmatprep.subr.bf16.mxu1 %v1589_v1 }
  0x64   : > { %726 = vmatmul.mubr.bf16.gmra.mxu0 %v1778_v50  ;;  %936 = vmatmul.mubr.bf16.gmra.mxu1 %v1769_v46 }
  0x65   : > { %1110 = vmatpush1.bf16.msra.mxu0 %v1567_v5  ;;  %1491 = vmatpush1.bf16.msra.mxu1 %v1567_v5 }
  0x66   : > { %1111 = vmatprep.subr.bf16.mxu0 %v1589_v1  ;;  %1482 = vmatprep.subr.bf16.mxu1 %v1589_v1 }
  0x67   : > { %1381 = vmatprep.mubr.msk.bf16.mxu0 %vm318_vm0, %v1789_v53  ;;  %1423 = vmatprep.mubr.msk.bf16.mxu1 %vm318_vm0, %v1786_v52 }
  0x69   : > { %1112 = vmatpush1.bf16.msra.mxu0 %v1568_v6  ;;  %1492 = vmatpush1.bf16.msra.mxu1 %v1568_v6 }
  0x6a   : > { %1113 = vmatprep.subr.bf16.mxu0 %v1589_v1  ;;  %1483 = vmatprep.subr.bf16.mxu1 %v1589_v1 }
  0x6c   : > { %734 = vmatmul.mubr.bf16.gmra.mxu0 %v1810_v58  ;;  %944 = vmatmul.mubr.bf16.gmra.mxu1 %v1805_v56 }
  0x6d   : > { %1114 = vmatpush1.bf16.msra.mxu0 %v1569_v8  ;;  %1493 = vmatpush1.bf16.msra.mxu1 %v1569_v8 }
  0x6e   : > { %1115 = vmatprep.subr.bf16.mxu0 %v1589_v1  ;;  %1484 = vmatprep.subr.bf16.mxu1 %v1589_v1 }
  0x6f   : > { %1382 = vmatprep.mubr.msk.bf16.mxu0 %vm318_vm0, %v1368_v10  ;;  %1424 = vmatprep.mubr.msk.bf16.mxu1 %vm318_vm0, %v1410_v11 }
  0x71   : > { %1116 = vmatpush1.bf16.msra.mxu0 %v1570_v12  ;;  %1494 = vmatpush1.bf16.msra.mxu1 %v1570_v12 }
  0x72   : > { %1117 = vmatprep.subr.bf16.mxu0 %v1589_v1  ;;  %1485 = vmatprep.subr.bf16.mxu1 %v1589_v1 }
  0x74   : > { %742 = vmatmul.mubr.bf16.gmra.mxu0 %v1367_v13  ;;  %952 = vmatmul.mubr.bf16.gmra.mxu1 %v1409_v15 }
  0x75   : > { %1118 = vmatpush1.bf16.msra.mxu0 %v1574_v14  ;;  %1495 = vmatpush1.bf16.msra.mxu1 %v1574_v14 }
  0x76   : > { %1119 = vmatprep.subr.bf16.mxu0 %v1589_v1  ;;  %1486 = vmatprep.subr.bf16.mxu1 %v1589_v1 }
  0x77   : > { %1463 = vmatprep.mubr.msk.bf16.mxu0 %vm318_vm0, %v1754_v43  ;;  %1465 = vmatprep.mubr.msk.bf16.mxu1 %vm318_vm0, %v1368_v10 }
  0x79   : > { %1120 = vmatpush1.bf16.msra.mxu0 %v1576_v16  ;;  %1496 = vmatpush1.bf16.msra.mxu1 %v1576_v16 }
  0x7a   : > { %1133 = vmatprep.subr.bf16.mxu0 %v1589_v1  ;;  %1487 = vmatprep.subr.bf16.mxu1 %v1589_v1 }
  0x7d   : > { %1134 = vmatpush2.bf16.msra.mxu0 %v1577_v17  ;;  %1497 = vmatpush2.bf16.msra.mxu1 %v1577_v17 }
  0x7e   : > { %1135 = vmatprep.subr.bf16.mxu0 %v1589_v1  ;;  %1488 = vmatprep.subr.bf16.mxu1 %v1589_v1 }
  0x81   : > { %1136 = vmatpush2.bf16.msra.mxu0 %v1578_v18  ;;  %1498 = vmatpush2.bf16.msra.mxu1 %v1578_v18 }
  0x84   : > { %1138 = vmatmul.mubr.bf16.vlgmr.msra.gmra.mxu0 %v1778_v50  ;;  %1154 = vmatmul.mubr.bf16.vlgmr.msra.gmra.mxu1 %v1367_v13 }
  0x85   : > { %1464 = vmatprep.mubr.msk.bf16.mxu0 %vm318_vm0, %v1789_v53  ;;  %1466 = vmatprep.mubr.msk.bf16.mxu1 %vm318_vm0, %v1452_v20 }
  0x8c   : > { %1146 = vmatmul.mubr.bf16.gmra.mxu0 %v1810_v58  ;;  %1162 = vmatmul.mubr.bf16.gmra.mxu1 %v1451_v21 }
  0xf4   : > { %v365_v22 = vpop.f32.mrf.mxu0  ;;  %v517_v23 = vpop.f32.mrf.mxu1 }
  0xf5   : > { %v1926_v24 = vadd.f32 %v517_v23, %v365_v22 }
  0xf6   : > { %v367_v1 = vpop.f32.mrf.mxu0  ;;  %v519_v25 = vpop.f32.mrf.mxu1 }
  0xf8   : > { %v368_v26 = vpop.f32.mrf.mxu0  ;;  %v520_v27 = vpop.f32.mrf.mxu1 }
  0xf9   : > { %v1928_v28 = vadd.f32 %v520_v27, %v368_v26 }
  0xfa   : > { %v370_v29 = vpop.f32.mrf.mxu0  ;;  %v522_v30 = vpop.f32.mrf.mxu1 }
  0xfc   : > { %v373_v31 = vpop.f32.mrf.mxu0  ;;  %v525_v32 = vpop.f32.mrf.mxu1 }
  0xfd   : > { %v1930_v33 = vadd.f32 %v525_v32, %v373_v31 }
  0xfe   : > { %v375_v34 = vpop.f32.mrf.mxu0  ;;  %v527_v35 = vpop.f32.mrf.mxu1 }
 0x100   : > { %v376_v36 = vpop.f32.mrf.mxu0  ;;  %v528_v37 = vpop.f32.mrf.mxu1 }
 0x101   : > { %v1932_v38 = vadd.f32 %v528_v37, %v376_v36 }
 0x102   : > { %v378_v39 = vpop.f32.mrf.mxu0  ;;  %v530_v40 = vpop.f32.mrf.mxu1 }
 0x104   : > { %v381_v41 = vpop.f32.mrf.mxu0  ;;  %v533_v42 = vpop.f32.mrf.mxu1 }
 0x105   : > { %v534_v26 = vadd.f32 %v533_v42, %v381_v41 }
 0x106   : > { %v383_v43 = vpop.f32.mrf.mxu0  ;;  %v535_v44 = vpop.f32.mrf.mxu1 }
 0x108   : > { %v384_v45 = vpop.f32.mrf.mxu0  ;;  %v536_v46 = vpop.f32.mrf.mxu1 }
 0x109   : > { %v537_v27 = vadd.f32 %v536_v46, %v384_v45 }
 0x10a   : > { %v386_v47 = vpop.f32.mrf.mxu0  ;;  %v538_v48 = vpop.f32.mrf.mxu1 }
 0x10c   : > { %v389_v49 = vpop.f32.mrf.mxu0  ;;  %v541_v50 = vpop.f32.mrf.mxu1 }
 0x10d   : > { %v542_v42 = vadd.f32 %v541_v50, %v389_v49 }
 0x10e   : > { %v391_v51 = vpop.f32.mrf.mxu0  ;;  %v543_v52 = vpop.f32.mrf.mxu1 }
 0x110   : > { %v392_v53 = vpop.f32.mrf.mxu0  ;;  %v544_v54 = vpop.f32.mrf.mxu1 }
 0x111   : > { %v545_v45 = vadd.f32 %v544_v54, %v392_v53 }
 0x112   : > { %v394_v55 = vpop.f32.mrf.mxu0  ;;  %v546_v56 = vpop.f32.mrf.mxu1 }
 0x11c   : > { %v719_v57 = vpop.f32.mrf.mxu0  ;;  %v929_v58 = vpop.f32.mrf.mxu1 }
 0x11d   : > { %v750_v29 = vadd.f32 %v719_v57, %v1926_v24 }
 0x11e   : > { %v721_v59 = vpop.f32.mrf.mxu0  ;;  %v931_v60 = vpop.f32.mrf.mxu1 }
 0x11f   : > { %v960_v37 = vadd.f32 %v929_v58, %v750_v29 }
 0x120   : > { %v722_v61 = vpop.f32.mrf.mxu0  ;;  %v932_v62 = vpop.f32.mrf.mxu1 }
 0x121   : > { %v751_v30 = vadd.f32 %v722_v61, %v1928_v28  ;;  %v1467_v28 = vld [vmem:[%s1954_s2] ss:$0 sm:$0xff] }
 0x122   : > { %v724_v63 = vpop.f32.mrf.mxu0  ;;  %v934_v0 = vpop.f32.mrf.mxu1 }
 0x123   : > { %v961_v39 = vadd.f32 %v932_v62, %v751_v30 }
 0x124   : > { %v727_v2 = vpop.f32.mrf.mxu0  ;;  %v937_v3 = vpop.f32.mrf.mxu1 }
 0x125   : > { %v752_v55 = vadd.f32 %v727_v2, %v1930_v33 }
 0x126   : > { %v729_v4 = vpop.f32.mrf.mxu0  ;;  %v939_v5 = vpop.f32.mrf.mxu1 }
 0x127   : > { %v962_v63 = vadd.f32 %v937_v3, %v752_v55 }
 0x128   : > { %v730_v6 = vpop.f32.mrf.mxu0  ;;  %v940_v7 = vpop.f32.mrf.mxu1 }
 0x129   : > { %v753_v56 = vadd.f32 %v730_v6, %v1932_v38 }
 0x12a   : > { %v732_v8 = vpop.f32.mrf.mxu0  ;;  %v942_v9 = vpop.f32.mrf.mxu1 }
 0x12b   : > { %v963_v33 = vadd.f32 %v940_v7, %v753_v56 }
 0x12c   : > { %v735_v10 = vpop.f32.mrf.mxu0  ;;  %v945_v11 = vpop.f32.mrf.mxu1 }
 0x12d   : > { %v754_v31 = vadd.f32 %v735_v10, %v534_v26 }
 0x12e   : > { %v737_v12 = vpop.f32.mrf.mxu0  ;;  %v947_v13 = vpop.f32.mrf.mxu1 }
 0x12f   : > { %v964_v43 = vadd.f32 %v945_v11, %v754_v31 }
 0x130   : > { %v738_v14 = vpop.f32.mrf.mxu0  ;;  %v948_v15 = vpop.f32.mrf.mxu1 }
 0x131   : > { %v755_v32 = vadd.f32 %v738_v14, %v537_v27 }
 0x132   : > { %v740_v16 = vpop.f32.mrf.mxu0  ;;  %v950_v17 = vpop.f32.mrf.mxu1 }
 0x133   : > { %v965_v44 = vadd.f32 %v948_v15, %v755_v32 }
 0x134   : > { %v743_v18 = vpop.f32.mrf.mxu0  ;;  %v953_v19 = vpop.f32.mrf.mxu1 }
 0x135   : > { %v756_v59 = vadd.f32 %v743_v18, %v542_v42 }
 0x136   : > { %v745_v20 = vpop.f32.mrf.mxu0  ;;  %v955_v21 = vpop.f32.mrf.mxu1 }
 0x137   : > { %v966_v2 = vadd.f32 %v953_v19, %v756_v59 }
 0x138   : > { %v746_v22 = vpop.f32.mrf.mxu0  ;;  %v956_v23 = vpop.f32.mrf.mxu1 }
 0x139   : > { %v757_v60 = vadd.f32 %v746_v22, %v545_v45 }
 0x13a   : > { %v748_v1 = vpop.f32.mrf.mxu0  ;;  %v958_v25 = vpop.f32.mrf.mxu1 }
 0x13b   : > { %v967_v4 = vadd.f32 %v956_v23, %v757_v60 }
 0x144   : > { %v1139_v34 = vpop.f32.mrf.mxu0  ;;  %v1155_v35 = vpop.f32.mrf.mxu1 }
 0x145   : > { %v1170_v48 = vadd.f32 %v1139_v34, %v960_v37  ;;  %v1174_v24 = vadd.f32 %v1155_v35, %v964_v43 }
 0x146   : > { %v1141_v36 = vpop.f32.mrf.mxu0  ;;  %v1157_v40 = vpop.f32.mrf.mxu1 }
 0x148   : > { %v1142_v47 = vpop.f32.mrf.mxu0  ;;  %v1158_v41 = vpop.f32.mrf.mxu1 }
 0x149   : > { %v1171_v51 = vadd.f32 %v1142_v47, %v961_v39  ;;  %v1175_v46 = vadd.f32 %v1158_v41, %v965_v44 }
 0x14a   : > { %v1144_v52 = vpop.f32.mrf.mxu0  ;;  %v1160_v58 = vpop.f32.mrf.mxu1 }
 0x14b   : > { %v1178_v57 = vmax.f32 %v1170_v48, %v1171_v51  ;;  %v1180_v61 = vmax.f32 %v1174_v24, %v1175_v46 }
 0x14c   : > { %v1147_v62 = vpop.f32.mrf.mxu0  ;;  %v1163_v50 = vpop.f32.mrf.mxu1 }
 0x14d   : > { %v1189_v49 = vadd.f32 %v1467_v28, %v1178_v57  ;;  %v1191_v53 = vadd.f32 %v1467_v28, %v1180_v61  ;;  %v1172_v8 = vadd.f32 %v1147_v62, %v962_v63  ;;  %v1176_v11 = vadd.f32 %v1163_v50, %v966_v2 }
 0x14e   : > { %v1149_v54 = vpop.f32.mrf.mxu0  ;;  %v1165_v38 = vpop.f32.mrf.mxu1 }
 0x14f   : > { %v1475_v0 = vpack.c.bf16 %v1189_v49, %v1189_v49  ;;  %v1477_v5 = vpack.c.bf16 %v1191_v53, %v1191_v53 }
 0x150   : > { %v1150_v6 = vpop.f32.mrf.mxu0  ;;  %v1166_v10 = vpop.f32.mrf.mxu1 }
 0x151   : > { %1210 = vst.msk [vmem:[%s170_s25] sm:$0xf] %vm1209_vm1, %v1475_v0  ;;  %v1173_v9 = vadd.f32 %v1150_v6, %v963_v33  ;;  %1212 = vst.msk [vmem:[%s170_s25 + $0x8] sm:$0xf] %vm1209_vm1, %v1477_v5  ;;  %v1177_v12 = vadd.f32 %v1166_v10, %v967_v4 }
 0x152   : > { %v1152_v13 = vpop.f32.mrf.mxu0  ;;  %v1168_v15 = vpop.f32.mrf.mxu1 }
 0x153   : > { %v1179_v14 = vmax.f32 %v1172_v8, %v1173_v9  ;;  %v1181_v3 = vmax.f32 %v1176_v11, %v1177_v12 }
 0x155   : > { %v1190_v7 = vadd.f32 %v1467_v28, %v1179_v14  ;;  %v1192_v16 = vadd.f32 %v1467_v28, %v1181_v3 }
 0x157   : > { %v1476_v17 = vpack.c.bf16 %v1190_v7, %v1190_v7  ;;  %v1478_v18 = vpack.c.bf16 %v1192_v16, %v1192_v16 }
 0x159   : > { %1211 = vst.msk [vmem:[%s170_s25 + $0x4] sm:$0xf] %vm1209_vm1, %v1476_v17  ;;  %1213 = vst.msk [vmem:[%s170_s25 + $0xc] sm:$0xf] %vm1209_vm1, %v1478_v18 }
 0x15a PF: > { %s13_s12 = sadd.s32 1, %s1587_s12  }
 0x15b   : > { %p10_p4 = scmp.ge.s32.totalorder %s13_s12, 4  }
 0x15d   :  { %12 = sbr.rel (!%p10_p4) target bundleno = 1 (0x1), region = 66 }

// kernel: network_forward.7
= control target key start
LH: loop header
LB: loop body
LE: loop exit
PB: predicated region body
PF: predicated region fallthrough
CT: control target
= control target key end

     0   :  { %vm1131_vm0 = vmmov 0   ;;  %s1399_s1 = inlined_call_operand.vmem [shape: bf16[1024,128], index: 1, kind: input, shape index: {}]   ;;  %s1400_s0 = inlined_call_operand.vmem [shape: bf16[8,1024], index: 0, kind: input, shape index: {}]   ;;  %s1401_s3 = inlined_call_operand.vmem [shape: bf16[128,128], index: 3, kind: input, shape index: {}]   ;;  %s1402_s2 = inlined_call_operand.vmem [shape: f32[1,128], index: 2, kind: input, shape index: {}]   ;;  %s1403_s4 = inlined_call_operand.vmem [shape: f32[1,128], index: 4, kind: input, shape index: {}]   ;;  %s1404_s5 = inlined_call_operand.vmem [shape: f32[8,128], index: 5, kind: output, shape index: {}]  }
   0x1   :  { %v1050_v0 = vld [vmem:[%s1399_s1 + $0x78] sm:$0xff]   ;;  %v1054_v4 = vld [vmem:[%s1399_s1 + $0x70] sm:$0xff]   ;;  %v1058_v8 = vld [vmem:[%s1399_s1 + $0x68] sm:$0xff]  }
   0x2   :  { %v1051_v1 = vld [vmem:[%s1399_s1 + $0xf8] sm:$0xff]   ;;  %931 = vmatprep.subr.bf16.mxu0 %v1050_v0  ;;  %v1055_v5 = vld [vmem:[%s1399_s1 + $0xf0] sm:$0xff]   ;;  %v1059_v9 = vld [vmem:[%s1399_s1 + $0xe8] sm:$0xff]  }
   0x3   :  { %v1052_v2 = vld [vmem:[%s1399_s1 + $0x38] sm:$0xff]   ;;  %953 = vmatprep.subr.bf16.mxu1 %v1051_v1  ;;  %v1056_v6 = vld [vmem:[%s1399_s1 + $0x30] sm:$0xff]   ;;  %v1060_v10 = vld [vmem:[%s1399_s1 + $0x28] sm:$0xff]  }
   0x4   :  { %v1053_v3 = vld [vmem:[%s1399_s1 + $0xb8] sm:$0xff]   ;;  %932 = vmatpush3.bf16.msra.mxu0 %v1052_v2  ;;  %v1057_v7 = vld [vmem:[%s1399_s1 + $0xb0] sm:$0xff]   ;;  %v1061_v11 = vld [vmem:[%s1399_s1 + $0xa8] sm:$0xff]  }
   0x5   :  { %954 = vmatpush3.bf16.msra.mxu1 %v1053_v3  ;;  %933 = vmatprep.subr.bf16.mxu0 %v1054_v4  ;;  %v1062_v12 = vld [vmem:[%s1399_s1 + $0x60] sm:$0xff]   ;;  %v1066_v16 = vld [vmem:[%s1399_s1 + $0x58] sm:$0xff]   ;;  %v1070_v20 = vld [vmem:[%s1399_s1 + $0x50] sm:$0xff]  }
   0x6   :  { %955 = vmatprep.subr.bf16.mxu1 %v1055_v5  ;;  %v1063_v13 = vld [vmem:[%s1399_s1 + $0xe0] sm:$0xff]   ;;  %v1067_v17 = vld [vmem:[%s1399_s1 + $0xd8] sm:$0xff]   ;;  %v1071_v21 = vld [vmem:[%s1399_s1 + $0xd0] sm:$0xff]  }
   0x7   :  { %v1064_v14 = vld [vmem:[%s1399_s1 + $0x20] sm:$0xff]   ;;  %v1068_v18 = vld [vmem:[%s1399_s1 + $0x18] sm:$0xff]   ;;  %v1072_v22 = vld [vmem:[%s1399_s1 + $0x10] sm:$0xff]  }
   0x8   :  { %934 = vmatpush3.bf16.msra.mxu0 %v1056_v6  ;;  %v1065_v15 = vld [vmem:[%s1399_s1 + $0xa0] sm:$0xff]   ;;  %v1069_v19 = vld [vmem:[%s1399_s1 + $0x98] sm:$0xff]   ;;  %v1073_v23 = vld [vmem:[%s1399_s1 + $0x90] sm:$0xff]  }
   0x9   :  { %956 = vmatpush3.bf16.msra.mxu1 %v1057_v7  ;;  %935 = vmatprep.subr.bf16.mxu0 %v1058_v8  ;;  %v1074_v24 = vld [vmem:[%s1399_s1 + $0x48] sm:$0xff]   ;;  %v1078_v28 = vld [vmem:[%s1399_s1 + $0x40] sm:$0xff]   ;;  %v1086_v38 = vld [vmem:[%s1399_s1 + $0x178] sm:$0xff]  }
   0xa   :  { %957 = vmatprep.subr.bf16.mxu1 %v1059_v9  ;;  %v1075_v25 = vld [vmem:[%s1399_s1 + $0xc8] sm:$0xff]   ;;  %v1079_v29 = vld [vmem:[%s1399_s1 + $0xc0] sm:$0xff]   ;;  %v1087_v39 = vld [vmem:[%s1399_s1 + $0x1f8] sm:$0xff]  }
   0xb   :  { %v1076_v26 = vld [vmem:[%s1399_s1 + $0x8] sm:$0xff]   ;;  %v1080_v30 = vld [vmem:[%s1399_s1] sm:$0xff]   ;;  %v1088_v40 = vld [vmem:[%s1399_s1 + $0x138] sm:$0xff]  }
   0xc   :  { %936 = vmatpush3.bf16.msra.mxu0 %v1060_v10  ;;  %v1077_v27 = vld [vmem:[%s1399_s1 + $0x88] sm:$0xff]   ;;  %v1081_v31 = vld [vmem:[%s1399_s1 + $0x80] sm:$0xff]   ;;  %v1089_v41 = vld [vmem:[%s1399_s1 + $0x1b8] sm:$0xff]  }
   0xd   :  { %958 = vmatpush3.bf16.msra.mxu1 %v1061_v11  ;;  %937 = vmatprep.subr.bf16.mxu0 %v1062_v12  ;;  %v21_v32 = vld [vmem:[%s1400_s0] sm:$0xff]  ;;  %v22_v33 = vld [vmem:[%s1400_s0 + $0x8] sm:$0xff]  ;;  %v1090_v42 = vld [vmem:[%s1399_s1 + $0x170] sm:$0xff]   ;;  %v1130_v12 = vmov 0.0  }
   0xe   :  { %959 = vmatprep.subr.bf16.mxu1 %v1063_v13  ;;  %v850_v34 = vcombine.low %v21_v32, %v21_v32  ;;  %v851_v35 = vcombine.high %v21_v32, %v21_v32  ;;  %v852_v36 = vcombine.low %v22_v33, %v22_v33  ;;  %v853_v37 = vcombine.high %v22_v33, %v22_v33  ;;  %v1091_v43 = vld [vmem:[%s1399_s1 + $0x1f0] sm:$0xff]   ;;  %v1094_v46 = vld [vmem:[%s1399_s1 + $0x168] sm:$0xff]   ;;  %v1098_v50 = vld [vmem:[%s1399_s1 + $0x160] sm:$0xff]  }
   0xf   :  { %v1092_v44 = vld [vmem:[%s1399_s1 + $0x130] sm:$0xff]   ;;  %v1095_v47 = vld [vmem:[%s1399_s1 + $0x1e8] sm:$0xff]   ;;  %v1099_v51 = vld [vmem:[%s1399_s1 + $0x1e0] sm:$0xff]  }
  0x10   :  { %938 = vmatpush3.bf16.msra.mxu0 %v1064_v14  ;;  %604 = vmatprep.mubr.bf16.mxu0 %v851_v35  ;;  %v1093_v45 = vld [vmem:[%s1399_s1 + $0x1b0] sm:$0xff]   ;;  %v1096_v48 = vld [vmem:[%s1399_s1 + $0x128] sm:$0xff]   ;;  %v1100_v52 = vld [vmem:[%s1399_s1 + $0x120] sm:$0xff]  }
  0x11   :  { %960 = vmatpush3.bf16.msra.mxu1 %v1065_v15  ;;  %939 = vmatprep.subr.bf16.mxu0 %v1066_v16  ;;  %v1097_v49 = vld [vmem:[%s1399_s1 + $0x1a8] sm:$0xff]   ;;  %v1101_v53 = vld [vmem:[%s1399_s1 + $0x1a0] sm:$0xff]   ;;  %v1102_v54 = vld [vmem:[%s1399_s1 + $0x158] sm:$0xff]  }
  0x12   :  { %961 = vmatprep.subr.bf16.mxu1 %v1067_v17  ;;  %644 = vmatprep.mubr.bf16.mxu1 %v853_v37  ;;  %v1103_v55 = vld [vmem:[%s1399_s1 + $0x1d8] sm:$0xff]   ;;  %v1106_v58 = vld [vmem:[%s1399_s1 + $0x150] sm:$0xff]   ;;  %v1110_v62 = vld [vmem:[%s1399_s1 + $0x148] sm:$0xff]  }
  0x13   :  { %v1104_v56 = vld [vmem:[%s1399_s1 + $0x118] sm:$0xff]   ;;  %v1107_v59 = vld [vmem:[%s1399_s1 + $0x1d0] sm:$0xff]   ;;  %v1111_v63 = vld [vmem:[%s1399_s1 + $0x1c8] sm:$0xff]  }
  0x14   :  { %940 = vmatpush3.bf16.msra.mxu0 %v1068_v18  ;;  %v1105_v57 = vld [vmem:[%s1399_s1 + $0x198] sm:$0xff]   ;;  %v1108_v60 = vld [vmem:[%s1399_s1 + $0x110] sm:$0xff]   ;;  %v1112_v0 = vld [vmem:[%s1399_s1 + $0x108] sm:$0xff]  }
  0x15   :  { %962 = vmatpush3.bf16.msra.mxu1 %v1069_v19  ;;  %941 = vmatprep.subr.bf16.mxu0 %v1070_v20  ;;  %v1109_v61 = vld [vmem:[%s1399_s1 + $0x190] sm:$0xff]   ;;  %v1113_v1 = vld [vmem:[%s1399_s1 + $0x188] sm:$0xff]   ;;  %v1114_v2 = vld [vmem:[%s1399_s1 + $0x140] sm:$0xff]  }
  0x16   :  { %963 = vmatprep.subr.bf16.mxu1 %v1071_v21  ;;  %v1115_v3 = vld [vmem:[%s1399_s1 + $0x1c0] sm:$0xff]   ;;  %v23_v6 = vld [vmem:[%s1400_s0 + $0x10] sm:$0xff]  ;;  %v24_v9 = vld [vmem:[%s1400_s0 + $0x18] sm:$0xff] }
  0x17   :  { %v1116_v4 = vld [vmem:[%s1399_s1 + $0x100] sm:$0xff]   ;;  %v854_v7 = vcombine.low %v23_v6, %v23_v6  ;;  %v855_v8 = vcombine.high %v23_v6, %v23_v6  ;;  %v856_v10 = vcombine.low %v24_v9, %v24_v9  ;;  %v857_v11 = vcombine.high %v24_v9, %v24_v9  ;;  %v1122_v13 = vld [vmem:[%s1401_s3 + $0x38] sm:$0xff]   ;;  %v1123_v14 = vld [vmem:[%s1401_s3 + $0x30] sm:$0xff]  }
  0x18   :  { %942 = vmatpush3.bf16.msra.mxu0 %v1072_v22  ;;  %v1117_v5 = vld [vmem:[%s1399_s1 + $0x180] sm:$0xff]   ;;  %v1124_v15 = vld [vmem:[%s1401_s3 + $0x28] sm:$0xff]   ;;  %v1126_v17 = vld [vmem:[%s1401_s3 + $0x18] sm:$0xff]  }
  0x19   :  { %964 = vmatpush3.bf16.msra.mxu1 %v1073_v23  ;;  %943 = vmatprep.subr.bf16.mxu0 %v1074_v24  ;;  %v1125_v16 = vld [vmem:[%s1401_s3 + $0x20] sm:$0xff]   ;;  %v1127_v18 = vld [vmem:[%s1401_s3 + $0x10] sm:$0xff]   ;;  %v1128_v19 = vld [vmem:[%s1401_s3 + $0x8] sm:$0xff]  }
  0x1a   :  { %965 = vmatprep.subr.bf16.mxu1 %v1075_v25  ;;  %v1129_v20 = vld [vmem:[%s1401_s3] sm:$0xff]  }
  0x1c   :  { %944 = vmatpush3.bf16.msra.mxu0 %v1076_v26 }
  0x1d   :  { %966 = vmatpush3.bf16.msra.mxu1 %v1077_v27  ;;  %945 = vmatprep.subr.bf16.mxu0 %v1078_v28 }
  0x1e   :  { %967 = vmatprep.subr.bf16.mxu1 %v1079_v29 }
  0x20   :  { %946 = vmatpush3.bf16.msra.mxu0 %v1080_v30  ;;  %v849_v30 = vld [vmem:[%s1402_s2] ss:$0 sm:$0xff] }
  0x21   :  { %968 = vmatpush3.bf16.msra.mxu1 %v1081_v31  ;;  %975 = vmatprep.subr.bf16.mxu0 %v1086_v38 }
  0x22   :  { %997 = vmatprep.subr.bf16.mxu1 %v1087_v39 }
  0x23   :  { %605 = vmatmul.mubr.bf16.vlgmr.msra.gmra.mxu0 %v850_v34 }
  0x24   :  { %645 = vmatmul.mubr.bf16.vlgmr.msra.gmra.mxu1 %v852_v36  ;;  %976 = vmatpush3.bf16.msra.mxu0 %v1088_v40 }
  0x25   :  { %998 = vmatpush3.bf16.msra.mxu1 %v1089_v41  ;;  %977 = vmatprep.subr.bf16.mxu0 %v1090_v42 }
  0x26   :  { %999 = vmatprep.subr.bf16.mxu1 %v1091_v43  ;;  %684 = vmatprep.mubr.bf16.mxu0 %v855_v8 }
  0x27   :  { %724 = vmatprep.mubr.bf16.mxu1 %v857_v11 }
  0x28   :  { %978 = vmatpush3.bf16.msra.mxu0 %v1092_v44 }
  0x29   :  { %1000 = vmatpush3.bf16.msra.mxu1 %v1093_v45  ;;  %979 = vmatprep.subr.bf16.mxu0 %v1094_v46 }
  0x2a   :  { %1001 = vmatprep.subr.bf16.mxu1 %v1095_v47  ;;  %v922_v47 = vld [vmem:[%s1403_s4] ss:$0 sm:$0xff] }
  0x2c   :  { %980 = vmatpush3.bf16.msra.mxu0 %v1096_v48 }
  0x2d   :  { %1002 = vmatpush3.bf16.msra.mxu1 %v1097_v49  ;;  %981 = vmatprep.subr.bf16.mxu0 %v1098_v50 }
  0x2e   :  { %1003 = vmatprep.subr.bf16.mxu1 %v1099_v51 }
  0x30   :  { %982 = vmatpush3.bf16.msra.mxu0 %v1100_v52 }
  0x31   :  { %1004 = vmatpush3.bf16.msra.mxu1 %v1101_v53  ;;  %983 = vmatprep.subr.bf16.mxu0 %v1102_v54 }
  0x32   :  { %1005 = vmatprep.subr.bf16.mxu1 %v1103_v55 }
  0x34   :  { %984 = vmatpush3.bf16.msra.mxu0 %v1104_v56 }
  0x35   :  { %1006 = vmatpush3.bf16.msra.mxu1 %v1105_v57  ;;  %985 = vmatprep.subr.bf16.mxu0 %v1106_v58 }
  0x36   :  { %1007 = vmatprep.subr.bf16.mxu1 %v1107_v59 }
  0x38   :  { %986 = vmatpush3.bf16.msra.mxu0 %v1108_v60 }
  0x39   :  { %1008 = vmatpush3.bf16.msra.mxu1 %v1109_v61  ;;  %987 = vmatprep.subr.bf16.mxu0 %v1110_v62 }
  0x3a   :  { %1009 = vmatprep.subr.bf16.mxu1 %v1111_v63 }
  0x3c   :  { %988 = vmatpush3.bf16.msra.mxu0 %v1112_v0 }
  0x3d   :  { %1010 = vmatpush3.bf16.msra.mxu1 %v1113_v1  ;;  %989 = vmatprep.subr.bf16.mxu0 %v1114_v2 }
  0x3e   :  { %1011 = vmatprep.subr.bf16.mxu1 %v1115_v3 }
  0x40   :  { %990 = vmatpush3.bf16.msra.mxu0 %v1116_v4 }
  0x41   :  { %1012 = vmatpush3.bf16.msra.mxu1 %v1117_v5  ;;  %1028 = vmatprep.subr.bf16.mxu0 %v1130_v12 }
  0x43   :  { %685 = vmatmul.mubr.bf16.vlgmr.msra.gmra.mxu0 %v854_v7 }
  0x44   :  { %725 = vmatmul.mubr.bf16.vlgmr.msra.gmra.mxu1 %v856_v10  ;;  %1029 = vmatpush3.bf16.msra.mxu0 %v1122_v13 }
  0x45   :  { %1030 = vmatprep.subr.bf16.mxu0 %v1130_v12  ;;  %1044 = vmatprep.mubr.msk.bf16.mxu0 %vm1131_vm0, %v1130_v12 }
  0x48   :  { %1031 = vmatpush3.bf16.msra.mxu0 %v1123_v14 }
  0x49   :  { %1032 = vmatprep.subr.bf16.mxu0 %v1130_v12 }
  0x4c   :  { %1033 = vmatpush3.bf16.msra.mxu0 %v1124_v15 }
  0x4d   :  { %1034 = vmatprep.subr.bf16.mxu0 %v1130_v12 }
  0x50   :  { %1035 = vmatpush3.bf16.msra.mxu0 %v1125_v16 }
  0x51   :  { %1036 = vmatprep.subr.bf16.mxu0 %v1130_v12 }
  0x54   :  { %1037 = vmatpush3.bf16.msra.mxu0 %v1126_v17 }
  0x55   :  { %1038 = vmatprep.subr.bf16.mxu0 %v1130_v12 }
  0x58   :  { %1039 = vmatpush3.bf16.msra.mxu0 %v1127_v18 }
  0x59   :  { %1040 = vmatprep.subr.bf16.mxu0 %v1130_v12 }
  0x5c   :  { %1041 = vmatpush3.bf16.msra.mxu0 %v1128_v19 }
  0x5d   :  { %1042 = vmatprep.subr.bf16.mxu0 %v1130_v12 }
  0x60   :  { %1043 = vmatpush3.bf16.msra.mxu0 %v1129_v20 }
  0xe3   :  { %v947_v21 = vpop.f32.mrf.mxu0 }
  0xe4   :  { %v969_v22 = vpop.f32.mrf.mxu1 }
  0xe5   :  { %v948_v23 = vpop.f32.mrf.mxu0 }
  0xe6   :  { %v970_v24 = vpop.f32.mrf.mxu1  ;;  %v949_v29 = vadd.f32 %v948_v23, %v947_v21 }
  0xe7   :  { %v950_v25 = vpop.f32.mrf.mxu0  ;;  %v971_v32 = vadd.f32 %v970_v24, %v969_v22 }
  0xe8   :  { %v972_v26 = vpop.f32.mrf.mxu1  ;;  %v607_v31 = vadd.f32 %v949_v29, %v849_v30 }
  0xe9   :  { %v951_v27 = vpop.f32.mrf.mxu0 }
  0xea   :  { %v973_v28 = vpop.f32.mrf.mxu1  ;;  %v647_v37 = vadd.f32 %v971_v32, %v607_v31 }
 0x103   :  { %v991_v33 = vpop.f32.mrf.mxu0 }
 0x104   :  { %v1013_v34 = vpop.f32.mrf.mxu1 }
 0x105   :  { %v992_v35 = vpop.f32.mrf.mxu0 }
 0x106   :  { %v1014_v36 = vpop.f32.mrf.mxu1  ;;  %v993_v38 = vadd.f32 %v992_v35, %v991_v33 }
 0x107   :  { %v994_v39 = vpop.f32.mrf.mxu0  ;;  %v1015_v42 = vadd.f32 %v1014_v36, %v1013_v34 }
 0x108   :  { %v1016_v40 = vpop.f32.mrf.mxu1  ;;  %v687_v41 = vadd.f32 %v993_v38, %v647_v37 }
 0x109   :  { %v995_v43 = vpop.f32.mrf.mxu0 }
 0x10a   :  { %v1017_v44 = vpop.f32.mrf.mxu1  ;;  %v727_v45 = vadd.f32 %v1015_v42, %v687_v41 }
 0x10c   :  { %v732_v46 = vpack.c.bf16 %v727_v45, %v727_v45 }
 0x10e   :  { %1045 = vmatmul.mubr.bf16.vlgmr.msra.gmra.mxu0 %v732_v46 }
 0x1ce   :  { %v838_v48 = vpop.f32.mrf.mxu0 }
 0x1cf   :  { %v839_v49 = vadd.f32 %v922_v47, %v838_v48 }
 0x1d0   :  { %v1046_v50 = vpop.f32.mrf.mxu0 }
 0x1d1   :  { %844 = vst [vmem:[%s1404_s5] sm:$0xff] %v839_v49 }
 0x1d2   :  { %v841_v51 = vpop.f32.mrf.mxu0 }
 0x1d4   :  { %v1047_v52 = vpop.f32.mrf.mxu0 }

</bundles_post_ra>
